<compile_context>
chip_gen: v5e
topology: v5e:2x2
jax: 0.10.0
libtpu: 0.0.40
codegen_flags: <defaults>
</compile_context>

<pallas_src>
import functools

import numpy as np

import jax
import jax.numpy as jnp
from jax import lax
from jax.experimental import pallas as pl
from jax.experimental.pallas import tpu as pltpu


C1 = 16   # conv1 output channels (module spec: Conv2d(1, 16, 3, padding=1))
C2 = 32   # conv2 output channels (module spec: Conv2d(16, 32, 3, padding=1))

MATMUL_DTYPE = jnp.bfloat16   # MXU operand dtype for conv2 / FC (f32 accumulate)


# ---------------------------------------------------------------------------
# Kernel
# ---------------------------------------------------------------------------
def _fused_forward_kernel(x_ref, g1_ref, s1_ref, b1_ref, g2_ref, s2_ref, b2_ref,
                          wf_ref, bf_ref, o_ref, *, c1, c2):
    """Whole forward pass for one batch tile of BB samples, fully VMEM-resident.

    x_ref  : (BB, H, W)            input samples (W on lanes)
    g1_ref : (3, W, W*c1)          conv1 banded weights, one slab per row-shift dy
    s1_ref : (1, W*c1)  b1_ref: (1, W*c1)   folded BN1 scale / bias, lane-tiled
    g2_ref : (3, W*c1, W1*c2)      conv2 banded weights over the "wide" pooled
                                   layout (bf16)
    s2_ref : (1, W1*c2) b2_ref: (1, W1*c2)
    wf_ref : (H2, W1*c2, hidden)   FC weights, NCHW-flatten order folded in (bf16)
    bf_ref : (1, hidden)
    o_ref  : (BB, hidden)

    Activation layout: (rows, x*c + c) i.e. pixels of one image row and all
    channels interleaved on the lane axis (lane-dense).  After each 2x2 pool
    the data stays "wide" (valid values in even c-blocks, garbage in odd
    blocks); the following weight matrix has all-zero rows for the odd blocks,
    so the garbage contributes exactly 0.
    """
    BB, H, W = x_ref.shape
    H1, H2 = H // 2, H // 4
    Wc1 = W * c1            # conv1 output lane width
    Wc2 = (W // 2) * c2     # conv2 output lane width
    hidden = bf_ref.shape[1]
    f32 = jnp.float32

    # ---- conv1 + folded BN + ReLU: 3 row-shifted banded MXU matmuls --------
    x = x_ref[...]                                         # (BB, H, W)
    zr = jnp.zeros((BB, 1, W), f32)
    xp = jnp.concatenate([zr, x, zr], axis=1)              # y-padding only;
    acc1 = jnp.zeros((BB * H, Wc1), f32)                   # x-padding lives in g1
    for dy in range(3):                                    # static unroll
        lhs = xp[:, dy:dy + H, :].reshape(BB * H, W)
        acc1 = acc1 + jnp.dot(lhs, g1_ref[dy], preferred_element_type=f32)
    y1 = jnp.maximum(acc1 * s1_ref[...] + b1_ref[...], 0.0)   # lane-dense VPU

    # ---- 2x2 max pool (rows via sublane split, cols via c1-block rotate) ---
    y1 = y1.reshape(BB, H1, 2, Wc1)
    y1 = jnp.maximum(y1[:, :, 0, :], y1[:, :, 1, :])       # (BB, H1, Wc1)
    y1s = jnp.concatenate([y1[:, :, c1:], y1[:, :, :c1]], axis=-1)
    h1w = jnp.maximum(y1, y1s)      # "wide": pooled h1 sits in even c1-blocks

    # ---- conv2 + folded BN + ReLU: 3 banded MXU matmuls (bf16, f32 acc) ----
    zr1 = jnp.zeros((BB, 1, Wc1), f32)
    h1p = jnp.concatenate([zr1, h1w, zr1], axis=1)         # (BB, H1+2, Wc1)
    wdt = g2_ref.dtype
    acc2 = jnp.zeros((BB * H1, Wc2), f32)
    for dy in range(3):
        lhs = h1p[:, dy:dy + H1, :].reshape(BB * H1, Wc1).astype(wdt)
        acc2 = acc2 + jnp.dot(lhs, g2_ref[dy], preferred_element_type=f32)
    y2 = jnp.maximum(acc2 * s2_ref[...] + b2_ref[...], 0.0)

    # ---- 2x2 max pool -------------------------------------------------------
    y2 = y2.reshape(BB, H2, 2, Wc2)
    y2 = jnp.maximum(y2[:, :, 0, :], y2[:, :, 1, :])       # (BB, H2, Wc2)
    y2s = jnp.concatenate([y2[:, :, c2:], y2[:, :, :c2]], axis=-1)
    h2w = jnp.maximum(y2, y2s)      # "wide": pooled h2 sits in even c2-blocks

    # ---- FC + ReLU (NCHW flatten folded into wf row layout) ----------------
    # Dropout(0.5) is the identity in eval mode.
    # TODO(synk): training-mode Dropout mask and BatchNorm batch statistics are
    # training-only; eval semantics (identity dropout, running-stats BN) here.
    fdt = wf_ref.dtype
    acc3 = jnp.zeros((BB, hidden), f32)
    for y in range(H2):                                    # static unroll, H2 small
        acc3 = acc3 + jnp.dot(h2w[:, y, :].astype(fdt), wf_ref[y],
                              preferred_element_type=f32)
    o_ref[...] = jnp.maximum(acc3 + bf_ref[...], 0.0)


# ---------------------------------------------------------------------------
# Wrapper
# ---------------------------------------------------------------------------
def fused_forward(x, kp, *, block_batch=None):
    """x: (B, H, W) float32 -> (B, hidden) float32."""
    B, H, W = x.shape
    assert H % 4 == 0 and W % 4 == 0, "H, W must be divisible by 4 (two 2x2 pools)"
    g1, s1, b1 = kp["g1"], kp["s1"], kp["b1"]
    g2, s2, b2 = kp["g2"], kp["s2"], kp["b2"]
    wf, bf = kp["wf"], kp["bf"]

    c1 = g1.shape[2] // W
    c2 = g2.shape[2] // (W // 2)
    hidden = bf.shape[1]
    H2 = H // 4
    assert g1.shape == (3, W, W * c1)
    assert g2.shape == (3, W * c1, (W // 2) * c2)
    assert wf.shape == (H2, (W // 2) * c2, hidden)

    # Batch tile per grid step.  BB=8 keeps the output block sublane-aligned
    # and amortises per-step overhead; per-step working set at the module's
    # default 40x40 shapes is only a few MiB, so BB could be raised to 16+ on
    # v5e/v6e (128 MiB VMEM) and kept at 8 on v7x (64 MiB VMEM).
    if block_batch is None:
        block_batch = 8 if B % 8 == 0 else B
    BB = block_batch
    assert B % BB == 0 and (BB % 8 == 0 or BB == B)

    kernel = functools.partial(_fused_forward_kernel, c1=c1, c2=c2)

    out = pl.pallas_call(
        kernel,
        out_shape=jax.ShapeDtypeStruct((B, hidden), jnp.float32),
        grid_spec=pltpu.PrefetchScalarGridSpec(
            num_scalar_prefetch=0,
            grid=(B // BB,),
            in_specs=[
                pl.BlockSpec((BB, H, W), lambda i: (i, 0, 0)),   # per-step samples
                pl.BlockSpec(g1.shape, lambda i: (0, 0, 0)),     # conv1 band W
                pl.BlockSpec(s1.shape, lambda i: (0, 0)),        # bn1 scale (tiled)
                pl.BlockSpec(b1.shape, lambda i: (0, 0)),        # bn1 bias  (tiled)
                pl.BlockSpec(g2.shape, lambda i: (0, 0, 0)),     # conv2 band W
                pl.BlockSpec(s2.shape, lambda i: (0, 0)),        # bn2 scale (tiled)
                pl.BlockSpec(b2.shape, lambda i: (0, 0)),        # bn2 bias  (tiled)
                pl.BlockSpec(wf.shape, lambda i: (0, 0, 0)),     # fc W (NCHW folded)
                pl.BlockSpec(bf.shape, lambda i: (0, 0)),        # fc bias
            ],
            out_specs=pl.BlockSpec((BB, hidden), lambda i: (i, 0)),
        ),
        compiler_params=pltpu.CompilerParams(
            dimension_semantics=("parallel",),   # batch tiles split across TCs
            vmem_limit_bytes=32 * 1024 * 1024,   # generous; working set is small
        ),
    )(x, g1, s1, b1, g2, s2, b2, wf, bf)
    return out


# ---------------------------------------------------------------------------
# Parameters (PyTorch-equivalent layout) + one-time kernel repack (host side)
# ---------------------------------------------------------------------------
def init_params(key, n_mfcc, max_length, hidden_size):
    ks = jax.random.split(key, 14)

    def nrm(k, shape, s=0.1):
        return s * jax.random.normal(k, shape, jnp.float32)

    fc_in = C2 * (n_mfcc // 4) * (max_length // 4)
    return {
        "conv1_w": nrm(ks[0], (3, 3, 1, C1)),      # HWIO
        "conv1_b": nrm(ks[1], (C1,)),
        "bn1_gamma": 1.0 + nrm(ks[2], (C1,)),
        "bn1_beta": nrm(ks[3], (C1,)),
        "bn1_mean": nrm(ks[4], (C1,)),
        "bn1_var": 1.0 + jnp.abs(nrm(ks[5], (C1,))),
        "conv2_w": nrm(ks[6], (3, 3, C1, C2)),     # HWIO
        "conv2_b": nrm(ks[7], (C2,)),
        "bn2_gamma": 1.0 + nrm(ks[8], (C2,)),
        "bn2_beta": nrm(ks[9], (C2,)),
        "bn2_mean": nrm(ks[10], (C2,)),
        "bn2_var": 1.0 + jnp.abs(nrm(ks[11], (C2,))),
        # fc weight stored like PyTorch (rows in NCHW-flatten order), transposed
        # to (fc_in, hidden).
        "fc_w": nrm(ks[12], (fc_in, hidden_size)),
        "fc_b": nrm(ks[13], (hidden_size,)),
    }


def fold_bn(conv_b, gamma, beta, mean, var, eps=1e-5):
    scale = gamma * lax.rsqrt(var + eps)
    bias = (conv_b - mean) * scale + beta
    return scale, bias


def prepare_params(p, n_mfcc, max_length, matmul_dtype=MATMUL_DTYPE):
    """One-time (init-time) repack into kernel-ready layouts; zero runtime cost."""
    H, W = n_mfcc, max_length
    assert H % 4 == 0 and W % 4 == 0
    H2, W1, W2 = H // 4, W // 2, W // 4
    c1, c2 = C1, C2
    hidden = p["fc_w"].shape[1]
    assert p["fc_w"].shape[0] == c2 * H2 * W2

    s1, b1 = fold_bn(p["conv1_b"], p["bn1_gamma"], p["bn1_beta"],
                     p["bn1_mean"], p["bn1_var"])
    s2, b2 = fold_bn(p["conv2_b"], p["bn2_gamma"], p["bn2_beta"],
                     p["bn2_mean"], p["bn2_var"])

    w1 = np.asarray(p["conv1_w"], np.float32)   # (3, 3, 1, c1)  HWIO
    w2 = np.asarray(p["conv2_w"], np.float32)   # (3, 3, c1, c2) HWIO
    fcw = np.asarray(p["fc_w"], np.float32)     # (fc_in, hidden), NCHW row order

    # conv1 banded weights: g1[dy, x_in, x_out*c1 + c] = w1[dy, x_in-x_out+1, 0, c]
    # (x-direction zero padding is expressed by simply omitting out-of-range taps).
    g1 = np.zeros((3, W, W * c1), np.float32)
    for dy in range(3):
        for dx in range(3):
            for xo in range(W):
                xi = xo + dx - 1
                if 0 <= xi < W:
                    g1[dy, xi, xo * c1:(xo + 1) * c1] = w1[dy, dx, 0, :]

    # conv2 banded weights over the "wide" pooled layout: valid pooled h1 sits in
    # even c1-blocks (column 2*x*c1 + ci); odd blocks map to all-zero rows.
    g2 = np.zeros((3, W * c1, W1 * c2), np.float32)
    for dy in range(3):
        for dx in range(3):
            for xo in range(W1):
                xi = xo + dx - 1
                if 0 <= xi < W1:
                    g2[dy, 2 * xi * c1:(2 * xi + 1) * c1,
                       xo * c2:(xo + 1) * c2] = w2[dy, dx]

    # FC weights: one (W1*c2, hidden) slab per pooled row y; row layout folds in
    # both the PyTorch NCHW flatten order and the even-block ("wide") selection.
    fcw_r = fcw.reshape(c2, H2, W2, hidden)
    wf = np.zeros((H2, W1 * c2, hidden), np.float32)
    for y in range(H2):
        for x in range(W2):
            wf[y, 2 * x * c2:(2 * x + 1) * c2, :] = fcw_r[:, y, x, :]

    return {
        "g1": jnp.asarray(g1),
        "s1": jnp.asarray(np.tile(np.asarray(s1, np.float32), W)[None, :]),
        "b1": jnp.asarray(np.tile(np.asarray(b1, np.float32), W)[None, :]),
        "g2": jnp.asarray(g2, matmul_dtype),
        "s2": jnp.asarray(np.tile(np.asarray(s2, np.float32), W1)[None, :]),
        "b2": jnp.asarray(np.tile(np.asarray(b2, np.float32), W1)[None, :]),
        "wf": jnp.asarray(wf, matmul_dtype),
        "bf": jnp.asarray(np.asarray(p["fc_b"], np.float32)[None, :]),
    }


@jax.jit
def forward(x, kp):
    # x: (B, n_mfcc, max_length) -- mirrors the PyTorch input before unsqueeze(1)
    return fused_forward(x.astype(jnp.float32), kp)


def forward_ref(x, p):
    """Pure-JAX (XLA) reference with PyTorch semantics (NCHW flatten via transpose)."""
    x = x[..., None].astype(jnp.float32)   # NHWC, C = 1

    def block(h, w, cb, g, bt, m, v):
        y = lax.conv_general_dilated(
            h, w, (1, 1), "SAME",
            dimension_numbers=("NHWC", "HWIO", "NHWC"),
            precision=lax.Precision.HIGHEST)
        y = (y + cb - m) * (g * lax.rsqrt(v + 1e-5)) + bt
        y = jnp.maximum(y, 0.0)
        return lax.reduce_window(y, -jnp.inf, lax.max,
                                 (1, 2, 2, 1), (1, 2, 2, 1), "VALID")

    h1 = block(x, p["conv1_w"], p["conv1_b"], p["bn1_gamma"], p["bn1_beta"],
               p["bn1_mean"], p["bn1_var"])
    h2 = block(h1, p["conv2_w"], p["conv2_b"], p["bn2_gamma"], p["bn2_beta"],
               p["bn2_mean"], p["bn2_var"])
    flat = jnp.transpose(h2, (0, 3, 1, 2)).reshape(h2.shape[0], -1)
    out = jnp.dot(flat, p["fc_w"], precision=lax.Precision.HIGHEST) + p["fc_b"]
    return jnp.maximum(out, 0.0)


if __name__ == "__main__":
    # Small shapes consistent with the module: n_mfcc=16, max_length=16,
    # hidden=32.  batch=16 with BB=8 gives grid=(2,) -> both v7x TCs get work.
    B, n_mfcc, max_length, hidden = 16, 16, 16, 32

    key = jax.random.PRNGKey(0)
    kx, kp = jax.random.split(key)
    x = jax.random.normal(kx, (B, n_mfcc, max_length), jnp.float32)
    params = init_params(kp, n_mfcc, max_length, hidden)
    kparams = prepare_params(params, n_mfcc, max_length)

    out = jax.block_until_ready(forward(x, kparams))
    assert out.shape == (B, hidden), out.shape

    ref = jax.block_until_ready(forward_ref(x, params))
    # Tolerance sized for the bf16 MXU operands on conv2/FC (f32 accumulation,
    # per the performance review); the pure-f32 path matches to ~1e-6.
    assert jnp.allclose(out, ref, rtol=2e-2, atol=3e-2), (
        float(jnp.max(jnp.abs(out - ref))))

    print("KERNEL_OK")
</pallas_src>

<mosaic_0001>
module attributes {stable_mosaic.version = 11 : i64} {
  func.func @_fused_forward_kernel(%arg0: i32, %arg1: memref<8x16x16xf32, #tpu.memory_space<vmem>>, %arg2: memref<3x16x256xf32, #tpu.memory_space<vmem>>, %arg3: memref<1x256xf32, #tpu.memory_space<vmem>>, %arg4: memref<1x256xf32, #tpu.memory_space<vmem>>, %arg5: memref<3x256x256xbf16, #tpu.memory_space<vmem>>, %arg6: memref<1x256xf32, #tpu.memory_space<vmem>>, %arg7: memref<1x256xf32, #tpu.memory_space<vmem>>, %arg8: memref<4x256x32xbf16, #tpu.memory_space<vmem>>, %arg9: memref<1x32xf32, #tpu.memory_space<vmem>>, %arg10: memref<8x32xf32, #tpu.memory_space<vmem>>) attributes {dimension_semantics = [#tpu.dimension_semantics<parallel>], iteration_bounds = array<i64: 2>, scalar_prefetch = 0 : i64, scratch_operands = 0 : i64, tpu.core_type = #tpu.core_type<tc>, window_params = [{transform_indices = @transform_0, window_bounds = array<i64: 8, 16, 16>}, {pipeline_mode = #tpu.pipeline_mode<synchronous>, transform_indices = @transform_1, window_bounds = array<i64: 3, 16, 256>}, {pipeline_mode = #tpu.pipeline_mode<synchronous>, transform_indices = @transform_2, window_bounds = array<i64: 1, 256>}, {pipeline_mode = #tpu.pipeline_mode<synchronous>, transform_indices = @transform_3, window_bounds = array<i64: 1, 256>}, {pipeline_mode = #tpu.pipeline_mode<synchronous>, transform_indices = @transform_4, window_bounds = array<i64: 3, 256, 256>}, {pipeline_mode = #tpu.pipeline_mode<synchronous>, transform_indices = @transform_5, window_bounds = array<i64: 1, 256>}, {pipeline_mode = #tpu.pipeline_mode<synchronous>, transform_indices = @transform_6, window_bounds = array<i64: 1, 256>}, {pipeline_mode = #tpu.pipeline_mode<synchronous>, transform_indices = @transform_7, window_bounds = array<i64: 4, 256, 32>}, {pipeline_mode = #tpu.pipeline_mode<synchronous>, transform_indices = @transform_8, window_bounds = array<i64: 1, 32>}, {transform_indices = @transform_9, window_bounds = array<i64: 8, 32>}]} {
    %c0 = arith.constant 0 : index
    %c0_0 = arith.constant 0 : index
    %c0_1 = arith.constant 0 : index
    %0 = vector.load %arg1[%c0, %c0_0, %c0_1] : memref<8x16x16xf32, #tpu.memory_space<vmem>>, vector<8x16x16xf32>
    %cst = arith.constant 0.000000e+00 : f32
    %1 = vector.broadcast %cst : f32 to vector<8x1x16xf32>
    %2 = tpu.concatenate %1, %0, %1 in 1 : vector<8x1x16xf32>, vector<8x16x16xf32>, vector<8x1x16xf32> -> vector<8x18x16xf32>
    %cst_2 = arith.constant 0.000000e+00 : f32
    %3 = vector.broadcast %cst_2 : f32 to vector<128x256xf32>
    %4 = vector.extract_strided_slice %2 {offsets = [0, 0, 0], sizes = [8, 16, 16], strides = [1, 1, 1]} : vector<8x18x16xf32> to vector<8x16x16xf32>
    %5 = vector.shape_cast %4 : vector<8x16x16xf32> to vector<128x16xf32>
    %c0_3 = arith.constant 0 : index
    %c0_4 = arith.constant 0 : index
    %c0_5 = arith.constant 0 : index
    %6 = vector.load %arg2[%c0_3, %c0_4, %c0_5] : memref<3x16x256xf32, #tpu.memory_space<vmem>>, vector<1x16x256xf32>
    %7 = vector.shape_cast %6 : vector<1x16x256xf32> to vector<16x256xf32>
    %cst_6 = arith.constant dense<0.000000e+00> : vector<128x256xf32>
    %8 = tpu.matmul %5, %7, %cst_6 {dimension_numbers = #tpu.dot_dimension_numbers<[1], [0], [0], [1], [0, 0, 1, 1], [], []>} : vector<128x16xf32>, vector<16x256xf32>, vector<128x256xf32> -> vector<128x256xf32>
    %9 = arith.addf %3, %8 : vector<128x256xf32>
    %10 = vector.extract_strided_slice %2 {offsets = [0, 1, 0], sizes = [8, 16, 16], strides = [1, 1, 1]} : vector<8x18x16xf32> to vector<8x16x16xf32>
    %11 = vector.shape_cast %10 : vector<8x16x16xf32> to vector<128x16xf32>
    %c1 = arith.constant 1 : index
    %c0_7 = arith.constant 0 : index
    %c0_8 = arith.constant 0 : index
    %12 = vector.load %arg2[%c1, %c0_7, %c0_8] : memref<3x16x256xf32, #tpu.memory_space<vmem>>, vector<1x16x256xf32>
    %13 = vector.shape_cast %12 : vector<1x16x256xf32> to vector<16x256xf32>
    %cst_9 = arith.constant dense<0.000000e+00> : vector<128x256xf32>
    %14 = tpu.matmul %11, %13, %cst_9 {dimension_numbers = #tpu.dot_dimension_numbers<[1], [0], [0], [1], [0, 0, 1, 1], [], []>} : vector<128x16xf32>, vector<16x256xf32>, vector<128x256xf32> -> vector<128x256xf32>
    %15 = arith.addf %9, %14 : vector<128x256xf32>
    %16 = vector.extract_strided_slice %2 {offsets = [0, 2, 0], sizes = [8, 16, 16], strides = [1, 1, 1]} : vector<8x18x16xf32> to vector<8x16x16xf32>
    %17 = vector.shape_cast %16 : vector<8x16x16xf32> to vector<128x16xf32>
    %c2 = arith.constant 2 : index
    %c0_10 = arith.constant 0 : index
    %c0_11 = arith.constant 0 : index
    %18 = vector.load %arg2[%c2, %c0_10, %c0_11] : memref<3x16x256xf32, #tpu.memory_space<vmem>>, vector<1x16x256xf32>
    %19 = vector.shape_cast %18 : vector<1x16x256xf32> to vector<16x256xf32>
    %cst_12 = arith.constant dense<0.000000e+00> : vector<128x256xf32>
    %20 = tpu.matmul %17, %19, %cst_12 {dimension_numbers = #tpu.dot_dimension_numbers<[1], [0], [0], [1], [0, 0, 1, 1], [], []>} : vector<128x16xf32>, vector<16x256xf32>, vector<128x256xf32> -> vector<128x256xf32>
    %21 = arith.addf %15, %20 : vector<128x256xf32>
    %c0_13 = arith.constant 0 : index
    %c0_14 = arith.constant 0 : index
    %22 = vector.load %arg3[%c0_13, %c0_14] : memref<1x256xf32, #tpu.memory_space<vmem>>, vector<1x256xf32>
    %23 = vector.broadcast %22 : vector<1x256xf32> to vector<128x256xf32>
    %24 = arith.mulf %21, %23 : vector<128x256xf32>
    %c0_15 = arith.constant 0 : index
    %c0_16 = arith.constant 0 : index
    %25 = vector.load %arg4[%c0_15, %c0_16] : memref<1x256xf32, #tpu.memory_space<vmem>>, vector<1x256xf32>
    %26 = vector.broadcast %25 : vector<1x256xf32> to vector<128x256xf32>
    %27 = arith.addf %24, %26 : vector<128x256xf32>
    %cst_17 = arith.constant 0.000000e+00 : f32
    %28 = vector.broadcast %cst_17 : f32 to vector<128x256xf32>
    %29 = arith.maximumf %27, %28 : vector<128x256xf32>
    %30 = vector.shape_cast %29 : vector<128x256xf32> to vector<8x8x2x256xf32>
    %31 = vector.extract_strided_slice %30 {offsets = [0, 0, 0, 0], sizes = [8, 8, 1, 256], strides = [1, 1, 1, 1]} : vector<8x8x2x256xf32> to vector<8x8x1x256xf32>
    %32 = vector.shape_cast %31 : vector<8x8x1x256xf32> to vector<8x8x256xf32>
    %33 = vector.extract_strided_slice %30 {offsets = [0, 0, 1, 0], sizes = [8, 8, 1, 256], strides = [1, 1, 1, 1]} : vector<8x8x2x256xf32> to vector<8x8x1x256xf32>
    %34 = vector.shape_cast %33 : vector<8x8x1x256xf32> to vector<8x8x256xf32>
    %35 = arith.maximumf %32, %34 : vector<8x8x256xf32>
    %36 = vector.extract_strided_slice %35 {offsets = [0, 0, 16], sizes = [8, 8, 240], strides = [1, 1, 1]} : vector<8x8x256xf32> to vector<8x8x240xf32>
    %37 = vector.extract_strided_slice %35 {offsets = [0, 0, 0], sizes = [8, 8, 16], strides = [1, 1, 1]} : vector<8x8x256xf32> to vector<8x8x16xf32>
    %38 = tpu.concatenate %36, %37 in 2 : vector<8x8x240xf32>, vector<8x8x16xf32> -> vector<8x8x256xf32>
    %39 = arith.maximumf %35, %38 : vector<8x8x256xf32>
    %cst_18 = arith.constant 0.000000e+00 : f32
    %40 = vector.broadcast %cst_18 : f32 to vector<8x1x256xf32>
    %41 = tpu.concatenate %40, %39, %40 in 1 : vector<8x1x256xf32>, vector<8x8x256xf32>, vector<8x1x256xf32> -> vector<8x10x256xf32>
    %cst_19 = arith.constant 0.000000e+00 : f32
    %42 = vector.broadcast %cst_19 : f32 to vector<64x256xf32>
    %43 = vector.extract_strided_slice %41 {offsets = [0, 0, 0], sizes = [8, 8, 256], strides = [1, 1, 1]} : vector<8x10x256xf32> to vector<8x8x256xf32>
    %44 = vector.shape_cast %43 : vector<8x8x256xf32> to vector<64x256xf32>
    %45 = arith.truncf %44 : vector<64x256xf32> to vector<64x256xbf16>
    %c0_20 = arith.constant 0 : index
    %c0_21 = arith.constant 0 : index
    %c0_22 = arith.constant 0 : index
    %46 = vector.load %arg5[%c0_20, %c0_21, %c0_22] : memref<3x256x256xbf16, #tpu.memory_space<vmem>>, vector<1x256x256xbf16>
    %47 = vector.shape_cast %46 : vector<1x256x256xbf16> to vector<256x256xbf16>
    %cst_23 = arith.constant dense<0.000000e+00> : vector<64x256xf32>
    %48 = tpu.matmul %45, %47, %cst_23 {dimension_numbers = #tpu.dot_dimension_numbers<[1], [0], [0], [1], [0, 0, 1, 1], [], []>} : vector<64x256xbf16>, vector<256x256xbf16>, vector<64x256xf32> -> vector<64x256xf32>
    %49 = arith.addf %42, %48 : vector<64x256xf32>
    %50 = vector.extract_strided_slice %41 {offsets = [0, 1, 0], sizes = [8, 8, 256], strides = [1, 1, 1]} : vector<8x10x256xf32> to vector<8x8x256xf32>
    %51 = vector.shape_cast %50 : vector<8x8x256xf32> to vector<64x256xf32>
    %52 = arith.truncf %51 : vector<64x256xf32> to vector<64x256xbf16>
    %c1_24 = arith.constant 1 : index
    %c0_25 = arith.constant 0 : index
    %c0_26 = arith.constant 0 : index
    %53 = vector.load %arg5[%c1_24, %c0_25, %c0_26] : memref<3x256x256xbf16, #tpu.memory_space<vmem>>, vector<1x256x256xbf16>
    %54 = vector.shape_cast %53 : vector<1x256x256xbf16> to vector<256x256xbf16>
    %cst_27 = arith.constant dense<0.000000e+00> : vector<64x256xf32>
    %55 = tpu.matmul %52, %54, %cst_27 {dimension_numbers = #tpu.dot_dimension_numbers<[1], [0], [0], [1], [0, 0, 1, 1], [], []>} : vector<64x256xbf16>, vector<256x256xbf16>, vector<64x256xf32> -> vector<64x256xf32>
    %56 = arith.addf %49, %55 : vector<64x256xf32>
    %57 = vector.extract_strided_slice %41 {offsets = [0, 2, 0], sizes = [8, 8, 256], strides = [1, 1, 1]} : vector<8x10x256xf32> to vector<8x8x256xf32>
    %58 = vector.shape_cast %57 : vector<8x8x256xf32> to vector<64x256xf32>
    %59 = arith.truncf %58 : vector<64x256xf32> to vector<64x256xbf16>
    %c2_28 = arith.constant 2 : index
    %c0_29 = arith.constant 0 : index
    %c0_30 = arith.constant 0 : index
    %60 = vector.load %arg5[%c2_28, %c0_29, %c0_30] : memref<3x256x256xbf16, #tpu.memory_space<vmem>>, vector<1x256x256xbf16>
    %61 = vector.shape_cast %60 : vector<1x256x256xbf16> to vector<256x256xbf16>
    %cst_31 = arith.constant dense<0.000000e+00> : vector<64x256xf32>
    %62 = tpu.matmul %59, %61, %cst_31 {dimension_numbers = #tpu.dot_dimension_numbers<[1], [0], [0], [1], [0, 0, 1, 1], [], []>} : vector<64x256xbf16>, vector<256x256xbf16>, vector<64x256xf32> -> vector<64x256xf32>
    %63 = arith.addf %56, %62 : vector<64x256xf32>
    %c0_32 = arith.constant 0 : index
    %c0_33 = arith.constant 0 : index
    %64 = vector.load %arg6[%c0_32, %c0_33] : memref<1x256xf32, #tpu.memory_space<vmem>>, vector<1x256xf32>
    %65 = vector.broadcast %64 : vector<1x256xf32> to vector<64x256xf32>
    %66 = arith.mulf %63, %65 : vector<64x256xf32>
    %c0_34 = arith.constant 0 : index
    %c0_35 = arith.constant 0 : index
    %67 = vector.load %arg7[%c0_34, %c0_35] : memref<1x256xf32, #tpu.memory_space<vmem>>, vector<1x256xf32>
    %68 = vector.broadcast %67 : vector<1x256xf32> to vector<64x256xf32>
    %69 = arith.addf %66, %68 : vector<64x256xf32>
    %cst_36 = arith.constant 0.000000e+00 : f32
    %70 = vector.broadcast %cst_36 : f32 to vector<64x256xf32>
    %71 = arith.maximumf %69, %70 : vector<64x256xf32>
    %72 = vector.shape_cast %71 : vector<64x256xf32> to vector<8x4x2x256xf32>
    %73 = vector.extract_strided_slice %72 {offsets = [0, 0, 0, 0], sizes = [8, 4, 1, 256], strides = [1, 1, 1, 1]} : vector<8x4x2x256xf32> to vector<8x4x1x256xf32>
    %74 = vector.shape_cast %73 : vector<8x4x1x256xf32> to vector<8x4x256xf32>
    %75 = vector.extract_strided_slice %72 {offsets = [0, 0, 1, 0], sizes = [8, 4, 1, 256], strides = [1, 1, 1, 1]} : vector<8x4x2x256xf32> to vector<8x4x1x256xf32>
    %76 = vector.shape_cast %75 : vector<8x4x1x256xf32> to vector<8x4x256xf32>
    %77 = arith.maximumf %74, %76 : vector<8x4x256xf32>
    %78 = vector.extract_strided_slice %77 {offsets = [0, 0, 32], sizes = [8, 4, 224], strides = [1, 1, 1]} : vector<8x4x256xf32> to vector<8x4x224xf32>
    %79 = vector.extract_strided_slice %77 {offsets = [0, 0, 0], sizes = [8, 4, 32], strides = [1, 1, 1]} : vector<8x4x256xf32> to vector<8x4x32xf32>
    %80 = tpu.concatenate %78, %79 in 2 : vector<8x4x224xf32>, vector<8x4x32xf32> -> vector<8x4x256xf32>
    %81 = arith.maximumf %77, %80 : vector<8x4x256xf32>
    %cst_37 = arith.constant 0.000000e+00 : f32
    %82 = vector.broadcast %cst_37 : f32 to vector<8x32xf32>
    %83 = vector.extract_strided_slice %81 {offsets = [0, 0, 0], sizes = [8, 1, 256], strides = [1, 1, 1]} : vector<8x4x256xf32> to vector<8x1x256xf32>
    %84 = vector.shape_cast %83 : vector<8x1x256xf32> to vector<8x256xf32>
    %85 = arith.truncf %84 : vector<8x256xf32> to vector<8x256xbf16>
    %c0_38 = arith.constant 0 : index
    %c0_39 = arith.constant 0 : index
    %c0_40 = arith.constant 0 : index
    %86 = vector.load %arg8[%c0_38, %c0_39, %c0_40] : memref<4x256x32xbf16, #tpu.memory_space<vmem>>, vector<1x256x32xbf16>
    %87 = vector.shape_cast %86 : vector<1x256x32xbf16> to vector<256x32xbf16>
    %cst_41 = arith.constant dense<0.000000e+00> : vector<8x32xf32>
    %88 = tpu.matmul %85, %87, %cst_41 {dimension_numbers = #tpu.dot_dimension_numbers<[1], [0], [0], [1], [0, 0, 1, 1], [], []>} : vector<8x256xbf16>, vector<256x32xbf16>, vector<8x32xf32> -> vector<8x32xf32>
    %89 = arith.addf %82, %88 : vector<8x32xf32>
    %90 = vector.extract_strided_slice %81 {offsets = [0, 1, 0], sizes = [8, 1, 256], strides = [1, 1, 1]} : vector<8x4x256xf32> to vector<8x1x256xf32>
    %91 = vector.shape_cast %90 : vector<8x1x256xf32> to vector<8x256xf32>
    %92 = arith.truncf %91 : vector<8x256xf32> to vector<8x256xbf16>
    %c1_42 = arith.constant 1 : index
    %c0_43 = arith.constant 0 : index
    %c0_44 = arith.constant 0 : index
    %93 = vector.load %arg8[%c1_42, %c0_43, %c0_44] : memref<4x256x32xbf16, #tpu.memory_space<vmem>>, vector<1x256x32xbf16>
    %94 = vector.shape_cast %93 : vector<1x256x32xbf16> to vector<256x32xbf16>
    %cst_45 = arith.constant dense<0.000000e+00> : vector<8x32xf32>
    %95 = tpu.matmul %92, %94, %cst_45 {dimension_numbers = #tpu.dot_dimension_numbers<[1], [0], [0], [1], [0, 0, 1, 1], [], []>} : vector<8x256xbf16>, vector<256x32xbf16>, vector<8x32xf32> -> vector<8x32xf32>
    %96 = arith.addf %89, %95 : vector<8x32xf32>
    %97 = vector.extract_strided_slice %81 {offsets = [0, 2, 0], sizes = [8, 1, 256], strides = [1, 1, 1]} : vector<8x4x256xf32> to vector<8x1x256xf32>
    %98 = vector.shape_cast %97 : vector<8x1x256xf32> to vector<8x256xf32>
    %99 = arith.truncf %98 : vector<8x256xf32> to vector<8x256xbf16>
    %c2_46 = arith.constant 2 : index
    %c0_47 = arith.constant 0 : index
    %c0_48 = arith.constant 0 : index
    %100 = vector.load %arg8[%c2_46, %c0_47, %c0_48] : memref<4x256x32xbf16, #tpu.memory_space<vmem>>, vector<1x256x32xbf16>
    %101 = vector.shape_cast %100 : vector<1x256x32xbf16> to vector<256x32xbf16>
    %cst_49 = arith.constant dense<0.000000e+00> : vector<8x32xf32>
    %102 = tpu.matmul %99, %101, %cst_49 {dimension_numbers = #tpu.dot_dimension_numbers<[1], [0], [0], [1], [0, 0, 1, 1], [], []>} : vector<8x256xbf16>, vector<256x32xbf16>, vector<8x32xf32> -> vector<8x32xf32>
    %103 = arith.addf %96, %102 : vector<8x32xf32>
    %104 = vector.extract_strided_slice %81 {offsets = [0, 3, 0], sizes = [8, 1, 256], strides = [1, 1, 1]} : vector<8x4x256xf32> to vector<8x1x256xf32>
    %105 = vector.shape_cast %104 : vector<8x1x256xf32> to vector<8x256xf32>
    %106 = arith.truncf %105 : vector<8x256xf32> to vector<8x256xbf16>
    %c3 = arith.constant 3 : index
    %c0_50 = arith.constant 0 : index
    %c0_51 = arith.constant 0 : index
    %107 = vector.load %arg8[%c3, %c0_50, %c0_51] : memref<4x256x32xbf16, #tpu.memory_space<vmem>>, vector<1x256x32xbf16>
    %108 = vector.shape_cast %107 : vector<1x256x32xbf16> to vector<256x32xbf16>
    %cst_52 = arith.constant dense<0.000000e+00> : vector<8x32xf32>
    %109 = tpu.matmul %106, %108, %cst_52 {dimension_numbers = #tpu.dot_dimension_numbers<[1], [0], [0], [1], [0, 0, 1, 1], [], []>} : vector<8x256xbf16>, vector<256x32xbf16>, vector<8x32xf32> -> vector<8x32xf32>
    %110 = arith.addf %103, %109 : vector<8x32xf32>
    %c0_53 = arith.constant 0 : index
    %c0_54 = arith.constant 0 : index
    %111 = vector.load %arg9[%c0_53, %c0_54] : memref<1x32xf32, #tpu.memory_space<vmem>>, vector<1x32xf32>
    %112 = vector.broadcast %111 : vector<1x32xf32> to vector<8x32xf32>
    %113 = arith.addf %110, %112 : vector<8x32xf32>
    %cst_55 = arith.constant 0.000000e+00 : f32
    %114 = vector.broadcast %cst_55 : f32 to vector<8x32xf32>
    %115 = arith.maximumf %113, %114 : vector<8x32xf32>
    %c0_56 = arith.constant 0 : index
    %c0_57 = arith.constant 0 : index
    %116 = vector.load %arg10[%c0_56, %c0_57] : memref<8x32xf32, #tpu.memory_space<vmem>>, vector<8x32xf32>
    tpu.vector_store %arg10[%c0_56, %c0_57], %115 {strides = array<i32>} : memref<8x32xf32, #tpu.memory_space<vmem>>, vector<8x32xf32>,
    return
  }
  func.func @transform_0(%arg0: i32) -> (i32, i32, i32) {
    %c0_i32 = arith.constant 0 : i32
    %c0_i32_0 = arith.constant 0 : i32
    %c0_i32_1 = arith.constant 0 : i32
    return %arg0, %c0_i32, %c0_i32_0 : i32, i32, i32
  }
  func.func @transform_1(%arg0: i32) -> (i32, i32, i32) {
    %c0_i32 = arith.constant 0 : i32
    %c0_i32_0 = arith.constant 0 : i32
    %c0_i32_1 = arith.constant 0 : i32
    %c0_i32_2 = arith.constant 0 : i32
    return %c0_i32, %c0_i32_0, %c0_i32_1 : i32, i32, i32
  }
  func.func @transform_2(%arg0: i32) -> (i32, i32) {
    %c0_i32 = arith.constant 0 : i32
    %c0_i32_0 = arith.constant 0 : i32
    %c0_i32_1 = arith.constant 0 : i32
    return %c0_i32, %c0_i32_0 : i32, i32
  }
  func.func @transform_3(%arg0: i32) -> (i32, i32) {
    %c0_i32 = arith.constant 0 : i32
    %c0_i32_0 = arith.constant 0 : i32
    %c0_i32_1 = arith.constant 0 : i32
    return %c0_i32, %c0_i32_0 : i32, i32
  }
  func.func @transform_4(%arg0: i32) -> (i32, i32, i32) {
    %c0_i32 = arith.constant 0 : i32
    %c0_i32_0 = arith.constant 0 : i32
    %c0_i32_1 = arith.constant 0 : i32
    %c0_i32_2 = arith.constant 0 : i32
    return %c0_i32, %c0_i32_0, %c0_i32_1 : i32, i32, i32
  }
  func.func @transform_5(%arg0: i32) -> (i32, i32) {
    %c0_i32 = arith.constant 0 : i32
    %c0_i32_0 = arith.constant 0 : i32
    %c0_i32_1 = arith.constant 0 : i32
    return %c0_i32, %c0_i32_0 : i32, i32
  }
  func.func @transform_6(%arg0: i32) -> (i32, i32) {
    %c0_i32 = arith.constant 0 : i32
    %c0_i32_0 = arith.constant 0 : i32
    %c0_i32_1 = arith.constant 0 : i32
    return %c0_i32, %c0_i32_0 : i32, i32
  }
  func.func @transform_7(%arg0: i32) -> (i32, i32, i32) {
    %c0_i32 = arith.constant 0 : i32
    %c0_i32_0 = arith.constant 0 : i32
    %c0_i32_1 = arith.constant 0 : i32
    %c0_i32_2 = arith.constant 0 : i32
    return %c0_i32, %c0_i32_0, %c0_i32_1 : i32, i32, i32
  }
  func.func @transform_8(%arg0: i32) -> (i32, i32) {
    %c0_i32 = arith.constant 0 : i32
    %c0_i32_0 = arith.constant 0 : i32
    %c0_i32_1 = arith.constant 0 : i32
    return %c0_i32, %c0_i32_0 : i32, i32
  }
  func.func @transform_9(%arg0: i32) -> (i32, i32) {
    %c0_i32 = arith.constant 0 : i32
    %c0_i32_0 = arith.constant 0 : i32
    return %arg0, %c0_i32 : i32, i32
  }
}

</mosaic_0001>

<bundles_post_ra>
// kernel: forward.1
= control target key start
LH: loop header
LB: loop body
LE: loop exit
PB: predicated region body
PF: predicated region fallthrough
CT: control target
= control target key end

     0   :  { %14 = vsyncpa [#allocation3], 0  ;;  %s10070_s0 = inlined_call_operand.vmem [shape: f32[16,16,16], index: 0, kind: input, shape index: {}]   ;;  %s10071_s1 = inlined_call_operand.vmem [shape: f32[3,16,256], index: 1, kind: input, shape index: {}]   ;;  %s10072_s2 = inlined_call_operand.vmem [shape: f32[1,256], index: 2, kind: input, shape index: {}]   ;;  %s10073_s3 = inlined_call_operand.vmem [shape: f32[1,256], index: 3, kind: input, shape index: {}]   ;;  %s10074_s4 = inlined_call_operand.hbm [shape: bf16[3,256,256], index: 4, kind: input, shape index: {}]   ;;  %s10075_s5 = inlined_call_operand.vmem [shape: f32[1,256], index: 5, kind: input, shape index: {}]   ;;  %s10076_s6 = inlined_call_operand.vmem [shape: f32[1,256], index: 6, kind: input, shape index: {}]   ;;  %s10077_s7 = inlined_call_operand.vmem [shape: bf16[4,256,32], index: 7, kind: input, shape index: {}]   ;;  %s10078_s8 = inlined_call_operand.vmem [shape: f32[1,32], index: 8, kind: input, shape index: {}]   ;;  %s10079_s9 = inlined_call_operand.hbm [shape: f32[16,32], index: 9, kind: output, shape index: {}]  }
   0x1   :  { %15 = vsyncpa [#allocation4], 0 }
   0x2   :  { %17 = vsyncpa [#allocation4 + $0x1], 0  ;;  %s7054_s30 = smov 0   ;;  %s7056_s10 = smov 0  }
   0x3   :  { %s7058_s11 = smov 0   ;;  %s7060_s12 = smov 0  }
   0x4 LB: > { %s7075_s13 = sadd.s32 4294967295, %s6997_s12   ;;  %s5575_s14 = sadd.s32 4294967294, %s6997_s12   ;;  %s6997_s12 = sphi %s7060_s12, %s10357_s12   ;;  %s6993_s11 = sphi %s7058_s11, %s10356_s11   ;;  %s6989_s10 = sphi %s7056_s10, %s10355_s10   ;;  %s6985_s30 = sphi %s7054_s30, %s10354_s30  }
   0x5   : > { %s7079_s15 = sadd.s32 1, %s6997_s12   ;;  %s224_s16 = sadd.s32 1, %s6993_s11 }
   0x6   : > { %s221_s17 = ssub.s32 %s6997_s12, %s7079_s15  ;;  %p234_p0 = scmp.ne.s32.totalorder %s6993_s11, %s6989_s10 }
   0x7   : > { %p222_p1 = scmp.eq.s32.totalorder %s221_s17, 0  ;;  %p235_p2 = scmp.eq.s32.totalorder %s7075_s13, 1 }
   0x8   : > { %p240_p3 = scmp.ne.s32.totalorder %s6989_s10, %s6985_s30  ;;  %p241_p4 = scmp.eq.s32.totalorder %s5575_s14, 1 }
   0x9   : > { %s7090_s18 = scalar_select %p222_p1, %s6993_s11, %s224_s16  }
   0xa   : > { %p7092_p5 = por %p235_p2, %p234_p0  ;;  %p7096_p6 = por %p241_p4, %p240_p3 }
   0xb   : > { %p5576_p7 = scmp.ge.s32.totalorder %s6997_s12, 1  ;;  %p248_p8 = scmp.lt.s32.totalorder %s6997_s12, 3 }
   0xc   : > { %p6780_p9 = scmp.eq.s32.totalorder %s7075_s13, 0  ;;  %s268_s23 = sshll.u32 %s10074_s4, 4  ;;  %s269_s23 = int_to_ptr.hbm [resolvable:$true] %s268_s23 }
   0xd   : > { %p249_p10 = pnand %p5576_p7, %p248_p8  ;;  %s6999_s24 = smov [#allocation2]  }
   0xe   : > { %s270_s25 = sshll.u32 %s6999_s24, 4  ;;  %s7000_s26 = smov 128   ;;  %s271_s25 = int_to_ptr.vmem [resolvable:$true] %s270_s25 }
   0xf   : > { %p6772_p11 = pneg %p249_p10  ;;  %s7001_s27 = smov 8  }
  0x10   : > { %308 = sbr.rel (%p249_p10) target bundleno = 1286 (0x506), region = 56 }
  0x11   : > { %p6773_p12 = pnand %p6780_p9, %p6772_p11 }
  0x13   : > { %6775 = dma.hbm_to_vmem [thread:$0]  (!%p6773_p12), %s269_s23, 12288, %s271_s25, [#allocation3], %s7000_s26, %s7000_s26, %s7001_s27  }
  0x15   : > { %6976 = dma.done.wait (%p6780_p9), [#allocation3], 12288  }
  0x16   : > { %6978 = vsyncadd (%p6780_p9), [#allocation3], 4294955008  ;;  %s7113_s28 = sshll.u32 %s7075_s13, 3  ;;  %v444_v0 = vld [vmem:[%s10071_s1 + $0x10] sm:$0xff]  ;;  %v445_v1 = vld [vmem:[%s10071_s1 + $0x18] sm:$0xff]  ;;  %vm385_vm0 = vcmask 1040384  }
  0x17   : > { %p347_p13 = scmp.lt.s32.totalorder %s7113_s28, 15  ;;  %v442_v2 = vld [vmem:[%s10071_s1] sm:$0xff]  ;;  %717 = vmatpush.msra.mxu2 %v444_v0  ;;  %782 = vmatpush.msra.mxu3 %v445_v1  ;;  %v443_v3 = vld [vmem:[%s10071_s1 + $0x8] sm:$0xff]  ;;  %v5587_v4 = vld [vmem:[%s10071_s1 + $0x30] sm:$0xff]  ;;  %vm508_vm1 = vcmask 130048   ;;  %vm462_vm2 = vcmask 1046528  }
  0x18   : > { %v5588_v5 = vld [vmem:[%s10071_s1 + $0x38] sm:$0xff]  ;;  %555 = vmatpush.msra.mxu0 %v5587_v4  ;;  %v5585_v8 = vld [vmem:[%s10071_s1 + $0x20] sm:$0xff]  ;;  %v5586_v11 = vld [vmem:[%s10071_s1 + $0x28] sm:$0xff]  ;;  %vm833_vm3 = vcmask 1045504   ;;  %vm1229_vm4 = vcmask 1041408   ;;  %vm1231_vm5 = vcmask 1043458  }
  0x19   : > { %s348_s29 = scalar_select %p347_p13, %s7113_s28, 15  ;;  %620 = vmatpush.msra.mxu1 %v5588_v5  ;;  %718 = vmatpush.msra.mxu2 %v442_v2  ;;  %v5656_v12 = vld [vmem:[%s10071_s1 + $0x58] sm:$0xff]  ;;  %v5655_v13 = vld [vmem:[%s10071_s1 + $0x50] sm:$0xff]  ;;  %v5654_v46 = vld [vmem:[%s10071_s1 + $0x48] sm:$0xff]  ;;  %vm1234_vm6 = vcmask 1045508   ;;  %vm1856_vm7 = vcmask 1041409  }
  0x1a   : > { %783 = vmatpush.msra.mxu3 %v443_v3  ;;  %556 = vmatpush.msra.mxu0 %v5585_v8  ;;  %v5653_v47 = vld [vmem:[%s10071_s1 + $0x40] sm:$0xff]  ;;  %vm1858_vm8 = vcmask 1042434   ;;  %vm1860_vm9 = vcmask 1043459   ;;  %vm1862_vm10 = vcmask 1044484   ;;  %vm1864_vm11 = vcmask 1045509   ;;  %s7002_s26 = smov 112   ;;  %vm6009_vm15 = vmneg %vm385_vm0 }
  0x1b   : > { %s6605_s14 = sshll.u32 %s348_s29, 4  ;;  %621 = vmatpush.msra.mxu1 %v5586_v11  ;;  %vm1866_vm12 = vcmask 1046534   ;;  %vm1868_vm13 = vcmask 1047559   ;;  %vm2007_vm14 = vcmask 916480   ;;  %s7003_s17 = smov 96  }
  0x1c   : > { %s7120_s21 = scalar_lea.vmem %s10070_s0, %s6605_s14  ;;  %925 = vmatpush.msrb.mxu0 %v5655_v13  ;;  %s343_s29 = sand.u32 1, %s6989_s10  }
  0x1d   : > { %v353_v6 = vld [vmem:[%s7120_s21] sm:$0xff]  ;;  %v354_v7 = vld [vmem:[%s7120_s21 + $0x8] sm:$0xff]  ;;  %990 = vmatpush.msrb.mxu1 %v5656_v12  ;;  %v355_v20 = vld [vmem:[%s7120_s21 + $0x10] sm:$0xff]  ;;  %s5581_s14 = sshll.u32 %s343_s29, 3 }
  0x1e   : > { %v386_v9 = vrot.slane %v353_v6, 7  ;;  %v387_v10 = vrot.slane %v354_v7, 7  ;;  %v356_v21 = vld [vmem:[%s7120_s21 + $0x18] sm:$0xff]  ;;  %v389_v23 = vrot.slane %v355_v20, 7  ;;  %v357_v32 = vld [vmem:[%s7120_s21 + $0x20] sm:$0xff]  ;;  %v358_v33 = vld [vmem:[%s7120_s21 + $0x28] sm:$0xff]  ;;  %926 = vmatpush.msrb.mxu0 %v5653_v47 }
  0x1f   : > { %v390_v24 = vrot.slane %v356_v21, 7  ;;  %v392_v35 = vrot.slane %v357_v32, 7  ;;  %v393_v36 = vrot.slane %v358_v33, 7  ;;  %v359_v44 = vld [vmem:[%s7120_s21 + $0x30] sm:$0xff]  ;;  %v360_v45 = vld [vmem:[%s7120_s21 + $0x38] sm:$0xff]  ;;  %991 = vmatpush.msrb.mxu1 %v5654_v46  ;;  %v361_v58 = vld [vmem:[%s7120_s21 + $0x40] sm:$0xff] }
  0x20   : > { %v7155_v14 = vsel %vm385_vm0, %v386_v9, %v387_v10  ;;  %v7158_v15 = vsel %vm385_vm0, 0.0, %v386_v9  ;;  %v7167_v18 = vsel %vm385_vm0, %v387_v10, 0.0  ;;  %v7184_v27 = vsel %vm385_vm0, 0.0, %v389_v23  ;;  %v362_v59 = vld [vmem:[%s7120_s21 + $0x48] sm:$0xff]  ;;  %v363_v6 = vld [vmem:[%s7120_s21 + $0x50] sm:$0xff]  ;;  %v364_v7 = vld [vmem:[%s7120_s21 + $0x58] sm:$0xff] }
  0x21   : > { %5621 = vmatmul.msk.f32.vlgmr.msra.gmra.mxu2 %vm508_vm1, %v7158_v15  ;;  %5637 = vmatmul.msk.f32.vlgmr.msra.gmra.mxu3 %vm508_vm1, %v7158_v15  ;;  %v463_v16 = vrot.slane %v7158_v15, 1  ;;  %v464_v17 = vrot.slane %v7155_v14, 1  ;;  %v466_v22 = vrot.slane %v7167_v18, 1  ;;  %v7181_v26 = vsel %vm385_vm0, %v389_v23, %v390_v24  ;;  %v365_v21 = vld [vmem:[%s7120_s21 + $0x60] sm:$0xff]  ;;  %s345_s24 = scalar_lea.vmem [#allocation5], %s5581_s14 }
  0x22   : > { %v468_v28 = vrot.slane %v7184_v27, 1  ;;  %v469_v29 = vrot.slane %v7181_v26, 1  ;;  %v7196_v31 = vsel %vm385_vm0, %v390_v24, 0.0  ;;  %v7209_v38 = vsel %vm385_vm0, %v392_v35, %v393_v36  ;;  %s5501_s25 = sshll.u32 %s345_s24, 4  ;;  %s5502_s25 = int_to_ptr.vmem [resolvable:$true] %s5501_s25 }
  0x23   : > { %v465_v19 = vsel %vm462_vm2, %v463_v16, %v464_v17  ;;  %v467_v25 = vsel %vm462_vm2, %v464_v17, %v466_v22  ;;  %v471_v34 = vrot.slane %v7196_v31, 1  ;;  %v7212_v39 = vsel %vm385_vm0, 0.0, %v392_v35  ;;  %v366_v22 = vld [vmem:[%s7120_s21 + $0x68] sm:$0xff] }
  0x24   : > { %5589 = vmatmul.msk.f32.vlgmr.msra.gmra.mxu0 %vm508_vm1, %v465_v19  ;;  %5605 = vmatmul.msk.f32.vlgmr.msra.gmra.mxu1 %vm508_vm1, %v465_v19  ;;  %v470_v30 = vsel %vm462_vm2, %v468_v28, %v469_v29  ;;  %v473_v40 = vrot.slane %v7212_v39, 1  ;;  %v474_v41 = vrot.slane %v7209_v38, 1  ;;  %v7224_v43 = vsel %vm385_vm0, %v393_v36, 0.0  ;;  %v367_v36 = vld [vmem:[%s7120_s21 + $0x70] sm:$0xff] }
  0x25   : > { %v472_v37 = vsel %vm462_vm2, %v469_v29, %v471_v34  ;;  %v476_v48 = vrot.slane %v7224_v43, 1  ;;  %v395_v49 = vrot.slane %v359_v44, 7  ;;  %v396_v50 = vrot.slane %v360_v45, 7 }
  0x26   : > { %v475_v42 = vsel %vm462_vm2, %v473_v40, %v474_v41  ;;  %v398_v61 = vrot.slane %v361_v58, 7  ;;  %v399_v62 = vrot.slane %v362_v59, 7  ;;  %v401_v9 = vrot.slane %v363_v6, 7 }
  0x27   : > { %v477_v51 = vsel %vm462_vm2, %v474_v41, %v476_v48  ;;  %v7243_v52 = vsel %vm385_vm0, %v395_v49, %v396_v50  ;;  %v7246_v53 = vsel %vm385_vm0, 0.0, %v395_v49  ;;  %v7258_v57 = vsel %vm385_vm0, %v396_v50, 0.0 }
  0x28   : > { %v478_v54 = vrot.slane %v7246_v53, 1  ;;  %v479_v55 = vrot.slane %v7243_v52, 1  ;;  %v481_v60 = vrot.slane %v7258_v57, 1  ;;  %v7271_v0 = vsel %vm385_vm0, %v398_v61, %v399_v62 }
  0x29   : > { %5622 = vmatmul.msk.f32.gmra.mxu2 %vm508_vm1, %v7155_v14  ;;  %5638 = vmatmul.msk.f32.gmra.mxu3 %vm508_vm1, %v7155_v14  ;;  %v7274_v1 = vsel %vm385_vm0, 0.0, %v398_v61  ;;  %v484_v3 = vrot.slane %v7271_v0, 1  ;;  %v7286_v5 = vsel %vm385_vm0, %v399_v62, 0.0  ;;  %v402_v10 = vrot.slane %v364_v7, 7 }
  0x2a   : > { %v480_v56 = vsel %vm462_vm2, %v478_v54, %v479_v55  ;;  %v482_v63 = vsel %vm462_vm2, %v479_v55, %v481_v60  ;;  %v483_v2 = vrot.slane %v7274_v1, 1  ;;  %v486_v8 = vrot.slane %v7286_v5, 1 }
  0x2b   : > { %v7299_v12 = vsel %vm385_vm0, %v401_v9, %v402_v10  ;;  %v7302_v13 = vsel %vm385_vm0, 0.0, %v401_v9  ;;  %v7314_v20 = vsel %vm385_vm0, %v402_v10, 0.0  ;;  %v404_v24 = vrot.slane %v365_v21, 7 }
  0x2c   : > { %5590 = vmatmul.msk.f32.gmra.mxu0 %vm508_vm1, %v467_v25  ;;  %5606 = vmatmul.msk.f32.gmra.mxu1 %vm508_vm1, %v467_v25  ;;  %v485_v4 = vsel %vm462_vm2, %v483_v2, %v484_v3  ;;  %v487_v11 = vsel %vm462_vm2, %v484_v3, %v486_v8  ;;  %v488_v16 = vrot.slane %v7302_v13, 1  ;;  %v489_v17 = vrot.slane %v7299_v12, 1 }
  0x2d   : > { %v491_v23 = vrot.slane %v7314_v20, 1  ;;  %v405_v25 = vrot.slane %v366_v22, 7  ;;  %v407_v41 = vrot.slane %v367_v36, 7  ;;  %v834_v55 = vrot.slane %v7158_v15, 2 }
  0x2e   : > { %v490_v19 = vsel %vm462_vm2, %v488_v16, %v489_v17  ;;  %v839_v6 = vrot.slane %v7184_v27, 2  ;;  %v840_v7 = vrot.slane %v7181_v26, 2  ;;  %v842_v16 = vrot.slane %v7196_v31, 2 }
  0x2f   : > { %v492_v28 = vsel %vm462_vm2, %v489_v17, %v491_v23  ;;  %v7327_v29 = vsel %vm385_vm0, %v404_v24, %v405_v25  ;;  %v7342_v35 = vsel %vm385_vm0, %v405_v25, 0.0  ;;  %v7358_v46 = vsel %vm385_vm0, 0.0, %v407_v41 }
  0x30   : > { %v494_v33 = vrot.slane %v7327_v29, 1  ;;  %v496_v40 = vrot.slane %v7342_v35, 1  ;;  %v498_v47 = vrot.slane %v7358_v46, 1  ;;  %v841_v9 = vsel %vm833_vm3, %v839_v6, %v840_v7 }
  0x31   : > { %5623 = vmatmul.msk.f32.gmra.mxu2 %vm508_vm1, %v7184_v27  ;;  %5639 = vmatmul.msk.f32.gmra.mxu3 %vm508_vm1, %v7184_v27  ;;  %v844_v22 = vrot.slane %v7212_v39, 2  ;;  %v845_v23 = vrot.slane %v7209_v38, 2 }
  0x32   : > { %v497_v44 = vsel %vm462_vm2, %v494_v33, %v496_v40  ;;  %v849_v40 = vrot.slane %v7246_v53, 2 }
  0x33   : > { %v846_v25 = vsel %vm833_vm3, %v844_v22, %v845_v23  ;;  %v859_v22 = vrot.slane %v7302_v13, 2 }
  0x34   : > { %5591 = vmatmul.msk.f32.gmra.mxu0 %vm508_vm1, %v470_v30  ;;  %5607 = vmatmul.msk.f32.gmra.mxu1 %vm508_vm1, %v470_v30  ;;  %v7330_v30 = vsel %vm385_vm0, 0.0, %v404_v24 }
  0x35   : > { %v493_v32 = vrot.slane %v7330_v30, 1 }
  0x37   : > { %v495_v34 = vsel %vm462_vm2, %v493_v32, %v494_v33  ;;  %v847_v33 = vrot.slane %v7224_v43, 2 }
  0x39   : > { %5624 = vmatmul.msk.f32.gmra.mxu2 %vm508_vm1, %v7181_v26  ;;  %5640 = vmatmul.msk.f32.gmra.mxu3 %vm508_vm1, %v7181_v26  ;;  %v843_v26 = vsel %vm833_vm3, %v840_v7, %v842_v16 }
  0x3c   : > { %5592 = vmatmul.msk.f32.gmra.mxu0 %vm508_vm1, %v472_v37  ;;  %5608 = vmatmul.msk.f32.gmra.mxu1 %vm508_vm1, %v472_v37  ;;  %v368_v37 = vld [vmem:[%s7120_s21 + $0x78] sm:$0xff]  ;;  %s5499_s21 = scalar_lea.hbm %s10079_s9, %s7113_s28 }
  0x3d   : > { %s5503_s13 = sshll.u32 %s5499_s21, 4  ;;  %s5504_s13 = int_to_ptr.hbm [resolvable:$true] %s5503_s13 }
  0x3e   : > { %s6945_s27 = sshra.s32 %s5504_s13, 4  ;;  %s6946_s27 = int_to_ptr.hbm [resolvable:$true] %s6945_s27 }
  0x3f   : > { %s6947_s16 = scalar_lea.hbm %s6946_s27, 8  ;;  %p6952_p3 = scmp.lt.s32.totalorder %s6946_s27, %s10079_s9 }
  0x40   : > { %p6948_p0 = scmp.ne.s32.totalorder %s6946_s27, %s6947_s16 }
  0x41   : > { %5625 = vmatmul.msk.f32.gmra.mxu2 %vm508_vm1, %v7212_v39  ;;  %5641 = vmatmul.msk.f32.gmra.mxu3 %vm508_vm1, %v7212_v39 }
  0x42   : > { %p6949_p1 = pnand %p6948_p0, %p7092_p5 }
  0x44   : > { %5593 = vmatmul.msk.f32.gmra.mxu0 %vm508_vm1, %v475_v42  ;;  %5609 = vmatmul.msk.f32.gmra.mxu1 %vm508_vm1, %v475_v42  ;;  %v408_v42 = vrot.slane %v368_v37, 7  ;;  %p6950_p2 = pneg %p6949_p1 }
  0x46   : > { %v7355_v45 = vsel %vm385_vm0, %v407_v41, %v408_v42  ;;  %v7370_v50 = vsel %vm385_vm0, %v408_v42, 0.0  ;;  %v850_v41 = vrot.slane %v7243_v52, 2 }
  0x47   : > { %v499_v48 = vrot.slane %v7355_v45, 1 }
  0x49   : > { %5626 = vmatmul.msk.f32.gmra.mxu2 %vm508_vm1, %v7209_v38  ;;  %5642 = vmatmul.msk.f32.gmra.mxu3 %vm508_vm1, %v7209_v38  ;;  %v500_v49 = vsel %vm462_vm2, %v498_v47, %v499_v48  ;;  %v848_v38 = vsel %vm833_vm3, %v845_v23, %v847_v33  ;;  %v860_v23 = vrot.slane %v7299_v12, 2 }
  0x4c   : > { %5594 = vmatmul.msk.f32.gmra.mxu0 %vm508_vm1, %v477_v51  ;;  %5610 = vmatmul.msk.f32.gmra.mxu1 %vm508_vm1, %v477_v51  ;;  %v501_v51 = vrot.slane %v7370_v50, 1 }
  0x4e   : > { %v502_v54 = vsel %vm462_vm2, %v499_v48, %v501_v51 }
  0x51   : > { %5627 = vmatmul.msk.f32.gmra.mxu2 %vm508_vm1, %v7246_v53  ;;  %5643 = vmatmul.msk.f32.gmra.mxu3 %vm508_vm1, %v7246_v53 }
  0x54   : > { %5595 = vmatmul.msk.f32.gmra.mxu0 %vm508_vm1, %v480_v56  ;;  %5611 = vmatmul.msk.f32.gmra.mxu1 %vm508_vm1, %v480_v56  ;;  %v835_v56 = vrot.slane %v7155_v14, 2 }
  0x56   : > { %v836_v60 = vsel %vm833_vm3, %v834_v55, %v835_v56 }
  0x59   : > { %5628 = vmatmul.msk.f32.gmra.mxu2 %vm508_vm1, %v7243_v52  ;;  %5644 = vmatmul.msk.f32.gmra.mxu3 %vm508_vm1, %v7243_v52 }
  0x5c   : > { %5596 = vmatmul.msk.f32.gmra.mxu0 %vm508_vm1, %v482_v63  ;;  %5612 = vmatmul.msk.f32.gmra.mxu1 %vm508_vm1, %v482_v63  ;;  %v837_v63 = vrot.slane %v7167_v18, 2 }
  0x5e   : > { %v838_v2 = vsel %vm833_vm3, %v835_v56, %v837_v63  ;;  %v854_v56 = vrot.slane %v7274_v1, 2 }
  0x61   : > { %5629 = vmatmul.msk.f32.gmra.mxu2 %vm508_vm1, %v7274_v1  ;;  %5645 = vmatmul.msk.f32.gmra.mxu3 %vm508_vm1, %v7274_v1 }
  0x64   : > { %5597 = vmatmul.msk.f32.gmra.mxu0 %vm508_vm1, %v485_v4  ;;  %5613 = vmatmul.msk.f32.gmra.mxu1 %vm508_vm1, %v485_v4 }
  0x69   : > { %5630 = vmatmul.msk.f32.gmra.mxu2 %vm508_vm1, %v7271_v0  ;;  %5646 = vmatmul.msk.f32.gmra.mxu3 %vm508_vm1, %v7271_v0 }
  0x6c   : > { %5598 = vmatmul.msk.f32.gmra.mxu0 %vm508_vm1, %v487_v11  ;;  %5614 = vmatmul.msk.f32.gmra.mxu1 %vm508_vm1, %v487_v11 }
  0x71   : > { %5631 = vmatmul.msk.f32.gmra.mxu2 %vm508_vm1, %v7302_v13  ;;  %5647 = vmatmul.msk.f32.gmra.mxu3 %vm508_vm1, %v7302_v13 }
  0x74   : > { %5599 = vmatmul.msk.f32.gmra.mxu0 %vm508_vm1, %v490_v19  ;;  %5615 = vmatmul.msk.f32.gmra.mxu1 %vm508_vm1, %v490_v19 }
  0x79   : > { %5632 = vmatmul.msk.f32.gmra.mxu2 %vm508_vm1, %v7299_v12  ;;  %5648 = vmatmul.msk.f32.gmra.mxu3 %vm508_vm1, %v7299_v12 }
  0x7c   : > { %5600 = vmatmul.msk.f32.gmra.mxu0 %vm508_vm1, %v492_v28  ;;  %5616 = vmatmul.msk.f32.gmra.mxu1 %vm508_vm1, %v492_v28 }
  0x81   : > { %5633 = vmatmul.msk.f32.gmra.mxu2 %vm508_vm1, %v7330_v30  ;;  %5649 = vmatmul.msk.f32.gmra.mxu3 %vm508_vm1, %v7330_v30 }
  0x84   : > { %5601 = vmatmul.msk.f32.gmra.mxu0 %vm508_vm1, %v495_v34  ;;  %5617 = vmatmul.msk.f32.gmra.mxu1 %vm508_vm1, %v495_v34 }
  0x89   : > { %5634 = vmatmul.msk.f32.gmra.mxu2 %vm508_vm1, %v7327_v29  ;;  %5650 = vmatmul.msk.f32.gmra.mxu3 %vm508_vm1, %v7327_v29 }
  0x8c   : > { %5602 = vmatmul.msk.f32.gmra.mxu0 %vm508_vm1, %v497_v44  ;;  %5618 = vmatmul.msk.f32.gmra.mxu1 %vm508_vm1, %v497_v44  ;;  %v851_v44 = vsel %vm833_vm3, %v849_v40, %v850_v41  ;;  %v862_v40 = vrot.slane %v7314_v20, 2 }
  0x91   : > { %5635 = vmatmul.msk.f32.gmra.mxu2 %vm508_vm1, %v7358_v46  ;;  %5651 = vmatmul.msk.f32.gmra.mxu3 %vm508_vm1, %v7358_v46 }
  0x94   : > { %5603 = vmatmul.msk.f32.gmra.mxu0 %vm508_vm1, %v500_v49  ;;  %5619 = vmatmul.msk.f32.gmra.mxu1 %vm508_vm1, %v500_v49  ;;  %v852_v49 = vrot.slane %v7258_v57, 2 }
  0x96   : > { %v853_v52 = vsel %vm833_vm3, %v850_v41, %v852_v49  ;;  %v863_v49 = vsel %vm833_vm3, %v860_v23, %v862_v40 }
  0x99   : > { %5636 = vmatmul.msk.f32.gmra.mxu2 %vm508_vm1, %v7355_v45  ;;  %5652 = vmatmul.msk.f32.gmra.mxu3 %vm508_vm1, %v7355_v45 }
  0x9c   : > { %5604 = vmatmul.msk.f32.gmra.mxu0 %vm508_vm1, %v502_v54  ;;  %5620 = vmatmul.msk.f32.gmra.mxu1 %vm508_vm1, %v502_v54 }
  0xa1   : > { %v7384_v58 = vpop.f32.mrf.mxu0  ;;  %v7386_v59 = vpop.f32.mrf.mxu1 }
  0xa4   : > { %v7389_v61 = vpop.f32.mrf.mxu2  ;;  %v7391_v62 = vpop.f32.mrf.mxu3  ;;  %5657 = vmatmul.msk.f32.vlgmr.msrb.gmra.mxu0 %vm508_vm1, %v836_v60  ;;  %5673 = vmatmul.msk.f32.vlgmr.msrb.gmra.mxu1 %vm508_vm1, %v836_v60  ;;  %v855_v60 = vrot.slane %v7271_v0, 2 }
  0xa9   : > { %v7396_v15 = vpop.f32.mrf.mxu0  ;;  %v7398_v14 = vpop.f32.mrf.mxu1 }
  0xac   : > { %v7401_v3 = vpop.f32.mrf.mxu2  ;;  %v7403_v4 = vpop.f32.mrf.mxu3  ;;  %5658 = vmatmul.msk.f32.gmra.mxu0 %vm508_vm1, %v838_v2  ;;  %5674 = vmatmul.msk.f32.gmra.mxu1 %vm508_vm1, %v838_v2  ;;  %v856_v2 = vsel %vm833_vm3, %v854_v56, %v855_v60  ;;  %v865_v56 = vrot.slane %v7327_v29, 2 }
  0xb1   : > { %v7409_v8 = vpop.f32.mrf.mxu0  ;;  %v7411_v18 = vpop.f32.mrf.mxu1 }
  0xb4   : > { %v7414_v10 = vpop.f32.mrf.mxu2  ;;  %v7416_v11 = vpop.f32.mrf.mxu3  ;;  %5659 = vmatmul.msk.f32.gmra.mxu0 %vm508_vm1, %v841_v9  ;;  %5675 = vmatmul.msk.f32.gmra.mxu1 %vm508_vm1, %v841_v9  ;;  %v857_v9 = vrot.slane %v7286_v5, 2 }
  0xb6   : > { %v858_v0 = vsel %vm833_vm3, %v855_v60, %v857_v9 }
  0xb9   : > { %v7421_v17 = vpop.f32.mrf.mxu0  ;;  %v7423_v27 = vpop.f32.mrf.mxu1 }
  0xbc   : > { %v7426_v19 = vpop.f32.mrf.mxu2  ;;  %v7428_v21 = vpop.f32.mrf.mxu3  ;;  %5660 = vmatmul.msk.f32.gmra.mxu0 %vm508_vm1, %v843_v26  ;;  %5676 = vmatmul.msk.f32.gmra.mxu1 %vm508_vm1, %v843_v26 }
  0xc1   : > { %v7434_v24 = vpop.f32.mrf.mxu0  ;;  %v7436_v31 = vpop.f32.mrf.mxu1 }
  0xc4   : > { %v7439_v28 = vpop.f32.mrf.mxu2  ;;  %v7441_v32 = vpop.f32.mrf.mxu3  ;;  %5661 = vmatmul.msk.f32.gmra.mxu0 %vm508_vm1, %v846_v25  ;;  %5677 = vmatmul.msk.f32.gmra.mxu1 %vm508_vm1, %v846_v25 }
  0xc9   : > { %v7446_v34 = vpop.f32.mrf.mxu0  ;;  %v7448_v39 = vpop.f32.mrf.mxu1 }
  0xcc   : > { %v7451_v36 = vpop.f32.mrf.mxu2  ;;  %v7453_v37 = vpop.f32.mrf.mxu3  ;;  %5662 = vmatmul.msk.f32.gmra.mxu0 %vm508_vm1, %v848_v38  ;;  %5678 = vmatmul.msk.f32.gmra.mxu1 %vm508_vm1, %v848_v38  ;;  %v861_v38 = vsel %vm833_vm3, %v859_v22, %v860_v23  ;;  %v867_v22 = vrot.slane %v7342_v35, 2 }
  0xce   : > { %v868_v29 = vsel %vm833_vm3, %v865_v56, %v867_v22 }
  0xd1   : > { %v7459_v42 = vpop.f32.mrf.mxu0  ;;  %v7461_v43 = vpop.f32.mrf.mxu1 }
  0xd4   : > { %v7464_v47 = vpop.f32.mrf.mxu2  ;;  %v7466_v48 = vpop.f32.mrf.mxu3  ;;  %5663 = vmatmul.msk.f32.gmra.mxu0 %vm508_vm1, %v851_v44  ;;  %5679 = vmatmul.msk.f32.gmra.mxu1 %vm508_vm1, %v851_v44 }
  0xd9   : > { %v7471_v51 = vpop.f32.mrf.mxu0  ;;  %v7473_v53 = vpop.f32.mrf.mxu1 }
  0xdc   : > { %v7476_v54 = vpop.f32.mrf.mxu2  ;;  %v7478_v55 = vpop.f32.mrf.mxu3  ;;  %5664 = vmatmul.msk.f32.gmra.mxu0 %vm508_vm1, %v853_v52  ;;  %5680 = vmatmul.msk.f32.gmra.mxu1 %vm508_vm1, %v853_v52  ;;  %v864_v52 = vrot.slane %v7330_v30, 2 }
  0xde   : > { %v866_v9 = vsel %vm833_vm3, %v864_v52, %v865_v56  ;;  %v870_v52 = vrot.slane %v7355_v45, 2  ;;  %v872_v56 = vrot.slane %v7370_v50, 2  ;;  %v1073_v45 = vld [vmem:[%s10072_s2] sm:$0x3] }
  0xdf   : > { %v1111_v50 = vld [vmem:[%s10073_s3] sm:$0x3] }
  0xe1   : > { %v7484_v63 = vpop.f32.mrf.mxu0  ;;  %v7486_v57 = vpop.f32.mrf.mxu1 }
  0xe4   : > { %v7489_v6 = vpop.f32.mrf.mxu2  ;;  %v7491_v7 = vpop.f32.mrf.mxu3  ;;  %5665 = vmatmul.msk.f32.gmra.mxu0 %vm508_vm1, %v856_v2  ;;  %5681 = vmatmul.msk.f32.gmra.mxu1 %vm508_vm1, %v856_v2 }
  0xe9   : > { %v7496_v16 = vpop.f32.mrf.mxu0  ;;  %v7498_v1 = vpop.f32.mrf.mxu1 }
  0xec   : > { %v7501_v26 = vpop.f32.mrf.mxu2  ;;  %5666 = vmatmul.msk.f32.gmra.mxu0 %vm508_vm1, %v858_v0  ;;  %5682 = vmatmul.msk.f32.gmra.mxu1 %vm508_vm1, %v858_v0  ;;  %v7507_v25 = vpop.f32.mrf.mxu3 }
  0xf1   : > { %v7509_v33 = vpop.f32.mrf.mxu0  ;;  %v7511_v5 = vpop.f32.mrf.mxu1 }
  0xf4   : > { %5667 = vmatmul.msk.f32.gmra.mxu0 %vm508_vm1, %v861_v38  ;;  %5683 = vmatmul.msk.f32.gmra.mxu1 %vm508_vm1, %v861_v38  ;;  %v7517_v41 = vpop.f32.mrf.mxu2  ;;  %v7519_v44 = vpop.f32.mrf.mxu3 }
  0xf9   : > { %v7521_v13 = vpop.f32.mrf.mxu0  ;;  %v7523_v12 = vpop.f32.mrf.mxu1 }
  0xfc   : > { %5668 = vmatmul.msk.f32.gmra.mxu0 %vm508_vm1, %v863_v49  ;;  %5684 = vmatmul.msk.f32.gmra.mxu1 %vm508_vm1, %v863_v49  ;;  %v7530_v60 = vpop.f32.mrf.mxu2  ;;  %v7537_v0 = vpop.f32.mrf.mxu3  ;;  %v869_v49 = vrot.slane %v7358_v46, 2  ;;  %v873_v46 = vsel %vm833_vm3, %v870_v52, %v872_v56 }
  0xfd   : > { %10143 = vst [vmem:[#allocation10_spill] sm:$0xff] %v7537_v0  ;;  %v7596_v0 = vperm.slane %v1111_v50, 1 }
  0xfe   : > { %v871_v35 = vsel %vm833_vm3, %v869_v49, %v870_v52  ;;  %v724_v52 = vadd.f32 %v7401_v3, %v7396_v15 }
 0x101   : > { %v7532_v20 = vpop.f32.mrf.mxu0  ;;  %v7534_v2 = vpop.f32.mrf.mxu1 }
 0x102   : > { %10141 = vst [vmem:[#allocation8_spill] sm:$0xff] %v7532_v20 }
 0x103   : > { %10142 = vst [vmem:[#allocation9_spill] sm:$0xff] %v7534_v2 }
 0x104   : > { %5669 = vmatmul.msk.f32.gmra.mxu0 %vm508_vm1, %v866_v9  ;;  %5685 = vmatmul.msk.f32.gmra.mxu1 %vm508_vm1, %v866_v9  ;;  %v756_v38 = vpop.f32.mrf.mxu2  ;;  %v821_v40 = vpop.f32.mrf.mxu3 }
 0x109   : > { %v7542_v23 = vpop.f32.mrf.mxu0  ;;  %v7544_v30 = vpop.f32.mrf.mxu1 }
 0x10a   : > { %10144 = vst [vmem:[#allocation11_spill] sm:$0xff] %v7542_v23 }
 0x10b   : > { %10145 = vst [vmem:[#allocation12_spill] sm:$0xff] %v7544_v30 }
 0x10c   : > { %5670 = vmatmul.msk.f32.gmra.mxu0 %vm508_vm1, %v868_v29  ;;  %5686 = vmatmul.msk.f32.gmra.mxu1 %vm508_vm1, %v868_v29  ;;  %v759_v23 = vpop.f32.mrf.mxu2  ;;  %v824_v22 = vpop.f32.mrf.mxu3 }
 0x111   : > { %v7551_v2 = vpop.f32.mrf.mxu0  ;;  %v7553_v9 = vpop.f32.mrf.mxu1 }
 0x112   : > { %10146 = vst [vmem:[#allocation13_spill] sm:$0xff] %v7551_v2  ;;  %v789_v2 = vadd.f32 %v7403_v4, %v7398_v14  ;;  %v7600_v14 = vadd.f32 %v7428_v21, %v7423_v27  ;;  %v7604_v4 = vadd.f32 %v7439_v28, %v7434_v24  ;;  %v7630_v21 = vadd.f32 %v7476_v54, %v7471_v51  ;;  %v10150_v51 = vld [vmem:[#allocation8_spill] sm:$0xff]  ;;  %v10151_v54 = vld [vmem:[#allocation9_spill] sm:$0xff] }
 0x113   : > { %10147 = vst [vmem:[#allocation14_spill] sm:$0xff] %v7553_v9  ;;  %v7578_v9 = vperm.slane %v1073_v45, 1  ;;  %v7634_v24 = vadd.f32 %v7478_v55, %v7473_v53  ;;  %v7642_v28 = vadd.f32 %v7491_v7, %v7486_v57  ;;  %v7671_v53 = vadd.f32 %v756_v38, %v10150_v51 }
 0x114   : > { %5671 = vmatmul.msk.f32.gmra.mxu0 %vm508_vm1, %v871_v35  ;;  %5687 = vmatmul.msk.f32.gmra.mxu1 %vm508_vm1, %v871_v35  ;;  %v762_v49 = vpop.f32.mrf.mxu2  ;;  %v721_v35 = vadd.f32 %v7389_v61, %v7384_v58  ;;  %v827_v56 = vpop.f32.mrf.mxu3  ;;  %v7584_v58 = vadd.f32 %v7414_v10, %v7409_v8  ;;  %v7588_v61 = vadd.f32 %v7416_v11, %v7411_v18 }
 0x115   : > { %v7608_v8 = vadd.f32 %v7441_v32, %v7436_v31  ;;  %v7612_v18 = vadd.f32 %v7451_v36, %v7446_v34  ;;  %v7616_v10 = vadd.f32 %v7453_v37, %v7448_v39  ;;  %v7620_v11 = vadd.f32 %v7464_v47, %v7459_v42  ;;  %v10149_v47 = vld [vmem:[#allocation10_spill] sm:$0xff] }
 0x116   : > { %v7638_v31 = vadd.f32 %v7489_v6, %v7484_v63  ;;  %v7646_v32 = vadd.f32 %v7501_v26, %v7496_v16  ;;  %v7652_v36 = vadd.f32 %v7507_v25, %v7498_v1  ;;  %v7656_v37 = vadd.f32 %v7517_v41, %v7509_v33  ;;  %v10152_v6 = vld [vmem:[#allocation11_spill] sm:$0xff]  ;;  %v10153_v41 = vld [vmem:[#allocation12_spill] sm:$0xff] }
 0x117   : > { %v7660_v42 = vadd.f32 %v7519_v44, %v7511_v5  ;;  %v7674_v55 = vadd.f32 %v821_v40, %v10151_v54  ;;  %v7677_v7 = vadd.f32 %v759_v23, %v10152_v6  ;;  %v7680_v44 = vadd.f32 %v824_v22, %v10153_v41 }
 0x119   : > { %v603_v30 = vpop.f32.mrf.mxu0  ;;  %v7559_v29 = vpop.f32.mrf.mxu1 }
 0x11a   : > { %10148 = vst [vmem:[#allocation15_spill] sm:$0xff] %v7559_v29  ;;  %v786_v29 = vadd.f32 %v7391_v62, %v7386_v59  ;;  %v7592_v59 = vadd.f32 %v7426_v19, %v7421_v17  ;;  %v7626_v19 = vadd.f32 %v7466_v48, %v7461_v43  ;;  %v7664_v43 = vadd.f32 %v7530_v60, %v7521_v13  ;;  %v10154_v13 = vld [vmem:[#allocation13_spill] sm:$0xff]  ;;  %v10155_v60 = vld [vmem:[#allocation14_spill] sm:$0xff] }
 0x11b   : > { %v7668_v48 = vadd.f32 %v10149_v47, %v7523_v12  ;;  %v7683_v12 = vadd.f32 %v762_v49, %v10154_v13 }
 0x11c   : > { %5672 = vmatmul.msk.f32.gmra.mxu0 %vm508_vm1, %v873_v46  ;;  %5688 = vmatmul.msk.f32.gmra.mxu1 %vm508_vm1, %v873_v46  ;;  %v7576_v46 = vperm.slane %v1073_v45, 0  ;;  %v7594_v45 = vperm.slane %v1111_v50, 0  ;;  %v765_v63 = vpop.f32.mrf.mxu2  ;;  %v830_v38 = vpop.f32.mrf.mxu3  ;;  %vm8481_vm1 = vmpackc.low %vm6009_vm15, %vm6009_vm15 }
 0x11d   : > { %v7688_v23 = vadd.f32 %v765_v63, %v603_v30 }
 0x121   : > { %v928_v62 = vpop.f32.mrf.mxu0  ;;  %v993_v15 = vpop.f32.mrf.mxu1  ;;  %v10156_v49 = vld [vmem:[#allocation15_spill] sm:$0xff] }
 0x122   : > { %v1041_v3 = vadd.f32 %v928_v62, %v721_v35  ;;  %v1042_v20 = vadd.f32 %v993_v15, %v786_v29  ;;  %v7695_v15 = vadd.f32 %v830_v38, %v10156_v49 }
 0x124   : > { %v1079_v17 = vmul.f32 %v7576_v46, %v1041_v3  ;;  %v1080_v27 = vmul.f32 %v7578_v9, %v1042_v20  ;;  %v7686_v20 = vadd.f32 %v827_v56, %v10155_v60 }
 0x126   : > { %v1117_v34 = vadd.f32 %v7594_v45, %v1079_v17  ;;  %v1118_v39 = vadd.f32 %v7596_v0, %v1080_v27 }
 0x128   : > { %v1150_v57 = vmax.f32 %v1118_v39, 0.0  ;;  %v1149_v26 = vmax.f32 %v1117_v34, 0.0 }
 0x129   : > { %v931_v16 = vpop.f32.mrf.mxu0  ;;  %v996_v1 = vpop.f32.mrf.mxu1 }
 0x12a   : > { %v1213_v25 = vrot.slane %v1150_v57, 6  ;;  %v1043_v33 = vadd.f32 %v931_v16, %v724_v52  ;;  %v1044_v5 = vadd.f32 %v996_v1, %v789_v2 }
 0x12c   : > { %v1230_v40 = vsel %vm1229_vm4, %v1149_v26, %v1213_v25  ;;  %v1232_v29 = vsel %vm1231_vm5, %v1149_v26, %v1213_v25  ;;  %v1235_v35 = vsel %vm1234_vm6, %v1149_v26, %v1213_v25  ;;  %v1237_v2 = vsel %vm833_vm3, %v1213_v25, %v1149_v26 }
 0x12d   : > { %v1233_v50 = vrot.slane %v1232_v29, 2  ;;  %v1236_v22 = vrot.slane %v1235_v35, 4  ;;  %v1238_v52 = vrot.slane %v1237_v2, 6  ;;  %v5689_v62 = vrot.slane %v1230_v40, 9 }
 0x12e   : > { %v1081_v56 = vmul.f32 %v7576_v46, %v1043_v33  ;;  %v1082_v30 = vmul.f32 %v7578_v9, %v1044_v5 }
 0x12f   : > { %v5690_v3 = vrot.slane %v1233_v50, 9  ;;  %v5691_v17 = vrot.slane %v1236_v22, 9  ;;  %v5692_v27 = vrot.slane %v1238_v52, 9  ;;  %v7699_v34 = vmax.f32 %v1230_v40, %v5689_v62 }
 0x130   : > { %v1119_v39 = vadd.f32 %v7594_v45, %v1081_v56  ;;  %v1120_v47 = vadd.f32 %v7596_v0, %v1082_v30 }
 0x131   : > { %v7703_v51 = vmax.f32 %v1233_v50, %v5690_v3  ;;  %v7705_v54 = vmax.f32 %v1236_v22, %v5691_v17  ;;  %v7707_v63 = vmax.f32 %v1238_v52, %v5692_v27  ;;  %v1728_v57 = vperm.slane %v7699_v34, 0  ;;  %v934_v6 = vpop.f32.mrf.mxu0  ;;  %v999_v16 = vpop.f32.mrf.mxu1 }
 0x132   : > { %v1729_v1 = vperm.slane %v7699_v34, 2  ;;  %v1151_v26 = vmax.f32 %v1119_v39, 0.0  ;;  %v1152_v25 = vmax.f32 %v1120_v47, 0.0  ;;  %v1045_v33 = vadd.f32 %v934_v6, %v7584_v58 }
 0x133   : > { %10157 = vst [vmem:[#allocation10_spill] sm:$0xff] %v7703_v51  ;;  %v1730_v5 = vperm.slane %v7703_v51, 0  ;;  %v1731_v41 = vperm.slane %v7703_v51, 2  ;;  %v1046_v13 = vadd.f32 %v999_v16, %v7588_v61  ;;  %v1732_v60 = vperm.slane %v7705_v54, 0 }
 0x134   : > { %10158 = vst [vmem:[#allocation8_spill] sm:$0xff] %v7707_v63  ;;  %v1214_v38 = vrot.slane %v1152_v25, 6  ;;  %v1083_v40 = vmul.f32 %v7576_v46, %v1045_v33  ;;  %v1733_v29 = vperm.slane %v7705_v54, 2  ;;  %v1734_v35 = vperm.slane %v7707_v63, 0 }
 0x135   : > { %v1084_v2 = vmul.f32 %v7578_v9, %v1046_v13  ;;  %v1857_v58 = vsel %vm1856_vm7, %v1730_v5, %v1728_v57  ;;  %v1870_v22 = vsel %vm1856_vm7, %v1731_v41, %v1729_v1 }
 0x136   : > { %v1239_v52 = vsel %vm1229_vm4, %v1151_v26, %v1214_v38  ;;  %v1240_v61 = vsel %vm1231_vm5, %v1151_v26, %v1214_v38  ;;  %v1242_v62 = vsel %vm1234_vm6, %v1151_v26, %v1214_v38  ;;  %v1121_v49 = vadd.f32 %v7594_v45, %v1083_v40 }
 0x137   : > { %v1241_v56 = vrot.slane %v1240_v61, 2  ;;  %v1243_v30 = vrot.slane %v1242_v62, 4  ;;  %v5693_v3 = vrot.slane %v1239_v52, 9  ;;  %v1122_v17 = vadd.f32 %v7596_v0, %v1084_v2 }
 0x138   : > { %v1153_v27 = vmax.f32 %v1121_v49, 0.0  ;;  %v1244_v39 = vsel %vm833_vm3, %v1214_v38, %v1151_v26  ;;  %v1859_v47 = vsel %vm1858_vm8, %v1732_v60, %v1857_v58  ;;  %v7731_v57 = vsel %vm1858_vm8, %v1733_v29, %v1870_v22 }
 0x139   : > { %v5694_v6 = vrot.slane %v1241_v56, 9  ;;  %v7733_v16 = vmax.f32 %v1239_v52, %v5693_v3  ;;  %v1154_v1 = vmax.f32 %v1122_v17, 0.0  ;;  %v937_v25 = vpop.f32.mrf.mxu0  ;;  %v1002_v33 = vpop.f32.mrf.mxu1  ;;  %v1245_v5 = vrot.slane %v1244_v39, 6 }
 0x13a   : > { %v1047_v41 = vadd.f32 %v937_v25, %v7592_v59  ;;  %v1048_v13 = vadd.f32 %v1002_v33, %v7600_v14  ;;  %v5695_v40 = vrot.slane %v1243_v30, 9  ;;  %v7738_v2 = vsel %vm1860_vm9, %v1734_v35, %v1859_v47 }
 0x13b   : > { %10159 = vst [vmem:[#allocation9_spill] sm:$0xff] %v7733_v16  ;;  %v1215_v26 = vrot.slane %v1154_v1, 6  ;;  %v5696_v60 = vrot.slane %v1245_v5, 9  ;;  %v7740_v38 = vmax.f32 %v1241_v56, %v5694_v6  ;;  %v1736_v29 = vperm.slane %v7733_v16, 0 }
 0x13c   : > { %v1085_v58 = vmul.f32 %v7576_v46, %v1047_v41  ;;  %v1086_v22 = vmul.f32 %v7578_v9, %v1048_v13  ;;  %v7745_v52 = vmax.f32 %v1243_v30, %v5695_v40 }
 0x13d   : > { %10160 = vst [vmem:[#allocation11_spill] sm:$0xff] %v7740_v38  ;;  %v1246_v14 = vsel %vm1229_vm4, %v1153_v27, %v1215_v26  ;;  %v1247_v61 = vsel %vm1231_vm5, %v1153_v27, %v1215_v26  ;;  %v1249_v35 = vsel %vm1234_vm6, %v1153_v27, %v1215_v26  ;;  %v1251_v62 = vsel %vm833_vm3, %v1215_v26, %v1153_v27 }
 0x13e   : > { %10161 = vst [vmem:[#allocation12_spill] sm:$0xff] %v7745_v52  ;;  %v1248_v49 = vrot.slane %v1247_v61, 2  ;;  %v1250_v56 = vrot.slane %v1249_v35, 4  ;;  %v1252_v3 = vrot.slane %v1251_v62, 6  ;;  %v5697_v17 = vrot.slane %v1246_v14, 9 }
 0x13f   : > { %v1123_v39 = vadd.f32 %v7594_v45, %v1085_v58  ;;  %v1124_v30 = vadd.f32 %v7596_v0, %v1086_v22  ;;  %v7754_v47 = vmax.f32 %v1245_v5, %v5696_v60  ;;  %v1738_v6 = vperm.slane %v7740_v38, 0 }
 0x140   : > { %v5698_v1 = vrot.slane %v1248_v49, 9  ;;  %v5699_v25 = vrot.slane %v1250_v56, 9  ;;  %v5700_v33 = vrot.slane %v1252_v3, 9  ;;  %v7757_v41 = vmax.f32 %v1246_v14, %v5697_v17 }
 0x141   : > { %10162 = vst [vmem:[#allocation13_spill] sm:$0xff] %v7754_v47  ;;  %v1155_v27 = vmax.f32 %v1123_v39, 0.0  ;;  %v1156_v13 = vmax.f32 %v1124_v30, 0.0  ;;  %v940_v40 = vpop.f32.mrf.mxu0  ;;  %v1005_v26 = vpop.f32.mrf.mxu1  ;;  %v1739_v61 = vperm.slane %v7740_v38, 2  ;;  %v1740_v58 = vperm.slane %v7745_v52, 0 }
 0x142   : > { %v7761_v5 = vmax.f32 %v1248_v49, %v5698_v1  ;;  %v7763_v60 = vmax.f32 %v1250_v56, %v5699_v25  ;;  %v7765_v22 = vmax.f32 %v1252_v3, %v5700_v33  ;;  %v1049_v17 = vadd.f32 %v940_v40, %v7604_v4 }
 0x143   : > { %v1216_v62 = vrot.slane %v1156_v13, 6  ;;  %v1050_v39 = vadd.f32 %v1005_v26, %v7608_v8  ;;  %v1741_v49 = vperm.slane %v7745_v52, 2  ;;  %v1742_v56 = vperm.slane %v7754_v47, 0 }
 0x144   : > { %10163 = vst [vmem:[#allocation14_spill] sm:$0xff] %v7761_v5  ;;  %v1087_v26 = vmul.f32 %v7576_v46, %v1049_v17  ;;  %v1743_v50 = vperm.slane %v7754_v47, 2  ;;  %v10166_v17 = vperm.slane %v7707_v63, 2 }
 0x145   : > { %10164 = vst [vmem:[#allocation15_spill] sm:$0xff] %v7765_v22  ;;  %v1253_v3 = vsel %vm1229_vm4, %v1155_v27, %v1216_v62  ;;  %v1254_v1 = vsel %vm1231_vm5, %v1155_v27, %v1216_v62  ;;  %v1256_v25 = vsel %vm1234_vm6, %v1155_v27, %v1216_v62  ;;  %v1258_v33 = vsel %vm833_vm3, %v1216_v62, %v1155_v27 }
 0x146   : > { %v1255_v13 = vrot.slane %v1254_v1, 2  ;;  %v1257_v4 = vrot.slane %v1256_v25, 4  ;;  %v1259_v40 = vrot.slane %v1258_v33, 6  ;;  %v5701_v8 = vrot.slane %v1253_v3, 9 }
 0x147   : > { %v1088_v59 = vmul.f32 %v7578_v9, %v1050_v39  ;;  %v1125_v27 = vadd.f32 %v7594_v45, %v1087_v26  ;;  %v1863_v1 = vsel %vm1862_vm10, %v1736_v29, %v7738_v2  ;;  %v1872_v39 = vsel %vm1860_vm9, %v10166_v17, %v7731_v57 }
 0x148   : > { %v5702_v14 = vrot.slane %v1255_v13, 9  ;;  %v5703_v30 = vrot.slane %v1257_v4, 9  ;;  %v7783_v35 = vmax.f32 %v1253_v3, %v5701_v8  ;;  %v1865_v3 = vsel %vm1864_vm11, %v1738_v6, %v1863_v1 }
 0x149   : > { %v1126_v62 = vadd.f32 %v7596_v0, %v1088_v59  ;;  %v943_v25 = vpop.f32.mrf.mxu0  ;;  %v1008_v33 = vpop.f32.mrf.mxu1  ;;  %v10168_v8 = vperm.slane %v7733_v16, 2  ;;  %v1157_v47 = vmax.f32 %v1125_v27, 0.0  ;;  %v1867_v2 = vsel %vm1866_vm12, %v1740_v58, %v1865_v3 }
 0x14a   : > { %10165 = vst [vmem:[#allocation16_spill] sm:$0xff] %v7783_v35  ;;  %v7794_v52 = vmax.f32 %v1255_v13, %v5702_v14  ;;  %v1051_v59 = vadd.f32 %v943_v25, %v7612_v18  ;;  %v1869_v57 = vsel %vm1868_vm13, %v1742_v56, %v1867_v2  ;;  %v1052_v6 = vadd.f32 %v1008_v33, %v7616_v10 }
 0x14b   : > { %v1873_v26 = vsel %vm1862_vm10, %v10168_v8, %v1872_v39  ;;  %v1158_v38 = vmax.f32 %v1126_v62, 0.0  ;;  %v5704_v39 = vrot.slane %v1259_v40, 9  ;;  %v7808_v8 = vmax.f32 %v1257_v4, %v5703_v30 }
 0x14c   : > { %10167 = vst [vmem:[#allocation17_spill] sm:$0xff] %v7794_v52  ;;  %v1874_v29 = vsel %vm1864_vm11, %v1739_v61, %v1873_v26  ;;  %v1089_v14 = vmul.f32 %v7576_v46, %v1051_v59  ;;  %v1090_v58 = vmul.f32 %v7578_v9, %v1052_v6  ;;  %v1751_v2 = vperm.slane %v7765_v22, 2 }
 0x14d   : > { %v1875_v17 = vsel %vm1866_vm12, %v1741_v49, %v1874_v29  ;;  %v1217_v13 = vrot.slane %v1158_v38, 6  ;;  %10169 = vst [vmem:[#allocation18_spill] sm:$0xff] %v7808_v8  ;;  %v7819_v59 = vmax.f32 %v1259_v40, %v5704_v39  ;;  %v10177_v61 = vperm.slane %v7761_v5, 0 }
 0x14e   : > { %v1876_v1 = vsel %vm1868_vm13, %v1743_v50, %v1875_v17  ;;  %v1127_v27 = vadd.f32 %v7594_v45, %v1089_v14  ;;  %v1128_v33 = vadd.f32 %v7596_v0, %v1090_v58 }
 0x14f   : > { %v6820_v18 = vpack.i.bf16 %v1876_v1, %v1869_v57  ;;  %v1260_v56 = vsel %vm1229_vm4, %v1157_v47, %v1217_v13  ;;  %v1261_v49 = vsel %vm1231_vm5, %v1157_v47, %v1217_v13  ;;  %v1263_v62 = vsel %vm1234_vm6, %v1157_v47, %v1217_v13  ;;  %10170 = vst [vmem:[#allocation19_spill] sm:$0xff] %v7819_v59 }
 0x150   : > { %v1265_v10 = vsel %vm833_vm3, %v1217_v13, %v1157_v47  ;;  %v1262_v38 = vrot.slane %v1261_v49, 2  ;;  %v1264_v50 = vrot.slane %v1263_v62, 4  ;;  %v5705_v30 = vrot.slane %v1260_v56, 9 }
 0x151   : > { %v1266_v25 = vrot.slane %v1265_v10, 6  ;;  %6821 = vrot.lane.b32.xlu0 %v6820_v18, %s7002_s26  ;;  %v1159_v4 = vmax.f32 %v1127_v27, 0.0  ;;  %v946_v3 = vpop.f32.mrf.mxu0  ;;  %v1011_v26 = vpop.f32.mrf.mxu1  ;;  %v1160_v14 = vmax.f32 %v1128_v33, 0.0  ;;  %v1752_v1 = vperm.slane %v7783_v35, 0 }
 0x152   : > { %v5706_v29 = vrot.slane %v1262_v38, 9  ;;  %v5707_v57 = vrot.slane %v1264_v50, 9  ;;  %v7822_v47 = vmax.f32 %v1260_v56, %v5705_v30  ;;  %v1053_v6 = vadd.f32 %v946_v3, %v7620_v11 }
 0x153   : > { %v5708_v17 = vrot.slane %v1266_v25, 9  ;;  %v1054_v13 = vadd.f32 %v1011_v26, %v7626_v19  ;;  %v1218_v49 = vrot.slane %v1160_v14, 6  ;;  %v1753_v10 = vperm.slane %v7783_v35, 2 }
 0x154   : > { %10171 = vst [vmem:[#allocation20_spill] sm:$0xff] %v7822_v47  ;;  %v7827_v18 = vmax.f32 %v1262_v38, %v5706_v29  ;;  %v7829_v27 = vmax.f32 %v1264_v50, %v5707_v57  ;;  %v1091_v56 = vmul.f32 %v7576_v46, %v1053_v6  ;;  %v1754_v38 = vperm.slane %v7794_v52, 0 }
 0x155   : > { %v7831_v40 = vmax.f32 %v1266_v25, %v5708_v17  ;;  %v1092_v62 = vmul.f32 %v7578_v9, %v1054_v13  ;;  %v1267_v50 = vsel %vm1229_vm4, %v1159_v4, %v1218_v49  ;;  %v7843_v25 = vsel %vm1231_vm5, %v1159_v4, %v1218_v49 }
 0x156   : > { %10172 = vst [vmem:[#allocation21_spill] sm:$0xff] %v7827_v18  ;;  %v7846_v30 = vsel %vm1234_vm6, %v1159_v4, %v1218_v49  ;;  %v1129_v33 = vadd.f32 %v7594_v45, %v1091_v56  ;;  %v10086_v3 = vrot.slane %v7843_v25, 2  ;;  %v5709_v29 = vrot.slane %v1267_v50, 9 }
 0x157   : > { %10173 = vst [vmem:[#allocation22_spill] sm:$0xff] %v7829_v27  ;;  %v1130_v57 = vadd.f32 %v7596_v0, %v1092_v62  ;;  %v1755_v14 = vperm.slane %v7794_v52, 2  ;;  %v1756_v6 = vperm.slane %v7808_v8, 0  ;;  %v1757_v13 = vperm.slane %v7808_v8, 2 }
 0x158   : > { %10174 = vst [vmem:[#allocation23_spill] sm:$0xff] %v7831_v40  ;;  %v1161_v17 = vmax.f32 %v1129_v33, 0.0  ;;  %v7857_v11 = vrot.slane %v10086_v3, 9  ;;  %v7859_v56 = vmax.f32 %v1267_v50, %v5709_v29  ;;  %v1758_v26 = vperm.slane %v7819_v59, 0 }
 0x159   : > { %v949_v19 = vpop.f32.mrf.mxu0  ;;  %v1014_v58 = vpop.f32.mrf.mxu1  ;;  %v1162_v39 = vmax.f32 %v1130_v57, 0.0  ;;  %v1759_v62 = vperm.slane %v7819_v59, 2  ;;  %v10176_v33 = vperm.slane %v7757_v41, 0  ;;  %v10178_v8 = vperm.slane %v7757_v41, 2 }
 0x15a   : > { %10175 = vst [vmem:[#allocation24_spill] sm:$0xff] %v7859_v56  ;;  %v10179_v35 = vperm.slane %v7761_v5, 2  ;;  %v1055_v50 = vadd.f32 %v949_v19, %v7630_v21  ;;  %v10180_v57 = vperm.slane %v7763_v60, 0  ;;  %v10181_v59 = vperm.slane %v7763_v60, 2 }
 0x15b   : > { %v1877_v52 = vsel %vm1856_vm7, %v10177_v61, %v10176_v33  ;;  %v1219_v29 = vrot.slane %v1162_v39, 6  ;;  %v1056_v51 = vadd.f32 %v1014_v58, %v7634_v24  ;;  %v10182_v61 = vperm.slane %v7765_v22, 0 }
 0x15c   : > { %v1884_v3 = vsel %vm1856_vm7, %v10179_v35, %v10178_v8  ;;  %v1878_v16 = vsel %vm1858_vm8, %v10180_v57, %v1877_v52  ;;  %v1093_v35 = vmul.f32 %v7576_v46, %v1055_v50  ;;  %v7887_v21 = vsel %vm833_vm3, %v1218_v49, %v1159_v4 }
 0x15d   : > { %v1885_v63 = vsel %vm1858_vm8, %v10181_v59, %v1884_v3  ;;  %v1879_v33 = vsel %vm1860_vm9, %v10182_v61, %v1878_v16  ;;  %v1274_v8 = vsel %vm1229_vm4, %v1161_v17, %v1219_v29  ;;  %v1275_v52 = vsel %vm1231_vm5, %v1161_v17, %v1219_v29 }
 0x15e   : > { %v1886_v5 = vsel %vm1860_vm9, %v1751_v2, %v1885_v63  ;;  %v1277_v39 = vsel %vm1234_vm6, %v1161_v17, %v1219_v29  ;;  %v1279_v59 = vsel %vm833_vm3, %v1219_v29, %v1161_v17  ;;  %v1276_v24 = vrot.slane %v1275_v52, 2 }
 0x15f   : > { %v1278_v58 = vrot.slane %v1277_v39, 4  ;;  %v1280_v19 = vrot.slane %v1279_v59, 6  ;;  %v5713_v3 = vrot.slane %v1274_v8, 9  ;;  %v1880_v16 = vsel %vm1862_vm10, %v1752_v1, %v1879_v33 }
 0x160   : > { %v1887_v63 = vsel %vm1862_vm10, %v1753_v10, %v1886_v5  ;;  %v1131_v2 = vadd.f32 %v7594_v45, %v1093_v35  ;;  %v1094_v4 = vmul.f32 %v7578_v9, %v1056_v51  ;;  %v5714_v49 = vrot.slane %v1276_v24, 9 }
 0x161   : > { %v5715_v50 = vrot.slane %v1278_v58, 9  ;;  %v5716_v57 = vrot.slane %v1280_v19, 9  ;;  %v7897_v61 = vmax.f32 %v1274_v8, %v5713_v3  ;;  %v952_v22 = vpop.f32.mrf.mxu0  ;;  %v1881_v17 = vsel %vm1864_vm11, %v1754_v38, %v1880_v16  ;;  %v1017_v33 = vpop.f32.mrf.mxu1 }
 0x162   : > { %v1888_v29 = vsel %vm1864_vm11, %v1755_v14, %v1887_v63  ;;  %v1163_v52 = vmax.f32 %v1131_v2, 0.0  ;;  %v1132_v39 = vadd.f32 %v7596_v0, %v1094_v4  ;;  %v7902_v1 = vmax.f32 %v1276_v24, %v5714_v49 }
 0x163   : > { %10183 = vst [vmem:[#allocation25_spill] sm:$0xff] %v7897_v61  ;;  %v7904_v5 = vmax.f32 %v1278_v58, %v5715_v50  ;;  %v7906_v10 = vmax.f32 %v1280_v19, %v5716_v57  ;;  %v1882_v8 = vsel %vm1866_vm12, %v1756_v6, %v1881_v17  ;;  %v1889_v38 = vsel %vm1866_vm12, %v1757_v13, %v1888_v29 }
 0x164   : > { %10184 = vst [vmem:[#allocation26_spill] sm:$0xff] %v7902_v1  ;;  %v1164_v59 = vmax.f32 %v1132_v39, 0.0  ;;  %v1883_v19 = vsel %vm1868_vm13, %v1758_v26, %v1882_v8  ;;  %v1890_v16 = vsel %vm1868_vm13, %v1759_v62, %v1889_v38  ;;  %v1057_v2 = vadd.f32 %v952_v22, %v7638_v31 }
 0x165   : > { %10185 = vst [vmem:[#allocation27_spill] sm:$0xff] %v7904_v5  ;;  %v6825_v4 = vpack.i.bf16 %v1890_v16, %v1883_v19  ;;  %v1058_v6 = vadd.f32 %v1017_v33, %v7642_v28  ;;  %v1273_v13 = vrot.slane %v7887_v21, 6  ;;  %v10187_v49 = vrot.slane %v7846_v30, 4 }
 0x166   : > { %10186 = vst [vmem:[#allocation28_spill] sm:$0xff] %v7906_v10  ;;  %v1220_v63 = vrot.slane %v1164_v59, 6  ;;  %v1095_v39 = vmul.f32 %v7576_v46, %v1057_v2  ;;  %v10188_v38 = vrot.slane %v7843_v25, 2  ;;  %v10197_v14 = vperm.slane %v7822_v47, 2 }
 0x167   : > { %v5711_v50 = vrot.slane %v10187_v49, 9  ;;  %6826 = vrot.lane.b32.xlu0 %v6825_v4, %s7002_s26  ;;  %v1096_v33 = vmul.f32 %v7578_v9, %v1058_v6  ;;  %v5712_v8 = vrot.slane %v1273_v13, 9  ;;  %v10198_v51 = vperm.slane %v7827_v18, 2 }
 0x168   : > { %v1281_v57 = vsel %vm1229_vm4, %v1163_v52, %v1220_v63  ;;  %v1282_v17 = vsel %vm1231_vm5, %v1163_v52, %v1220_v63  ;;  %v7926_v29 = vsel %vm1234_vm6, %v1163_v52, %v1220_v63  ;;  %v7929_v26 = vsel %vm833_vm3, %v1220_v63, %v1163_v52 }
 0x169   : > { %v1283_v31 = vrot.slane %v1282_v17, 2  ;;  %v10093_v28 = vrot.slane %v7926_v29, 4  ;;  %v5717_v62 = vrot.slane %v1281_v57, 9  ;;  %v955_v21 = vpop.f32.mrf.mxu0  ;;  %v7939_v59 = vmax.f32 %v10188_v38, %v7857_v11 }
 0x16a   : > { %v10191_v63 = vmov %v10187_v49  ;;  %v1133_v2 = vadd.f32 %v7594_v45, %v1095_v39  ;;  %v1134_v6 = vadd.f32 %v7596_v0, %v1096_v33  ;;  %v7953_v49 = vmax.f32 %v1273_v13, %v5712_v8 }
 0x16b   : > { %10189 = vst [vmem:[#allocation29_spill] sm:$0xff] %v7939_v59  ;;  %v5718_v52 = vrot.slane %v1283_v31, 9  ;;  %v7943_v19 = vrot.slane %v10093_v28, 9  ;;  %v7945_v16 = vmax.f32 %v1281_v57, %v5717_v62  ;;  %v7949_v4 = vmax.f32 %v10191_v63, %v5711_v50  ;;  %v1020_v62 = vpop.f32.mrf.mxu1 }
 0x16c   : > { %10193 = vst [vmem:[#allocation32_spill] sm:$0xff] %v7953_v49  ;;  %v1764_v11 = vperm.slane %v7829_v27, 0  ;;  %v1765_v17 = vperm.slane %v7829_v27, 2  ;;  %v1766_v38 = vperm.slane %v7831_v40, 0  ;;  %v1767_v57 = vperm.slane %v7831_v40, 2 }
 0x16d   : > { %10190 = vst [vmem:[#allocation30_spill] sm:$0xff] %v7945_v16  ;;  %v7956_v25 = vmax.f32 %v1283_v31, %v5718_v52  ;;  %v1165_v30 = vmax.f32 %v1133_v2, 0.0  ;;  %v1166_v50 = vmax.f32 %v1134_v6, 0.0  ;;  %v1768_v63 = vperm.slane %v7859_v56, 0 }
 0x16e   : > { %10192 = vst [vmem:[#allocation31_spill] sm:$0xff] %v7949_v4  ;;  %v1769_v39 = vperm.slane %v7859_v56, 2  ;;  %v1770_v13 = vperm.slane %v7939_v59, 0  ;;  %v1771_v33 = vperm.slane %v7939_v59, 2  ;;  %v1772_v31 = vperm.slane %v7949_v4, 0 }
 0x16f   : > { %10194 = vst [vmem:[#allocation33_spill] sm:$0xff] %v7956_v25  ;;  %v1773_v8 = vperm.slane %v7949_v4, 2  ;;  %v1221_v52 = vrot.slane %v1166_v50, 6  ;;  %v1774_v58 = vperm.slane %v7953_v49, 0  ;;  %v1775_v3 = vperm.slane %v7953_v49, 2 }
 0x170   : > { %v10195_v2 = vperm.slane %v7822_v47, 0  ;;  %v10196_v6 = vperm.slane %v7827_v18, 0  ;;  %v1898_v28 = vsel %vm1856_vm7, %v10198_v51, %v10197_v14  ;;  %v1059_v50 = vadd.f32 %v955_v21, %v7646_v32 }
 0x171   : > { %v1060_v22 = vadd.f32 %v1020_v62, %v7652_v36  ;;  %v958_v59 = vpop.f32.mrf.mxu0  ;;  %v1288_v49 = vsel %vm1229_vm4, %v1165_v30, %v1221_v52  ;;  %v1289_v40 = vsel %vm1231_vm5, %v1165_v30, %v1221_v52  ;;  %v1291_v4 = vsel %vm1234_vm6, %v1165_v30, %v1221_v52 }
 0x172   : > { %v1891_v35 = vsel %vm1856_vm7, %v10196_v6, %v10195_v2  ;;  %v1293_v2 = vsel %vm833_vm3, %v1221_v52, %v1165_v30  ;;  %v5721_v56 = vrot.slane %v1288_v49, 9  ;;  %v1899_v51 = vsel %vm1858_vm8, %v1765_v17, %v1898_v28 }
 0x173   : > { %v1892_v24 = vsel %vm1858_vm8, %v1764_v11, %v1891_v35  ;;  %v1290_v35 = vrot.slane %v1289_v40, 2  ;;  %v1292_v11 = vrot.slane %v1291_v4, 4  ;;  %v1294_v6 = vrot.slane %v1293_v2, 6 }
 0x174   : > { %v1893_v27 = vsel %vm1860_vm9, %v1766_v38, %v1892_v24  ;;  %v1097_v32 = vmul.f32 %v7576_v46, %v1059_v50  ;;  %v1098_v36 = vmul.f32 %v7578_v9, %v1060_v22  ;;  %v7990_v18 = vmax.f32 %v1288_v49, %v5721_v56  ;;  %v1023_v38 = vpop.f32.mrf.mxu1 }
 0x175   : > { %v5722_v14 = vrot.slane %v1290_v35, 9  ;;  %v5723_v21 = vrot.slane %v1292_v11, 9  ;;  %v5724_v62 = vrot.slane %v1294_v6, 9  ;;  %v1894_v47 = vsel %vm1862_vm10, %v1768_v63, %v1893_v27 }
 0x176   : > { %v1900_v40 = vsel %vm1860_vm9, %v1767_v57, %v1899_v51  ;;  %v1135_v4 = vadd.f32 %v7594_v45, %v1097_v32  ;;  %v1136_v30 = vadd.f32 %v7596_v0, %v1098_v36  ;;  %v1895_v49 = vsel %vm1864_vm11, %v1770_v13, %v1894_v47 }
 0x177   : > { %v7996_v24 = vmax.f32 %v1290_v35, %v5722_v14  ;;  %v7998_v28 = vmax.f32 %v1292_v11, %v5723_v21  ;;  %v8000_v17 = vmax.f32 %v1294_v6, %v5724_v62  ;;  %v1901_v27 = vsel %vm1862_vm10, %v1769_v39, %v1900_v40 }
 0x178   : > { %v8006_v57 = vmax.f32 %v1135_v4, 0.0  ;;  %v1896_v50 = vsel %vm1866_vm12, %v1772_v31, %v1895_v49  ;;  %v1902_v2 = vsel %vm1864_vm11, %v1771_v33, %v1901_v27  ;;  %v1168_v51 = vmax.f32 %v1136_v30, 0.0 }
 0x179   : > { %v961_v35 = vpop.f32.mrf.mxu0  ;;  %v1897_v11 = vsel %vm1868_vm13, %v1774_v58, %v1896_v50  ;;  %v1903_v6 = vsel %vm1866_vm12, %v1773_v8, %v1902_v2  ;;  %v1061_v47 = vadd.f32 %v958_v59, %v7656_v37  ;;  %v1062_v13 = vadd.f32 %v1023_v38, %v7660_v42 }
 0x17a   : > { %v1904_v39 = vsel %vm1868_vm13, %v1775_v3, %v1903_v6  ;;  %v10199_v32 = vrot.slane %v7929_v26, 6  ;;  %v10200_v31 = vrot.slane %v7926_v29, 4  ;;  %v8024_v21 = vrot.slane %v1168_v51, 6 }
 0x17b   : > { %v6830_v33 = vpack.i.bf16 %v1904_v39, %v1897_v11  ;;  %v1099_v58 = vmul.f32 %v7576_v46, %v1061_v47  ;;  %v1782_v8 = vperm.slane %v7906_v10, 0  ;;  %v1100_v37 = vmul.f32 %v7578_v9, %v1062_v13 }
 0x17c   : > { %v5720_v36 = vrot.slane %v10199_v32, 9  ;;  %v8022_v14 = vmax.f32 %v10200_v31, %v7943_v19  ;;  %v10202_v3 = vmov %v10199_v32  ;;  %v1783_v59 = vperm.slane %v7906_v10, 2  ;;  %v1026_v13 = vpop.f32.mrf.mxu1 }
 0x17d   : > { %v1784_v62 = vperm.slane %v7945_v16, 0  ;;  %6831 = vrot.lane.b32.xlu1 %v6830_v33, %s7002_s26  ;;  %v1295_v29 = vsel %vm1229_vm4, %v8006_v57, %v8024_v21  ;;  %v8042_v19 = vsel %vm1231_vm5, %v8006_v57, %v8024_v21  ;;  %v8047_v26 = vsel %vm1234_vm6, %v8006_v57, %v8024_v21 }
 0x17e   : > { %10201 = vst [vmem:[#allocation34_spill] sm:$0xff] %v8022_v14  ;;  %v8031_v42 = vmax.f32 %v10202_v3, %v5720_v36  ;;  %v1137_v40 = vadd.f32 %v7594_v45, %v1099_v58  ;;  %v10102_v4 = vrot.slane %v8042_v19, 2  ;;  %v5725_v38 = vrot.slane %v1295_v29, 9 }
 0x17f   : > { %v1138_v49 = vadd.f32 %v7596_v0, %v1100_v37  ;;  %v1785_v50 = vperm.slane %v7945_v16, 2  ;;  %v1786_v2 = vperm.slane %v7956_v25, 0  ;;  %v1787_v11 = vperm.slane %v7956_v25, 2 }
 0x180   : > { %10203 = vst [vmem:[#allocation35_spill] sm:$0xff] %v8031_v42  ;;  %v1169_v27 = vmax.f32 %v1137_v40, 0.0  ;;  %v8058_v6 = vrot.slane %v10102_v4, 9  ;;  %v8060_v51 = vmax.f32 %v1295_v29, %v5725_v38  ;;  %v1788_v39 = vperm.slane %v8022_v14, 0 }
 0x181   : > { %v1170_v47 = vmax.f32 %v1138_v49, 0.0  ;;  %v964_v32 = vpop.f32.mrf.mxu0  ;;  %v1789_v36 = vperm.slane %v8022_v14, 2  ;;  %v1790_v31 = vperm.slane %v8031_v42, 0  ;;  %v1791_v33 = vperm.slane %v8031_v42, 2 }
 0x182   : > { %v10204_v58 = vperm.slane %v7897_v61, 0  ;;  %v10205_v37 = vperm.slane %v7902_v1, 0  ;;  %v10206_v29 = vperm.slane %v7904_v5, 0  ;;  %v10207_v49 = vperm.slane %v7897_v61, 2 }
 0x183   : > { %v1223_v40 = vrot.slane %v1170_v47, 6  ;;  %v10208_v52 = vperm.slane %v7902_v1, 2  ;;  %v1063_v63 = vadd.f32 %v961_v35, %v7664_v43  ;;  %v10209_v4 = vperm.slane %v7904_v5, 2 }
 0x184   : > { %v1905_v3 = vsel %vm1856_vm7, %v10205_v37, %v10204_v58  ;;  %v1064_v47 = vadd.f32 %v1026_v13, %v7668_v48  ;;  %v1065_v58 = vadd.f32 %v964_v32, %v7671_v53 }
 0x185   : > { %v1906_v38 = vsel %vm1858_vm8, %v10206_v29, %v1905_v3  ;;  %v1912_v56 = vsel %vm1856_vm7, %v10208_v52, %v10207_v49  ;;  %v1302_v37 = vsel %vm1229_vm4, %v1169_v27, %v1223_v40  ;;  %v1303_v3 = vsel %vm1231_vm5, %v1169_v27, %v1223_v40 }
 0x186   : > { %v1907_v22 = vsel %vm1860_vm9, %v1782_v8, %v1906_v38  ;;  %v1913_v30 = vsel %vm1858_vm8, %v10209_v4, %v1912_v56  ;;  %v1305_v29 = vsel %vm1234_vm6, %v1169_v27, %v1223_v40  ;;  %v1307_v52 = vsel %vm833_vm3, %v1223_v40, %v1169_v27 }
 0x187   : > { %v1304_v49 = vrot.slane %v1303_v3, 2  ;;  %v1306_v43 = vrot.slane %v1305_v29, 4  ;;  %v1308_v35 = vrot.slane %v1307_v52, 6  ;;  %v5729_v8 = vrot.slane %v1302_v37, 9 }
 0x188   : > { %v1908_v38 = vsel %vm1862_vm10, %v1784_v62, %v1907_v22  ;;  %v1914_v56 = vsel %vm1860_vm9, %v1783_v59, %v1913_v30  ;;  %v1101_v48 = vmul.f32 %v7576_v46, %v1063_v63  ;;  %v1102_v53 = vmul.f32 %v7578_v9, %v1064_v47 }
 0x189   : > { %v5730_v4 = vrot.slane %v1304_v49, 9  ;;  %v5731_v13 = vrot.slane %v1306_v43, 9  ;;  %v5732_v32 = vrot.slane %v1308_v35, 9  ;;  %v8094_v42 = vmax.f32 %v1302_v37, %v5729_v8 }
 0x18a   : > { %v1909_v14 = vsel %vm1864_vm11, %v1786_v2, %v1908_v38  ;;  %v1915_v27 = vsel %vm1862_vm10, %v1785_v50, %v1914_v56  ;;  %v1139_v40 = vadd.f32 %v7594_v45, %v1101_v48  ;;  %v1140_v3 = vadd.f32 %v7596_v0, %v1102_v53  ;;  %v1029_v50 = vpop.f32.mrf.mxu1 }
 0x18b   : > { %v8100_v22 = vmax.f32 %v1304_v49, %v5730_v4  ;;  %v8102_v59 = vmax.f32 %v1306_v43, %v5731_v13  ;;  %v8104_v63 = vmax.f32 %v1308_v35, %v5732_v32  ;;  %v1910_v47 = vsel %vm1866_vm12, %v1788_v39, %v1909_v14 }
 0x18c   : > { %v1916_v2 = vsel %vm1864_vm11, %v1787_v11, %v1915_v27  ;;  %v1171_v37 = vmax.f32 %v1139_v40, 0.0  ;;  %v1911_v35 = vsel %vm1868_vm13, %v1790_v31, %v1910_v47  ;;  %v1172_v38 = vmax.f32 %v1140_v3, 0.0 }
 0x18d   : > { %v1917_v8 = vsel %vm1866_vm12, %v1789_v36, %v1916_v2  ;;  %v1103_v56 = vmul.f32 %v7576_v46, %v1065_v58  ;;  %v1066_v11 = vadd.f32 %v1029_v50, %v7674_v55  ;;  %v1300_v39 = vsel %vm833_vm3, %v8024_v21, %v8006_v57 }
 0x18e   : > { %v1918_v14 = vsel %vm1868_vm13, %v1791_v33, %v1917_v8  ;;  %v10210_v48 = vrot.slane %v8047_v26, 4  ;;  %v1224_v13 = vrot.slane %v1172_v38, 6  ;;  %v1301_v32 = vrot.slane %v1300_v39, 6 }
 0x18f   : > { %v6835_v4 = vpack.i.bf16 %v1918_v14, %v1911_v35  ;;  %v1141_v31 = vadd.f32 %v7594_v45, %v1103_v56  ;;  %v1104_v36 = vmul.f32 %v7578_v9, %v1066_v11  ;;  %v10211_v58 = vrot.slane %v8042_v19, 2 }
 0x190   : > { %v5727_v53 = vrot.slane %v10210_v48, 9  ;;  %v10212_v55 = vmov %v10210_v48  ;;  %v1796_v57 = vperm.slane %v7998_v28, 0  ;;  %v1309_v21 = vsel %vm1229_vm4, %v1171_v37, %v1224_v13 }
 0x191   : > { %v8129_v33 = vmax.f32 %v10211_v58, %v8058_v6  ;;  %6836 = vrot.lane.b32.xlu1 %v6835_v4, %s7002_s26  ;;  %v1310_v40 = vsel %vm1231_vm5, %v1171_v37, %v1224_v13  ;;  %v8140_v3 = vsel %vm1234_vm6, %v1171_v37, %v1224_v13  ;;  %v8143_v47 = vsel %vm833_vm3, %v1224_v13, %v1171_v37  ;;  %v967_v13 = vpop.f32.mrf.mxu0 }
 0x192   : > { %v8133_v27 = vmax.f32 %v10212_v55, %v5727_v53  ;;  %v1311_v19 = vrot.slane %v1310_v40, 2  ;;  %v10105_v6 = vrot.slane %v8140_v3, 4  ;;  %v5733_v2 = vrot.slane %v1309_v21, 9 }
 0x193   : > { %v1173_v50 = vmax.f32 %v1141_v31, 0.0  ;;  %v1142_v35 = vadd.f32 %v7596_v0, %v1104_v36  ;;  %v5728_v8 = vrot.slane %v1301_v32, 9  ;;  %v1797_v38 = vperm.slane %v7998_v28, 2 }
 0x194   : > { %v5734_v56 = vrot.slane %v1311_v19, 9  ;;  %v8151_v14 = vrot.slane %v10105_v6, 9  ;;  %v8153_v11 = vmax.f32 %v1309_v21, %v5733_v2  ;;  %v1798_v37 = vperm.slane %v8000_v17, 0  ;;  %v1032_v21 = vpop.f32.mrf.mxu1 }
 0x195   : > { %v1174_v39 = vmax.f32 %v1142_v35, 0.0  ;;  %v8156_v48 = vmax.f32 %v1301_v32, %v5728_v8  ;;  %v1799_v53 = vperm.slane %v8000_v17, 2  ;;  %v1800_v4 = vperm.slane %v8060_v51, 0 }
 0x196   : > { %v8160_v31 = vmax.f32 %v1311_v19, %v5734_v56  ;;  %v1801_v36 = vperm.slane %v8060_v51, 2  ;;  %v1802_v58 = vperm.slane %v8129_v33, 0  ;;  %v1803_v55 = vperm.slane %v8129_v33, 2 }
 0x197   : > { %10213 = vst [vmem:[#allocation36_spill] sm:$0xff] %v8156_v48  ;;  %v1225_v40 = vrot.slane %v1174_v39, 6  ;;  %v1804_v2 = vperm.slane %v8133_v27, 0  ;;  %v1805_v32 = vperm.slane %v8133_v27, 2  ;;  %v1806_v35 = vperm.slane %v8156_v48, 0 }
 0x198   : > { %v1807_v8 = vperm.slane %v8156_v48, 2  ;;  %v10214_v43 = vperm.slane %v7990_v18, 0  ;;  %v10215_v19 = vperm.slane %v7996_v24, 0  ;;  %v10216_v52 = vperm.slane %v7990_v18, 2 }
 0x199   : > { %v10217_v30 = vperm.slane %v7996_v24, 2  ;;  %v1067_v49 = vadd.f32 %v967_v13, %v7677_v7  ;;  %v1316_v29 = vsel %vm1229_vm4, %v1173_v50, %v1225_v40  ;;  %v1317_v62 = vsel %vm1231_vm5, %v1173_v50, %v1225_v40 }
 0x19a   : > { %v1919_v56 = vsel %vm1856_vm7, %v10215_v19, %v10214_v43  ;;  %v1319_v6 = vsel %vm1234_vm6, %v1173_v50, %v1225_v40  ;;  %v1321_v26 = vsel %vm833_vm3, %v1225_v40, %v1173_v50  ;;  %v1318_v48 = vrot.slane %v1317_v62, 2  ;;  %v5875_v40 = vld [vmem:[#allocation2 + $0x1f0] sm:$0xf] }
 0x19b   : > { %v1926_v39 = vsel %vm1856_vm7, %v10217_v30, %v10216_v52  ;;  %v1320_v25 = vrot.slane %v1319_v6, 4  ;;  %v1322_v10 = vrot.slane %v1321_v26, 6  ;;  %v5737_v43 = vrot.slane %v1316_v29, 9 }
 0x19c   : > { %v1920_v19 = vsel %vm1858_vm8, %v1796_v57, %v1919_v56  ;;  %v1927_v16 = vsel %vm1858_vm8, %v1797_v38, %v1926_v39  ;;  %v1105_v30 = vmul.f32 %v7576_v46, %v1067_v49  ;;  %v1068_v7 = vadd.f32 %v1032_v21, %v7680_v44  ;;  %v5811_v38 = vld [vmem:[#allocation2 + $0x170] sm:$0xf]  ;;  %v6653_v21 = vld [vmem:[#allocation2 + $0x174] sm:$0xf0]  ;;  %v970_v39 = vpop.f32.mrf.mxu0 }
 0x19d   : > { %v5738_v52 = vrot.slane %v1318_v48, 9  ;;  %v5739_v13 = vrot.slane %v1320_v25, 9  ;;  %v5740_v5 = vrot.slane %v1322_v10, 9  ;;  %v8188_v1 = vmax.f32 %v1316_v29, %v5737_v43  ;;  %v6669_v56 = vld [vmem:[#allocation2 + $0x1f4] sm:$0xf0]  ;;  %v1035_v43 = vpop.f32.mrf.mxu1 }
 0x19e   : > { %v1921_v61 = vsel %vm1860_vm9, %v1798_v37, %v1920_v19  ;;  %v1928_v62 = vsel %vm1860_vm9, %v1799_v53, %v1927_v16  ;;  %v1143_v6 = vadd.f32 %v7594_v45, %v1105_v30  ;;  %v1106_v26 = vmul.f32 %v7578_v9, %v1068_v7 }
 0x19f   : > { %v8194_v57 = vmax.f32 %v1318_v48, %v5738_v52  ;;  %v8196_v50 = vmax.f32 %v1320_v25, %v5739_v13  ;;  %v8198_v49 = vmax.f32 %v1322_v10, %v5740_v5  ;;  %v1922_v37 = vsel %vm1862_vm10, %v1800_v4, %v1921_v61 }
 0x1a0   : > { %v1929_v16 = vsel %vm1862_vm10, %v1801_v36, %v1928_v62  ;;  %v1175_v53 = vmax.f32 %v1143_v6, 0.0  ;;  %v1923_v19 = vsel %vm1864_vm11, %v1802_v58, %v1922_v37  ;;  %v1144_v61 = vadd.f32 %v7596_v0, %v1106_v26 }
 0x1a1   : > { %v1930_v30 = vsel %vm1864_vm11, %v1803_v55, %v1929_v16  ;;  %v5812_v4 = vor.u32 %v6653_v21, %v5811_v38  ;;  %v1924_v36 = vsel %vm1866_vm12, %v1804_v2, %v1923_v19  ;;  %v5876_v52 = vor.u32 %v6669_v56, %v5875_v40 }
 0x1a2   : > { %v1931_v7 = vsel %vm1866_vm12, %v1805_v32, %v1930_v30  ;;  %v1069_v13 = vadd.f32 %v970_v39, %v7683_v12  ;;  %v1925_v62 = vsel %vm1868_vm13, %v1806_v35, %v1924_v36  ;;  %v1176_v10 = vmax.f32 %v1144_v61, 0.0 }
 0x1a3   : > { %v1932_v6 = vsel %vm1868_vm13, %v1807_v8, %v1931_v7  ;;  %2961 = vmatpush.bf16.msrb.mxu2 %v5812_v4  ;;  %v1070_v58 = vadd.f32 %v1035_v43, %v7686_v20  ;;  %2990 = vmatpush.bf16.msrb.mxu3 %v5876_v52  ;;  %v10218_v26 = vrot.slane %v8143_v47, 6  ;;  %v10219_v32 = vrot.slane %v8140_v3, 4 }
 0x1a4   : > { %v6840_v37 = vpack.i.bf16 %v1932_v6, %v1925_v62  ;;  %v1107_v55 = vmul.f32 %v7576_v46, %v1069_v13  ;;  %v1226_v12 = vrot.slane %v1176_v10, 6  ;;  %v1814_v8 = vperm.slane %v8104_v63, 0 }
 0x1a5   : > { %v5736_v2 = vrot.slane %v10218_v26, 9  ;;  %v8223_v38 = vmax.f32 %v10219_v32, %v8151_v14  ;;  %v1108_v35 = vmul.f32 %v7578_v9, %v1070_v58  ;;  %v1815_v21 = vperm.slane %v8104_v63, 2  ;;  %v973_v58 = vpop.f32.mrf.mxu0 }
 0x1a6   : > { %6841 = vrot.lane.b32.xlu2 %v6840_v37, %s7002_s26  ;;  %v1145_v20 = vadd.f32 %v7594_v45, %v1107_v55  ;;  %v10220_v16 = vmov %v10218_v26  ;;  %v1816_v56 = vperm.slane %v8153_v11, 0  ;;  %v1817_v3 = vperm.slane %v8153_v11, 2  ;;  %v5803_v37 = vld [vmem:[#allocation2 + $0x160] sm:$0xf] }
 0x1a7   : > { %v8232_v40 = vmax.f32 %v10220_v16, %v5736_v2  ;;  %v1323_v14 = vsel %vm1229_vm4, %v1175_v53, %v1226_v12  ;;  %v1324_v39 = vsel %vm1231_vm5, %v1175_v53, %v1226_v12  ;;  %v1326_v10 = vsel %vm1234_vm6, %v1175_v53, %v1226_v12 }
 0x1a8   : > { %v8240_v43 = vsel %vm833_vm3, %v1226_v12, %v1175_v53  ;;  %v1325_v19 = vrot.slane %v1324_v39, 2  ;;  %v1327_v30 = vrot.slane %v1326_v10, 4  ;;  %v5741_v47 = vrot.slane %v1323_v14, 9  ;;  %v1038_v12 = vpop.f32.mrf.mxu1 }
 0x1a9   : > { %v10113_v61 = vrot.slane %v8240_v43, 6  ;;  %v1177_v4 = vmax.f32 %v1145_v20, 0.0  ;;  %v1146_v36 = vadd.f32 %v7596_v0, %v1108_v35  ;;  %v1818_v7 = vperm.slane %v8160_v31, 0  ;;  %v6651_v35 = vld [vmem:[#allocation2 + $0x164] sm:$0xf0] }
 0x1aa   : > { %v1819_v52 = vperm.slane %v8160_v31, 2  ;;  %v5742_v13 = vrot.slane %v1325_v19, 9  ;;  %v5743_v62 = vrot.slane %v1327_v30, 9  ;;  %v8250_v53 = vmax.f32 %v1323_v14, %v5741_v47 }
 0x1ab   : > { %v8248_v6 = vrot.slane %v10113_v61, 9  ;;  %v1178_v55 = vmax.f32 %v1146_v36, 0.0  ;;  %v1820_v26 = vperm.slane %v8223_v38, 0  ;;  %v1821_v2 = vperm.slane %v8223_v38, 2 }
 0x1ac   : > { %v1822_v32 = vperm.slane %v8232_v40, 0  ;;  %v8255_v20 = vmax.f32 %v1325_v19, %v5742_v13  ;;  %v8257_v16 = vmax.f32 %v1327_v30, %v5743_v62  ;;  %v1823_v39 = vperm.slane %v8232_v40, 2 }
 0x1ad   : > { %v10222_v14 = vperm.slane %v8094_v42, 0  ;;  %v10223_v10 = vperm.slane %v8100_v22, 0  ;;  %v1227_v36 = vrot.slane %v1178_v55, 6  ;;  %v10224_v5 = vperm.slane %v8102_v59, 0 }
 0x1ae   : > { %10221 = vst [vmem:[#allocation37_spill] sm:$0xff] %v8255_v20  ;;  %v10225_v29 = vperm.slane %v8094_v42, 2  ;;  %v10226_v19 = vperm.slane %v8100_v22, 2  ;;  %v1071_v13 = vadd.f32 %v973_v58, %v7688_v23  ;;  %v10227_v48 = vperm.slane %v8102_v59, 2 }
 0x1af   : > { %v1933_v47 = vsel %vm1856_vm7, %v10223_v10, %v10222_v14  ;;  %v1072_v55 = vadd.f32 %v1038_v12, %v7695_v15  ;;  %v5804_v14 = vor.u32 %v6651_v35, %v5803_v37  ;;  %v1330_v10 = vsel %vm1229_vm4, %v1177_v4, %v1227_v36 }
 0x1b0   : > { %v1934_v25 = vsel %vm1858_vm8, %v10224_v5, %v1933_v47  ;;  %v1940_v30 = vsel %vm1856_vm7, %v10226_v19, %v10225_v29  ;;  %v1331_v5 = vsel %vm1231_vm5, %v1177_v4, %v1227_v36  ;;  %v1333_v47 = vsel %vm1234_vm6, %v1177_v4, %v1227_v36 }
 0x1b1   : > { %v1935_v62 = vsel %vm1860_vm9, %v1814_v8, %v1934_v25  ;;  %v1941_v44 = vsel %vm1858_vm8, %v10227_v48, %v1940_v30  ;;  %v1335_v61 = vsel %vm833_vm3, %v1227_v36, %v1177_v4  ;;  %v1332_v29 = vrot.slane %v1331_v5, 2  ;;  %2962 = vmatpush.bf16.msrb.mxu2 %v5804_v14 }
 0x1b2   : > { %v1334_v19 = vrot.slane %v1333_v47, 4  ;;  %v1336_v23 = vrot.slane %v1335_v61, 6  ;;  %v5745_v58 = vrot.slane %v1330_v10, 9  ;;  %v1936_v25 = vsel %vm1862_vm10, %v1816_v56, %v1935_v62 }
 0x1b3   : > { %v1942_v48 = vsel %vm1860_vm9, %v1815_v21, %v1941_v44  ;;  %v1109_v15 = vmul.f32 %v7576_v46, %v1071_v13  ;;  %v1110_v8 = vmul.f32 %v7578_v9, %v1072_v55  ;;  %v5746_v37 = vrot.slane %v1332_v29, 9  ;;  %v5867_v21 = vld [vmem:[#allocation2 + $0x1e0] sm:$0xf]  ;;  %v6667_v13 = vld [vmem:[#allocation2 + $0x1e4] sm:$0xf0] }
 0x1b4   : > { %v5747_v12 = vrot.slane %v1334_v19, 9  ;;  %v5748_v35 = vrot.slane %v1336_v23, 9  ;;  %v8287_v30 = vmax.f32 %v1330_v10, %v5745_v58  ;;  %v1937_v4 = vsel %vm1864_vm11, %v1818_v7, %v1936_v25 }
 0x1b5   : > { %v1943_v36 = vsel %vm1862_vm10, %v1817_v3, %v1942_v48  ;;  %v1147_v61 = vadd.f32 %v7594_v45, %v1109_v15  ;;  %v1148_v14 = vadd.f32 %v7596_v0, %v1110_v8  ;;  %v8293_v56 = vmax.f32 %v1332_v29, %v5746_v37 }
 0x1b6   : > { %v8295_v44 = vmax.f32 %v1334_v19, %v5747_v12  ;;  %v8297_v46 = vmax.f32 %v1336_v23, %v5748_v35  ;;  %v1938_v7 = vsel %vm1866_vm12, %v1820_v26, %v1937_v4  ;;  %v1944_v3 = vsel %vm1864_vm11, %v1819_v52, %v1943_v36 }
 0x1b7   : > { %v1179_v55 = vmax.f32 %v1147_v61, 0.0  ;;  %v1939_v47 = vsel %vm1868_vm13, %v1822_v32, %v1938_v7  ;;  %v1945_v29 = vsel %vm1866_vm12, %v1821_v2, %v1944_v3  ;;  %v1180_v19 = vmax.f32 %v1148_v14, 0.0  ;;  %v5795_v61 = vld [vmem:[#allocation2 + $0x150] sm:$0xf]  ;;  %v6649_v14 = vld [vmem:[#allocation2 + $0x154] sm:$0xf0] }
 0x1b8   : > { %10228 = vst [vmem:[#allocation38_spill] sm:$0xff] %v8297_v46  ;;  %v5868_v23 = vor.u32 %v6667_v13, %v5867_v21  ;;  %v1946_v58 = vsel %vm1868_vm13, %v1823_v39, %v1945_v29  ;;  %v10229_v52 = vrot.slane %v8240_v43, 6  ;;  %v1830_v25 = vperm.slane %v8198_v49, 0  ;;  %v5859_v21 = vld [vmem:[#allocation2 + $0x1d0] sm:$0xf] }
 0x1b9   : > { %v1831_v48 = vperm.slane %v8198_v49, 2  ;;  %v6845_v15 = vpack.i.bf16 %v1946_v58, %v1939_v47  ;;  %v1228_v8 = vrot.slane %v1180_v19, 6  ;;  %v1832_v32 = vperm.slane %v8250_v53, 0  ;;  %v6665_v29 = vld [vmem:[#allocation2 + $0x1d4] sm:$0xf0] }
 0x1ba   : > { %v8313_v26 = vmax.f32 %v10229_v52, %v8248_v6  ;;  %2991 = vmatpush.bf16.msrb.mxu3 %v5868_v23  ;;  %v1833_v2 = vperm.slane %v8250_v53, 2  ;;  %v1834_v37 = vperm.slane %v8255_v20, 0  ;;  %v1835_v39 = vperm.slane %v8255_v20, 2 }
 0x1bb   : > { %v1836_v12 = vperm.slane %v8257_v16, 0  ;;  %v1837_v43 = vperm.slane %v8257_v16, 2  ;;  %6846 = vrot.lane.b32.xlu2 %v6845_v15, %s7002_s26  ;;  %v1337_v6 = vsel %vm1229_vm4, %v1179_v55, %v1228_v8  ;;  %v1338_v35 = vsel %vm1231_vm5, %v1179_v55, %v1228_v8 }
 0x1bc   : > { %10230 = vst [vmem:[#allocation39_spill] sm:$0xff] %v8313_v26  ;;  %v1340_v4 = vsel %vm1234_vm6, %v1179_v55, %v1228_v8  ;;  %v1342_v36 = vsel %vm833_vm3, %v1228_v8, %v1179_v55  ;;  %v1339_v13 = vrot.slane %v1338_v35, 2  ;;  %v5749_v47 = vrot.slane %v1337_v6, 9 }
 0x1bd   : > { %v1341_v7 = vrot.slane %v1340_v4, 4  ;;  %v1343_v3 = vrot.slane %v1342_v36, 6  ;;  %v1838_v19 = vperm.slane %v8313_v26, 0  ;;  %v1839_v23 = vperm.slane %v8313_v26, 2 }
 0x1be   : > { %v10231_v58 = vperm.slane %v8188_v1, 0  ;;  %v10232_v52 = vperm.slane %v8194_v57, 0  ;;  %v10233_v55 = vperm.slane %v8188_v1, 2  ;;  %v10234_v8 = vperm.slane %v8194_v57, 2 }
 0x1bf   : > { %v5750_v4 = vrot.slane %v1339_v13, 9  ;;  %v5751_v36 = vrot.slane %v1341_v7, 9  ;;  %v5752_v5 = vrot.slane %v1343_v3, 9  ;;  %v8340_v10 = vmax.f32 %v1337_v6, %v5749_v47 }
 0x1c0   : > { %v1947_v15 = vsel %vm1856_vm7, %v10232_v52, %v10231_v58  ;;  %v1954_v35 = vsel %vm1856_vm7, %v10234_v8, %v10233_v55  ;;  %v10236_v0 = vperm.slane %v8196_v50, 0  ;;  %v10237_v45 = vperm.slane %v8196_v50, 2 }
 0x1c1   : > { %10235 = vst [vmem:[#allocation40_spill] sm:$0xff] %v8340_v10  ;;  %v5796_v58 = vor.u32 %v6649_v14, %v5795_v61  ;;  %v5860_v52 = vor.u32 %v6665_v29, %v5859_v21  ;;  %v8348_v26 = vmax.f32 %v1339_v13, %v5750_v4  ;;  %v8350_v20 = vmax.f32 %v1341_v7, %v5751_v36  ;;  %v6621_v13 = vld [vmem:[#allocation2 + $0x74] sm:$0xf0]  ;;  %v6003_v7 = vld [vmem:[#allocation2 + $0xf0] sm:$0xf] }
 0x1c2   : > { %v1948_v62 = vsel %vm1858_vm8, %v10236_v0, %v1947_v15  ;;  %v1955_v9 = vsel %vm1858_vm8, %v10237_v45, %v1954_v35  ;;  %v8356_v0 = vmax.f32 %v1343_v3, %v5752_v5  ;;  %v1846_v45 = vperm.slane %v8297_v46, 0  ;;  %v6637_v15 = vld [vmem:[#allocation2 + $0xf4] sm:$0xf0]  ;;  %v5787_v35 = vld [vmem:[#allocation2 + $0x140] sm:$0xf] }
 0x1c3   : > { %10238 = vst [vmem:[#allocation41_spill] sm:$0xff] %v8348_v26  ;;  %v1949_v55 = vsel %vm1860_vm9, %v1830_v25, %v1948_v62  ;;  %v1956_v8 = vsel %vm1860_vm9, %v1831_v48, %v1955_v9  ;;  %2963 = vmatpush.bf16.msrb.mxu2 %v5796_v58  ;;  %2992 = vmatpush.bf16.msrb.mxu3 %v5860_v52  ;;  %v1847_v21 = vperm.slane %v8297_v46, 2  ;;  %v1848_v62 = vperm.slane %v8340_v10, 0  ;;  %v5939_v25 = vld [vmem:[#allocation2 + $0x70] sm:$0xf] }
 0x1c4   : > { %10239 = vst [vmem:[#allocation42_spill] sm:$0xff] %v8350_v20  ;;  %v1950_v6 = vsel %vm1862_vm10, %v1832_v32, %v1949_v55  ;;  %v1957_v47 = vsel %vm1862_vm10, %v1833_v2, %v1956_v8  ;;  %v1849_v32 = vperm.slane %v8340_v10, 2  ;;  %v1850_v5 = vperm.slane %v8348_v26, 0  ;;  %v6822_v2 = vpop.permute.xlu0 %6821  ;;  %v6647_v58 = vld [vmem:[#allocation2 + $0x144] sm:$0xf0] }
 0x1c5   : > { %10240 = vst [vmem:[#allocation43_spill] sm:$0xff] %v8356_v0  ;;  %v1951_v61 = vsel %vm1864_vm11, %v1834_v37, %v1950_v6  ;;  %v1958_v14 = vsel %vm1864_vm11, %v1835_v39, %v1957_v47  ;;  %v1851_v3 = vperm.slane %v8348_v26, 2  ;;  %v1852_v29 = vperm.slane %v8350_v20, 0  ;;  %v6635_v10 = vld [vmem:[#allocation2 + $0xe4] sm:$0xf0] }
 0x1c6   : > { %v1952_v9 = vsel %vm1866_vm12, %v1836_v12, %v1951_v61  ;;  %v1959_v48 = vsel %vm1866_vm12, %v1837_v43, %v1958_v14  ;;  %v1853_v43 = vperm.slane %v8350_v20, 2  ;;  %v1854_v4 = vperm.slane %v8356_v0, 0  ;;  %v5995_v20 = vld [vmem:[#allocation2 + $0xe0] sm:$0xf] }
 0x1c7   : > { %v1953_v37 = vsel %vm1868_vm13, %v1838_v19, %v1952_v9  ;;  %v1960_v39 = vsel %vm1868_vm13, %v1839_v23, %v1959_v48  ;;  %v1855_v36 = vperm.slane %v8356_v0, 2  ;;  %v10241_v52 = vperm.slane %v8287_v30, 0  ;;  %v5931_v0 = vld [vmem:[#allocation2 + $0x60] sm:$0xf] }
 0x1c8   : > { %v6850_v12 = vpack.i.bf16 %v1960_v39, %v1953_v37  ;;  %v10242_v19 = vperm.slane %v8293_v56, 0  ;;  %v10243_v55 = vperm.slane %v8287_v30, 2  ;;  %v10244_v8 = vperm.slane %v8293_v56, 2 }
 0x1c9   : > { %v6824_v47 = vunpack.i.h.bf16 %v6822_v2  ;;  %v10245_v61 = vperm.slane %v8295_v44, 0  ;;  %v10246_v9 = vperm.slane %v8295_v44, 2  ;;  %v6823_v37 = vunpack.i.l.bf16 %v6822_v2 }
 0x1ca   : > { %v1961_v23 = vsel %vm1856_vm7, %v10242_v19, %v10241_v52  ;;  %v1968_v6 = vsel %vm1856_vm7, %v10244_v8, %v10243_v55  ;;  %6851 = vrot.lane.b32.xlu0 %v6850_v12, %s7002_s26  ;;  %v5940_v39 = vor.u32 %v6621_v13, %v5939_v25  ;;  %v5851_v52 = vld [vmem:[#allocation2 + $0x1c0] sm:$0xf]  ;;  %v6663_v19 = vld [vmem:[#allocation2 + $0x1c4] sm:$0xf0]  ;;  %v6004_v8 = vor.u32 %v6637_v15, %v6003_v7 }
 0x1cb   : > { %v1962_v14 = vsel %vm1858_vm8, %v10245_v61, %v1961_v23  ;;  %v1969_v48 = vsel %vm1858_vm8, %v10246_v9, %v1968_v6  ;;  %v5788_v46 = vor.u32 %v6647_v58, %v5787_v35  ;;  %v6619_v12 = vld [vmem:[#allocation2 + $0x64] sm:$0xf0]  ;;  %v2008_v6 = vsel %vm2007_vm14, %v6823_v37, %v6824_v47 }
 0x1cc   : > { %v1963_v26 = vsel %vm1860_vm9, %v1846_v45, %v1962_v14  ;;  %v1970_v55 = vsel %vm1860_vm9, %v1847_v21, %v1969_v48  ;;  %v2032_v25 = vsel %vm2007_vm14, %v6824_v47, %v6823_v37  ;;  %3237 = vmatpush.bf16.msra.mxu0 %v5940_v39  ;;  %3266 = vmatpush.bf16.msra.mxu1 %v6004_v8  ;;  %v5987_v14 = vld [vmem:[#allocation2 + $0xd0] sm:$0xf] }
 0x1cd   : > { %v1964_v23 = vsel %vm1862_vm10, %v1848_v62, %v1963_v26  ;;  %v1971_v61 = vsel %vm1862_vm10, %v1849_v32, %v1970_v55  ;;  %v2048_v13 = vrot.slane %v2032_v25, 6  ;;  %2964 = vmatpush.bf16.msrb.mxu2 %v5788_v46  ;;  %v5852_v21 = vor.u32 %v6663_v19, %v5851_v52  ;;  %v5923_v32 = vld [vmem:[#allocation2 + $0x50] sm:$0xf]  ;;  %v6633_v46 = vld [vmem:[#allocation2 + $0xd4] sm:$0xf0]  ;;  %v10247_v55 = vld [vmem:[#allocation10_spill] sm:$0xff] }
 0x1ce   : > { %v1965_v2 = vsel %vm1864_vm11, %v1850_v5, %v1964_v23  ;;  %v1972_v45 = vsel %vm1864_vm11, %v1851_v3, %v1971_v61  ;;  %v5932_v26 = vor.u32 %v6619_v12, %v5931_v0  ;;  %v5996_v62 = vor.u32 %v6635_v10, %v5995_v20  ;;  %v6617_v3 = vld [vmem:[#allocation2 + $0x54] sm:$0xf0]  ;;  %v5915_v12 = vld [vmem:[#allocation2 + $0x40] sm:$0xf]  ;;  %v6615_v23 = vld [vmem:[#allocation2 + $0x44] sm:$0xf0] }
 0x1cf   : > { %v1966_v7 = vsel %vm1866_vm12, %v1852_v29, %v1965_v2  ;;  %v1973_v15 = vsel %vm1866_vm12, %v1853_v43, %v1972_v45  ;;  %v2056_v47 = vsel %vm1229_vm4, %v2008_v6, %v2048_v13  ;;  %v2057_v5 = vsel %vm1231_vm5, %v2008_v6, %v2048_v13  ;;  %2993 = vmatpush.bf16.msrb.mxu3 %v5852_v21  ;;  %v10249_v2 = vld [vmem:[#allocation9_spill] sm:$0xff] }
 0x1d0   : > { %v1967_v35 = vsel %vm1868_vm13, %v1854_v4, %v1966_v7  ;;  %v1974_v58 = vsel %vm1868_vm13, %v1855_v36, %v1973_v15  ;;  %v2058_v48 = vrot.slane %v2057_v5, 2  ;;  %v2059_v29 = vsel %vm1234_vm6, %v2008_v6, %v2048_v13  ;;  %3238 = vmatpush.bf16.msra.mxu0 %v5932_v26  ;;  %3267 = vmatpush.bf16.msra.mxu1 %v5996_v62  ;;  %v5907_v26 = vld [vmem:[#allocation2 + $0x30] sm:$0xf]  ;;  %v6613_v62 = vld [vmem:[#allocation2 + $0x34] sm:$0xf0] }
 0x1d1   : > { %v6855_v9 = vpack.i.bf16 %v1974_v58, %v1967_v35  ;;  %v2061_v0 = vsel %vm833_vm3, %v2048_v13, %v2008_v6  ;;  %v2060_v20 = vrot.slane %v2059_v29, 4  ;;  %v2112_v43 = vrot.slane %v2056_v47, 1  ;;  %v10248_v6 = vld [vmem:[#allocation8_spill] sm:$0xff]  ;;  %v6631_v13 = vld [vmem:[#allocation2 + $0xc4] sm:$0xf0] }
 0x1d2   : > { %v2062_v10 = vrot.slane %v2061_v0, 6  ;;  %v2208_v4 = vmax.f32 %v7699_v34, %v2056_v47  ;;  %v2113_v36 = vrot.slane %v2058_v48, 1  ;;  %v2210_v37 = vmax.f32 %v7705_v54, %v2058_v48  ;;  %v5979_v34 = vld [vmem:[#allocation2 + $0xc0] sm:$0xf]  ;;  %v5971_v5 = vld [vmem:[#allocation2 + $0xb0] sm:$0xf] }
 0x1d3   : > { %6856 = vrot.lane.b32.xlu1 %v6855_v9, %s7002_s26  ;;  %v5924_v39 = vor.u32 %v6617_v3, %v5923_v32  ;;  %v5988_v52 = vor.u32 %v6633_v46, %v5987_v14  ;;  %v2114_v19 = vrot.slane %v2060_v20, 1  ;;  %v2209_v8 = vmax.f32 %v10247_v55, %v2112_v43  ;;  %v10250_v3 = vld [vmem:[#allocation11_spill] sm:$0xff]  ;;  %v10251_v46 = vld [vmem:[#allocation12_spill] sm:$0xff]  ;;  %v6629_v48 = vld [vmem:[#allocation2 + $0xb4] sm:$0xf0]  ;;  %s5489_s26 = scalar_lea.sflag [#allocation4], %s343_s29 }
 0x1d4   : > { %v8411_v61 = vrot.slane %v2062_v10, 1  ;;  %v2211_v25 = vmax.f32 %v10248_v6, %v2113_v36  ;;  %v2212_v45 = vmax.f32 %v10249_v2, %v2060_v20  ;;  %v2336_v21 = vperm.slane %v2208_v4, 0  ;;  %v5779_v29 = vld [vmem:[#allocation2 + $0x130] sm:$0xf]  ;;  %v6645_v0 = vld [vmem:[#allocation2 + $0x134] sm:$0xf0] }
 0x1d5   : > { %3239 = vmatpush.bf16.msra.mxu0 %v5924_v39  ;;  %v2338_v7 = vperm.slane %v2209_v8, 0  ;;  %v2339_v15 = vperm.slane %v2209_v8, 2  ;;  %v2340_v54 = vperm.slane %v2210_v37, 0  ;;  %3268 = vmatpush.bf16.msra.mxu1 %v5988_v52  ;;  %v2337_v32 = vperm.slane %v2208_v4, 2  ;;  %v5843_v52 = vld [vmem:[#allocation2 + $0x1b0] sm:$0xf] }
 0x1d6   : > { %v2341_v35 = vperm.slane %v2210_v37, 2  ;;  %v2342_v58 = vperm.slane %v2211_v25, 0  ;;  %v2343_v47 = vperm.slane %v2211_v25, 2  ;;  %v2213_v14 = vmax.f32 %v10250_v3, %v2114_v19  ;;  %v6661_v4 = vld [vmem:[#allocation2 + $0x1b4] sm:$0xf0] }
 0x1d7   : > { %v8417_v9 = vmax.f32 %v10251_v46, %v2062_v10  ;;  %v2344_v20 = vperm.slane %v2212_v45, 0  ;;  %v2464_v43 = vsel %vm1858_vm8, %v2338_v7, %v2336_v21  ;;  %v2470_v36 = vsel %vm1858_vm8, %v2339_v15, %v2337_v32  ;;  %v5771_v6 = vld [vmem:[#allocation2 + $0x120] sm:$0xf]  ;;  %v6643_v21 = vld [vmem:[#allocation2 + $0x124] sm:$0xf0] }
 0x1d8   : > { %v5916_v39 = vor.u32 %v6615_v23, %v5915_v12  ;;  %v2345_v37 = vperm.slane %v2212_v45, 2  ;;  %v2465_v55 = vsel %vm1860_vm9, %v2340_v54, %v2464_v43  ;;  %v2471_v8 = vsel %vm1860_vm9, %v2341_v35, %v2470_v36  ;;  %v5835_v7 = vld [vmem:[#allocation2 + $0x1a0] sm:$0xf]  ;;  %v6659_v15 = vld [vmem:[#allocation2 + $0x1a4] sm:$0xf0]  ;;  %v10252_v36 = vld [vmem:[#allocation13_spill] sm:$0xff] }
 0x1d9   : > { %v5980_v19 = vor.u32 %v6631_v13, %v5979_v34  ;;  %v2466_v10 = vsel %vm1862_vm10, %v2342_v58, %v2465_v55  ;;  %v2472_v25 = vsel %vm1862_vm10, %v2343_v47, %v2471_v8  ;;  %v5908_v2 = vor.u32 %v6613_v62, %v5907_v26  ;;  %v5899_v32 = vld [vmem:[#allocation2 + $0x20] sm:$0xf]  ;;  %v6611_v35 = vld [vmem:[#allocation2 + $0x24] sm:$0xf0]  ;;  %v6609_v43 = vld [vmem:[#allocation2 + $0x14] sm:$0xf0] }
 0x1da   : > { %3240 = vmatpush.bf16.msra.mxu0 %v5916_v39  ;;  %v5780_v3 = vor.u32 %v6645_v0, %v5779_v29  ;;  %v2346_v12 = vperm.slane %v2213_v14, 0  ;;  %v2467_v23 = vsel %vm1864_vm11, %v2344_v20, %v2466_v10  ;;  %v5972_v45 = vor.u32 %v6629_v48, %v5971_v5  ;;  %v5963_v34 = vld [vmem:[#allocation2 + $0xa0] sm:$0xf]  ;;  %v6627_v13 = vld [vmem:[#allocation2 + $0xa4] sm:$0xf0]  ;;  %v6827_v20 = vpop.permute.xlu0 %6826 }
 0x1db   : > { %3269 = vmatpush.bf16.msra.mxu1 %v5980_v19  ;;  %v5844_v54 = vor.u32 %v6661_v4, %v5843_v52  ;;  %v5772_v58 = vor.u32 %v6643_v21, %v5771_v6  ;;  %v2348_v47 = vperm.slane %v8417_v9, 0  ;;  %v2473_v26 = vsel %vm1864_vm11, %v2345_v37, %v2472_v25  ;;  %v5891_v48 = vld [vmem:[#allocation2 + $0x10] sm:$0xf]  ;;  %v6625_v8 = vld [vmem:[#allocation2 + $0x94] sm:$0xf0] }
 0x1dc   : > { %2965 = vmatpush.bf16.msrb.mxu2 %v5780_v3  ;;  %v5836_v62 = vor.u32 %v6659_v15, %v5835_v7  ;;  %v2468_v46 = vsel %vm1866_vm12, %v2346_v12, %v2467_v23  ;;  %v2347_v29 = vperm.slane %v2213_v14, 2  ;;  %v2349_v0 = vperm.slane %v8417_v9, 2  ;;  %v5955_v55 = vld [vmem:[#allocation2 + $0x90] sm:$0xf]  ;;  %v6641_v9 = vld [vmem:[#allocation2 + $0x114] sm:$0xf0] }
 0x1dd   : > { %2994 = vmatpush.bf16.msrb.mxu3 %v5844_v54  ;;  %v5900_v5 = vor.u32 %v6611_v35, %v5899_v32  ;;  %v8432_v39 = vmax.f32 %v10252_v36, %v8411_v61  ;;  %v6829_v52 = vunpack.i.h.bf16 %v6827_v20  ;;  %v6828_v4 = vunpack.i.l.bf16 %v6827_v20  ;;  %v5763_v14 = vld [vmem:[#allocation2 + $0x110] sm:$0xf]  ;;  %v6657_v3 = vld [vmem:[#allocation2 + $0x194] sm:$0xf0]  ;;  %v5883_v21 = vld [vmem:[#allocation2] sm:$0xf] }
 0x1de   : > { %3241 = vmatpush.bf16.msra.mxu0 %v5908_v2  ;;  %v5964_v37 = vor.u32 %v6627_v13, %v5963_v34  ;;  %v8435_v19 = vsel %vm1868_vm13, %v2348_v47, %v2468_v46  ;;  %v5827_v6 = vld [vmem:[#allocation2 + $0x190] sm:$0xf]  ;;  %v2474_v10 = vsel %vm1866_vm12, %v2347_v29, %v2473_v26  ;;  %v5892_v61 = vor.u32 %v6609_v43, %v5891_v48  ;;  %v6607_v7 = vld [vmem:[#allocation2 + $0x4] sm:$0xf0]  ;;  %v5947_v34 = vld [vmem:[#allocation2 + $0x80] sm:$0xf] }
 0x1df   : > { %3270 = vmatpush.bf16.msra.mxu1 %v5972_v45  ;;  %v2033_v25 = vsel %vm2007_vm14, %v6829_v52, %v6828_v4  ;;  %v5764_v2 = vor.u32 %v6641_v9, %v5763_v14  ;;  %v5828_v12 = vor.u32 %v6657_v3, %v5827_v6  ;;  %v2350_v23 = vperm.slane %v8432_v39, 0  ;;  %v6639_v47 = vld [vmem:[#allocation2 + $0x104] sm:$0xf0]  ;;  %v10253_v6 = vld [vmem:[#allocation14_spill] sm:$0xff] }
 0x1e0   : > { %2966 = vmatpush.bf16.msrb.mxu2 %v5772_v58  ;;  %v2049_v15 = vrot.slane %v2033_v25, 6  ;;  %v8442_v45 = vsel %vm385_vm0, 0.0, %v8435_v19  ;;  %v2009_v54 = vsel %vm2007_vm14, %v6828_v4, %v6829_v52  ;;  %v5956_v32 = vor.u32 %v6625_v8, %v5955_v55  ;;  %v5755_v58 = vld [vmem:[#allocation2 + $0x100] sm:$0xf]  ;;  %v6623_v20 = vld [vmem:[#allocation2 + $0x84] sm:$0xf0] }
 0x1e1   : > { %2995 = vmatpush.bf16.msrb.mxu3 %v5836_v62  ;;  %v5884_v35 = vor.u32 %v6607_v7, %v5883_v21  ;;  %v8446_v13 = vsel %vm1868_vm13, %v2349_v0, %v2474_v10  ;;  %v6655_v48 = vld [vmem:[#allocation2 + $0x184] sm:$0xf0]  ;;  %v8454_v8 = vsel %vm385_vm0, %v2350_v23, 0.0  ;;  %v5948_v25 = vor.u32 %v6623_v20, %v5947_v34  ;;  %v10254_v21 = vld [vmem:[#allocation16_spill] sm:$0xff]  ;;  %v10257_v23 = vld [vmem:[#allocation18_spill] sm:$0xff] }
 0x1e2   : > { %3242 = vmatpush.bf16.msra.mxu0 %v5900_v5  ;;  %v2063_v26 = vsel %vm1229_vm4, %v2009_v54, %v2049_v15  ;;  %v2064_v62 = vsel %vm1231_vm5, %v2009_v54, %v2049_v15  ;;  %v2066_v46 = vsel %vm1234_vm6, %v2009_v54, %v2049_v15  ;;  %v2068_v29 = vsel %vm833_vm3, %v2049_v15, %v2009_v54  ;;  %v5819_v5 = vld [vmem:[#allocation2 + $0x180] sm:$0xf] }
 0x1e3   : > { %3271 = vmatpush.bf16.msra.mxu1 %v5964_v37  ;;  %v2065_v43 = vrot.slane %v2064_v62, 2  ;;  %v2067_v36 = vrot.slane %v2066_v46, 4  ;;  %v2069_v52 = vrot.slane %v2068_v29, 6  ;;  %v2116_v4 = vrot.slane %v2063_v26, 1 }
 0x1e4   : > { %2967 = vmatpush.bf16.msrb.mxu2 %v5764_v2  ;;  %v2216_v0 = vmax.f32 %v7757_v41, %v2063_v26  ;;  %v5756_v37 = vor.u32 %v6639_v47, %v5755_v58  ;;  %v5820_v55 = vor.u32 %v6655_v48, %v5819_v5  ;;  %v2696_v41 = vrot.slane %v8442_v45, 1 }
 0x1e5   : > { %2996 = vmatpush.bf16.msrb.mxu3 %v5828_v12  ;;  %v2117_v14 = vrot.slane %v2065_v43, 1  ;;  %v2118_v9 = vrot.slane %v2067_v36, 1  ;;  %v2217_v10 = vmax.f32 %v10253_v6, %v2116_v4  ;;  %v2119_v2 = vrot.slane %v2069_v52, 1  ;;  %v10256_v12 = vld [vmem:[#allocation17_spill] sm:$0xff] }
 0x1e6   : > { %3243 = vmatpush.bf16.msra.mxu0 %v5892_v61  ;;  %v2218_v3 = vmax.f32 %v7763_v60, %v2065_v43  ;;  %v2220_v7 = vmax.f32 %v10254_v21, %v2067_v36  ;;  %v10255_v61 = vld [vmem:[#allocation15_spill] sm:$0xff]  ;;  %v2222_v58 = vmax.f32 %v10257_v23, %v2069_v52  ;;  %v2352_v26 = vperm.slane %v2216_v0, 0 }
 0x1e7   : > { %3272 = vmatpush.bf16.msra.mxu1 %v5956_v32  ;;  %v2219_v15 = vmax.f32 %v10255_v61, %v2117_v14  ;;  %v2221_v54 = vmax.f32 %v10256_v12, %v2118_v9  ;;  %v2354_v47 = vperm.slane %v2217_v10, 0  ;;  %v2355_v62 = vperm.slane %v2217_v10, 2 }
 0x1e8   : > { %2968 = vmatpush.bf16.msrb.mxu2 %v5756_v37  ;;  %v2356_v32 = vperm.slane %v2218_v3, 0  ;;  %v2357_v34 = vperm.slane %v2218_v3, 2  ;;  %v2353_v46 = vperm.slane %v2216_v0, 2  ;;  %v2697_v20 = vrot.slane %v8454_v8, 1 }
 0x1e9   : > { %2997 = vmatpush.bf16.msrb.mxu3 %v5820_v55  ;;  %v2358_v60 = vperm.slane %v2219_v15, 0  ;;  %v2359_v29 = vperm.slane %v2219_v15, 2  ;;  %v2360_v5 = vperm.slane %v2220_v7, 0  ;;  %v2361_v48 = vperm.slane %v2220_v7, 2  ;;  %v10258_v55 = vld [vmem:[#allocation19_spill] sm:$0xff] }
 0x1ea   : > { %3244 = vmatpush.bf16.msra.mxu0 %v5884_v35  ;;  %v2362_v43 = vperm.slane %v2221_v54, 0  ;;  %v2476_v36 = vsel %vm1858_vm8, %v2354_v47, %v2352_v26  ;;  %v2363_v4 = vperm.slane %v2221_v54, 2  ;;  %v2482_v37 = vsel %vm1858_vm8, %v2355_v62, %v2353_v46 }
 0x1eb   : > { %3273 = vmatpush.bf16.msra.mxu1 %v5948_v25  ;;  %v2477_v52 = vsel %vm1860_vm9, %v2356_v32, %v2476_v36  ;;  %v2223_v14 = vmax.f32 %v10258_v55, %v2119_v2  ;;  %v2364_v9 = vperm.slane %v2222_v58, 0  ;;  %v2483_v0 = vsel %vm1860_vm9, %v2357_v34, %v2482_v37 }
 0x1ec   : > { %v2478_v35 = vsel %vm1862_vm10, %v2358_v60, %v2477_v52  ;;  %v2351_v6 = vperm.slane %v8432_v39, 2  ;;  %v2484_v25 = vsel %vm1862_vm10, %v2359_v29, %v2483_v0  ;;  %v2365_v7 = vperm.slane %v2222_v58, 2 }
 0x1ed   : > { %v2479_v10 = vsel %vm1864_vm11, %v2360_v5, %v2478_v35  ;;  %v2366_v3 = vperm.slane %v2223_v14, 0  ;;  %v2367_v21 = vperm.slane %v2223_v14, 2  ;;  %v2485_v61 = vsel %vm1864_vm11, %v2361_v48, %v2484_v25 }
 0x1ee   : > { %v2480_v2 = vsel %vm1866_vm12, %v2362_v43, %v2479_v10  ;;  %v8478_v15 = vsel %vm385_vm0, 0.0, %v8446_v13  ;;  %v2486_v39 = vsel %vm1866_vm12, %v2363_v4, %v2485_v61  ;;  %v8490_v58 = vsel %vm385_vm0, %v2351_v6, 0.0 }
 0x1ef   : > { %v2481_v12 = vsel %vm1868_vm13, %v2364_v9, %v2480_v2  ;;  %v8487_v23 = vsel %vm385_vm0, %v2366_v3, 0.0  ;;  %v2487_v26 = vsel %vm1868_vm13, %v2365_v7, %v2486_v39  ;;  %v8500_v32 = vsel %vm385_vm0, %v2367_v21, 0.0  ;;  %v6832_v34 = vpop.permute.xlu1 %6831  ;;  %v10266_v39 = vld [vmem:[#allocation20_spill] sm:$0xff] }
 0x1f0   : > { %v8493_v47 = vpack.c.bf16 %v2481_v12, %v8435_v19  ;;  %v8497_v62 = vsel %vm385_vm0, 0.0, %v2481_v12  ;;  %v8503_v46 = vpack.c.bf16 %v2487_v26, %v8446_v13  ;;  %v2698_v60 = vsel %vm462_vm2, %v2696_v41, %v2697_v20 }
 0x1f1   : > { %v2702_v29 = vrot.slane %v8497_v62, 1  ;;  %v2703_v5 = vrot.slane %v8487_v23, 1  ;;  %v6834_v19 = vunpack.i.h.bf16 %v6832_v34  ;;  %v6833_v48 = vunpack.i.l.bf16 %v6832_v34 }
 0x1f2   : > { %10261 = vst [vmem:[#allocation10_spill] sm:$0xff] %v8493_v47  ;;  %6013 = vmatmul.msk.bf16.vlgmr.msra.gmra.mxu0 %vm8481_vm1, %v8493_v47  ;;  %v8512_v43 = vsel %vm385_vm0, 0.0, %v2487_v26  ;;  %v2699_v36 = vrot.slane %v8478_v15, 1  ;;  %6033 = vmatmul.msk.bf16.vlgmr.msra.gmra.mxu1 %vm8481_vm1, %v8503_v46  ;;  %v2700_v41 = vrot.slane %v8490_v58, 1  ;;  %v2706_v4 = vrot.slane %v8500_v32, 1 }
 0x1f3   : > { %10262 = vst [vmem:[#allocation8_spill] sm:$0xff] %v8503_v46  ;;  %v2704_v13 = vsel %vm462_vm2, %v2702_v29, %v2703_v5  ;;  %v2705_v20 = vrot.slane %v8512_v43, 1  ;;  %v2034_v52 = vsel %vm2007_vm14, %v6834_v19, %v6833_v48  ;;  %v3353_v14 = vrot.slane %v8442_v45, 2  ;;  %v10267_v29 = vld [vmem:[#allocation21_spill] sm:$0xff]  ;;  %v10280_v46 = vld [vmem:[#allocation30_spill] sm:$0xff] }
 0x1f4   : > { %10263 = vst [vmem:[#allocation9_spill] sm:$0xff] %v8512_v43  ;;  %v8523_v37 = vpack.c.bf16 %v2704_v13, %v2698_v60  ;;  %v2050_v55 = vrot.slane %v2034_v52, 6  ;;  %v2701_v9 = vsel %vm462_vm2, %v2699_v36, %v2700_v41  ;;  %v2010_v0 = vsel %vm2007_vm14, %v6833_v48, %v6834_v19  ;;  %v10268_v48 = vld [vmem:[#allocation22_spill] sm:$0xff]  ;;  %v10269_v13 = vld [vmem:[#allocation24_spill] sm:$0xff]  ;;  %v10271_v52 = vld [vmem:[#allocation23_spill] sm:$0xff] }
 0x1f5   : > { %v2707_v35 = vsel %vm462_vm2, %v2705_v20, %v2706_v4  ;;  %v3354_v6 = vrot.slane %v8454_v8, 2  ;;  %v10270_v20 = vld [vmem:[#allocation31_spill] sm:$0xff] }
 0x1f6   : > { %10264 = vst [vmem:[#allocation11_spill] sm:$0xff] %v8523_v37  ;;  %2969 = vmatmul.bf16.vlgmr.msrb.gmra.mxu2 %v8523_v37  ;;  %v8531_v10 = vpack.c.bf16 %v2707_v35, %v2701_v9  ;;  %v2070_v25 = vsel %vm1229_vm4, %v2010_v0, %v2050_v55  ;;  %v2071_v3 = vsel %vm1231_vm5, %v2010_v0, %v2050_v55  ;;  %v10272_v9 = vld [vmem:[#allocation29_spill] sm:$0xff] }
 0x1f7   : > { %v2073_v21 = vsel %vm1234_vm6, %v2010_v0, %v2050_v55  ;;  %v2075_v45 = vsel %vm833_vm3, %v2050_v55, %v2010_v0  ;;  %v2072_v7 = vrot.slane %v2071_v3, 2  ;;  %v2120_v12 = vrot.slane %v2070_v25, 1 }
 0x1f8   : > { %10265 = vst [vmem:[#allocation12_spill] sm:$0xff] %v8531_v10  ;;  %v2074_v61 = vrot.slane %v2073_v21, 4  ;;  %v2076_v2 = vrot.slane %v2075_v45, 6  ;;  %2998 = vmatmul.bf16.vlgmr.msrb.gmra.mxu3 %v8531_v10  ;;  %v2224_v26 = vmax.f32 %v10266_v39, %v2070_v25  ;;  %v8540_v8 = vsel %vm833_vm3, %v3353_v14, %v3354_v6 }
 0x1f9   : > { %v2121_v34 = vrot.slane %v2072_v7, 1  ;;  %v2225_v5 = vmax.f32 %v10267_v29, %v2120_v12  ;;  %v2226_v36 = vmax.f32 %v10268_v48, %v2072_v7 }
 0x1fa   : > { %v2122_v60 = vrot.slane %v2074_v61, 1  ;;  %v2123_v19 = vrot.slane %v2076_v2, 1  ;;  %v2228_v41 = vmax.f32 %v10269_v13, %v2074_v61  ;;  %v8546_v4 = vmax.f32 %v10270_v20, %v2076_v2 }
 0x1fb   : > { %v2227_v55 = vmax.f32 %v10271_v52, %v2121_v34  ;;  %v2368_v0 = vperm.slane %v2224_v26, 0  ;;  %v2370_v25 = vperm.slane %v2225_v5, 0  ;;  %v2369_v14 = vperm.slane %v2224_v26, 2  ;;  %v10273_v52 = vld [vmem:[#allocation32_spill] sm:$0xff] }
 0x1fc   : > { %v2229_v35 = vmax.f32 %v10272_v9, %v2122_v60  ;;  %v2371_v6 = vperm.slane %v2225_v5, 2  ;;  %v2372_v3 = vperm.slane %v2226_v36, 0  ;;  %v2373_v21 = vperm.slane %v2226_v36, 2 }
 0x1fd   : > { %v2374_v45 = vperm.slane %v2227_v55, 0  ;;  %v2375_v12 = vperm.slane %v2227_v55, 2  ;;  %v2488_v39 = vsel %vm1858_vm8, %v2370_v25, %v2368_v0  ;;  %v2376_v7 = vperm.slane %v2228_v41, 0 }
 0x1fe   : > { %v2494_v61 = vsel %vm1858_vm8, %v2371_v6, %v2369_v14  ;;  %v2489_v29 = vsel %vm1860_vm9, %v2372_v3, %v2488_v39  ;;  %v2377_v34 = vperm.slane %v2228_v41, 2  ;;  %v2378_v48 = vperm.slane %v2229_v35, 0 }
 0x1ff   : > { %v2490_v60 = vsel %vm1862_vm10, %v2374_v45, %v2489_v29  ;;  %v2495_v26 = vsel %vm1860_vm9, %v2373_v21, %v2494_v61  ;;  %v2380_v36 = vperm.slane %v8546_v4, 0  ;;  %v8560_v55 = vmax.f32 %v10273_v52, %v2123_v19 }
 0x200   : > { %v6842_v5 = vpop.permute.xlu2 %6841  ;;  %v2491_v13 = vsel %vm1864_vm11, %v2376_v7, %v2490_v60  ;;  %v2496_v20 = vsel %vm1862_vm10, %v2375_v12, %v2495_v26  ;;  %v2379_v21 = vperm.slane %v2229_v35, 2 }
 0x201   : > { %v6844_v9 = vunpack.i.h.bf16 %v6842_v5  ;;  %v6843_v0 = vunpack.i.l.bf16 %v6842_v5  ;;  %v2492_v25 = vsel %vm1866_vm12, %v2378_v48, %v2491_v13  ;;  %v2497_v41 = vsel %vm1864_vm11, %v2377_v34, %v2496_v20 }
 0x202   : > { %v8567_v3 = vsel %vm1868_vm13, %v2380_v36, %v2492_v25  ;;  %v2382_v7 = vperm.slane %v8560_v55, 0  ;;  %v2381_v34 = vperm.slane %v8546_v4, 2  ;;  %v2498_v48 = vsel %vm1866_vm12, %v2379_v21, %v2497_v41 }
 0x203   : > { %v2036_v45 = vsel %vm2007_vm14, %v6844_v9, %v6843_v0  ;;  %v6837_v39 = vpop.permute.xlu1 %6836  ;;  %v2012_v60 = vsel %vm2007_vm14, %v6843_v0, %v6844_v9  ;;  %v8579_v5 = vsel %vm385_vm0, 0.0, %v8567_v3 }
 0x204   : > { %v2052_v61 = vrot.slane %v2036_v45, 6  ;;  %v6839_v26 = vunpack.i.h.bf16 %v6837_v39  ;;  %v6838_v35 = vunpack.i.l.bf16 %v6837_v39  ;;  %10274 = vst [vmem:[#allocation13_spill] sm:$0xff] %v8579_v5  ;;  %v8586_v41 = vsel %vm385_vm0, %v2382_v7, 0.0 }
 0x205   : > { %10275 = vst [vmem:[#allocation14_spill] sm:$0xff] %v8586_v41  ;;  %v2708_v21 = vrot.slane %v8579_v5, 1  ;;  %v2383_v39 = vperm.slane %v8560_v55, 2  ;;  %v8593_v12 = vsel %vm1868_vm13, %v2381_v34, %v2498_v48 }
 0x206   : > { %v2084_v36 = vsel %vm1229_vm4, %v2012_v60, %v2052_v61  ;;  %v2085_v13 = vsel %vm1231_vm5, %v2012_v60, %v2052_v61  ;;  %v2087_v20 = vsel %vm1234_vm6, %v2012_v60, %v2052_v61  ;;  %v2089_v52 = vsel %vm833_vm3, %v2052_v61, %v2012_v60 }
 0x207   : > { %v2086_v25 = vrot.slane %v2085_v13, 2  ;;  %v2088_v4 = vrot.slane %v2087_v20, 4  ;;  %v2128_v45 = vrot.slane %v2084_v36, 1  ;;  %v2090_v9 = vrot.slane %v2089_v52, 6 }
 0x208   : > { %v2240_v0 = vmax.f32 %v7990_v18, %v2084_v36  ;;  %v2709_v60 = vrot.slane %v8586_v41, 1  ;;  %v2011_v55 = vsel %vm2007_vm14, %v6838_v35, %v6839_v26  ;;  %v8635_v34 = vsel %vm385_vm0, %v2383_v39, 0.0 }
 0x209   : > { %v2129_v19 = vrot.slane %v2086_v25, 1  ;;  %v2130_v29 = vrot.slane %v2088_v4, 1  ;;  %v2241_v6 = vmax.f32 %v7996_v24, %v2128_v45  ;;  %v8596_v61 = vmax.f32 %v7998_v28, %v2086_v25 }
 0x20a   : > { %v8599_v7 = vmax.f32 %v8060_v51, %v2088_v4  ;;  %v2035_v24 = vsel %vm2007_vm14, %v6839_v26, %v6838_v35  ;;  %v8609_v48 = vrot.slane %v2090_v9, 1  ;;  %v8612_v28 = vmax.f32 %v8133_v27, %v2090_v9  ;;  %v10277_v9 = vld [vmem:[#allocation25_spill] sm:$0xff] }
 0x20b   : > { %v8604_v36 = vmax.f32 %v8000_v17, %v2129_v19  ;;  %v2400_v51 = vperm.slane %v2240_v0, 0  ;;  %v8615_v13 = vsel %vm462_vm2, %v2708_v21, %v2709_v60  ;;  %v8618_v20 = vmax.f32 %v8129_v33, %v2130_v29 }
 0x20c   : > { %v2401_v17 = vperm.slane %v2240_v0, 2  ;;  %v2402_v19 = vperm.slane %v2241_v6, 0  ;;  %v2403_v52 = vperm.slane %v2241_v6, 2  ;;  %v2051_v4 = vrot.slane %v2035_v24, 6 }
 0x20d   : > { %v8628_v33 = vsel %vm385_vm0, 0.0, %v8593_v12  ;;  %v2712_v47 = vrot.slane %v8635_v34, 1 }
 0x20e   : > { %10276 = vst [vmem:[#allocation16_spill] sm:$0xff] %v8628_v33  ;;  %v2077_v29 = vsel %vm1229_vm4, %v2011_v55, %v2051_v4  ;;  %v2078_v6 = vsel %vm1231_vm5, %v2011_v55, %v2051_v4  ;;  %v2080_v0 = vsel %vm1234_vm6, %v2011_v55, %v2051_v4  ;;  %v2082_v21 = vsel %vm833_vm3, %v2051_v4, %v2011_v55  ;;  %v10278_v55 = vld [vmem:[#allocation26_spill] sm:$0xff] }
 0x20f   : > { %v2079_v60 = vrot.slane %v2078_v6, 2  ;;  %v2081_v24 = vrot.slane %v2080_v0, 4  ;;  %v2124_v18 = vrot.slane %v2077_v29, 1  ;;  %v8638_v2 = vsel %vm1858_vm8, %v2402_v19, %v2400_v51  ;;  %v10279_v6 = vld [vmem:[#allocation27_spill] sm:$0xff]  ;;  %v10281_v19 = vld [vmem:[#allocation28_spill] sm:$0xff] }
 0x210   : > { %v8641_v14 = vsel %vm1858_vm8, %v2403_v52, %v2401_v17  ;;  %v2232_v45 = vmax.f32 %v10277_v9, %v2077_v29  ;;  %v2711_v26 = vrot.slane %v8628_v33, 1  ;;  %v2083_v35 = vrot.slane %v2082_v21, 6  ;;  %v10282_v52 = vld [vmem:[#allocation33_spill] sm:$0xff] }
 0x211   : > { %v2125_v27 = vrot.slane %v2079_v60, 1  ;;  %v2126_v25 = vrot.slane %v2081_v24, 1  ;;  %v2233_v4 = vmax.f32 %v10278_v55, %v2124_v18  ;;  %v2234_v0 = vmax.f32 %v10279_v6, %v2079_v60 }
 0x212   : > { %v2236_v39 = vmax.f32 %v10280_v46, %v2081_v24  ;;  %v2384_v9 = vperm.slane %v2232_v45, 0  ;;  %v2385_v21 = vperm.slane %v2232_v45, 2  ;;  %v2127_v18 = vrot.slane %v2083_v35, 1 }
 0x213   : > { %v2235_v17 = vmax.f32 %v10281_v19, %v2125_v27  ;;  %v2237_v10 = vmax.f32 %v10282_v52, %v2126_v25  ;;  %v2386_v29 = vperm.slane %v2233_v4, 0  ;;  %v2387_v5 = vperm.slane %v2233_v4, 2  ;;  %v10284_v4 = vld [vmem:[#allocation35_spill] sm:$0xff] }
 0x214   : > { %v2388_v41 = vperm.slane %v2234_v0, 0  ;;  %v2389_v43 = vperm.slane %v2234_v0, 2  ;;  %v8654_v46 = vsel %vm462_vm2, %v2711_v26, %v2712_v47  ;;  %v2392_v25 = vperm.slane %v2236_v39, 0  ;;  %v10283_v26 = vld [vmem:[#allocation34_spill] sm:$0xff] }
 0x215   : > { %v6847_v37 = vpop.permute.xlu2 %6846  ;;  %v2390_v55 = vperm.slane %v2235_v17, 0  ;;  %v2500_v60 = vsel %vm1858_vm8, %v2386_v29, %v2384_v9  ;;  %v2391_v24 = vperm.slane %v2235_v17, 2  ;;  %v2506_v6 = vsel %vm1858_vm8, %v2387_v5, %v2385_v21 }
 0x216   : > { %v6849_v27 = vunpack.i.h.bf16 %v6847_v37  ;;  %v6848_v19 = vunpack.i.l.bf16 %v6847_v37  ;;  %v2501_v52 = vsel %vm1860_vm9, %v2388_v41, %v2500_v60  ;;  %v2394_v51 = vperm.slane %v2237_v10, 0 }
 0x217   : > { %v2502_v9 = vsel %vm1862_vm10, %v2390_v55, %v2501_v52  ;;  %v2507_v47 = vsel %vm1860_vm9, %v2389_v43, %v2506_v6  ;;  %v2238_v17 = vmax.f32 %v10283_v26, %v2083_v35  ;;  %v2393_v29 = vperm.slane %v2236_v39, 2 }
 0x218   : > { %v2037_v0 = vsel %vm2007_vm14, %v6849_v27, %v6848_v19  ;;  %v2503_v37 = vsel %vm1864_vm11, %v2392_v25, %v2502_v9  ;;  %v2013_v21 = vsel %vm2007_vm14, %v6848_v19, %v6849_v27  ;;  %v2508_v60 = vsel %vm1862_vm10, %v2391_v24, %v2507_v47 }
 0x219   : > { %v2053_v5 = vrot.slane %v2037_v0, 6  ;;  %v2504_v41 = vsel %vm1866_vm12, %v2394_v51, %v2503_v37  ;;  %v2239_v45 = vmax.f32 %v10284_v4, %v2127_v18  ;;  %v2396_v19 = vperm.slane %v2238_v17, 0 }
 0x21a   : > { %v2395_v51 = vperm.slane %v2237_v10, 2  ;;  %v2509_v24 = vsel %vm1864_vm11, %v2393_v29, %v2508_v60  ;;  %v2397_v9 = vperm.slane %v2238_v17, 2 }
 0x21b   : > { %v2091_v33 = vsel %vm1229_vm4, %v2013_v21, %v2053_v5  ;;  %v2092_v55 = vsel %vm1231_vm5, %v2013_v21, %v2053_v5  ;;  %v2094_v43 = vsel %vm1234_vm6, %v2013_v21, %v2053_v5  ;;  %v2096_v35 = vsel %vm833_vm3, %v2053_v5, %v2013_v21 }
 0x21c   : > { %v2093_v39 = vrot.slane %v2092_v55, 2  ;;  %v2095_v6 = vrot.slane %v2094_v43, 4  ;;  %v2097_v52 = vrot.slane %v2096_v35, 6  ;;  %v2132_v25 = vrot.slane %v2091_v33, 1 }
 0x21d   : > { %v2248_v27 = vmax.f32 %v8094_v42, %v2091_v33  ;;  %v2505_v26 = vsel %vm1868_vm13, %v2396_v19, %v2504_v41  ;;  %v10285_v5 = vperm.slane %v8596_v61, 0  ;;  %v2411_v42 = vperm.slane %v8618_v20, 2 }
 0x21e   : > { %v2133_v0 = vrot.slane %v2093_v39, 1  ;;  %v2134_v18 = vrot.slane %v2095_v6, 1  ;;  %v2249_v4 = vmax.f32 %v8100_v22, %v2132_v25  ;;  %v2250_v47 = vmax.f32 %v8102_v59, %v2093_v39 }
 0x21f   : > { %v2513_v37 = vsel %vm1860_vm9, %v10285_v5, %v8638_v2  ;;  %v2135_v33 = vrot.slane %v2097_v52, 1  ;;  %v2510_v29 = vsel %vm1866_vm12, %v2395_v51, %v2509_v24  ;;  %v2398_v21 = vperm.slane %v2239_v45, 0 }
 0x220   : > { %v2418_v10 = vperm.slane %v2249_v4, 0  ;;  %v2251_v60 = vmax.f32 %v8104_v63, %v2133_v0  ;;  %v2252_v22 = vmax.f32 %v8153_v11, %v2095_v6  ;;  %v2254_v59 = vmax.f32 %v8223_v38, %v2097_v52 }
 0x221   : > { %v2416_v17 = vperm.slane %v2248_v27, 0  ;;  %v2253_v41 = vmax.f32 %v8160_v31, %v2134_v18  ;;  %v2417_v55 = vperm.slane %v2248_v27, 2  ;;  %v2419_v43 = vperm.slane %v2249_v4, 2 }
 0x222   : > { %v2420_v35 = vperm.slane %v2250_v47, 0  ;;  %v2421_v2 = vperm.slane %v2250_v47, 2  ;;  %v8689_v39 = vpack.c.bf16 %v2505_v26, %v8567_v3  ;;  %v2511_v25 = vsel %vm1868_vm13, %v2397_v9, %v2510_v29 }
 0x223   : > { %v8693_v19 = vsel %vm385_vm0, 0.0, %v2505_v26  ;;  %v2524_v63 = vsel %vm1858_vm8, %v2418_v10, %v2416_v17  ;;  %v8697_v11 = vpack.c.bf16 %v2511_v25, %v8593_v12  ;;  %v8700_v38 = vsel %vm385_vm0, %v2398_v21, 0.0 }
 0x224   : > { %10286 = vst [vmem:[#allocation15_spill] sm:$0xff] %v8689_v39  ;;  %v2714_v31 = vrot.slane %v8693_v19, 1  ;;  %v2422_v6 = vperm.slane %v2251_v60, 0  ;;  %6018 = vmatmul.msk.bf16.gmra.mxu0 %vm8481_vm1, %v8689_v39  ;;  %v2715_v3 = vrot.slane %v8700_v38, 1  ;;  %v2399_v52 = vperm.slane %v2239_v45, 2 }
 0x225   : > { %10287 = vst [vmem:[#allocation17_spill] sm:$0xff] %v8697_v11  ;;  %v8708_v27 = vsel %vm385_vm0, 0.0, %v2511_v25  ;;  %v2423_v51 = vperm.slane %v2251_v60, 2  ;;  %v2424_v24 = vperm.slane %v2252_v22, 0  ;;  %v2425_v12 = vperm.slane %v2252_v22, 2  ;;  %6038 = vmatmul.msk.bf16.gmra.mxu1 %vm8481_vm1, %v8697_v11 }
 0x226   : > { %v2717_v0 = vrot.slane %v8708_v27, 1  ;;  %v2716_v18 = vsel %vm462_vm2, %v2714_v31, %v2715_v3  ;;  %v8716_v4 = vsel %vm385_vm0, %v2399_v52, 0.0  ;;  %v10288_v9 = vperm.slane %v8604_v36, 0  ;;  %v6685_v11 = vld [vmem:[#allocation2 + $0x274] sm:$0xf0] }
 0x227   : > { %v2525_v47 = vsel %vm1860_vm9, %v2420_v35, %v2524_v63  ;;  %v2530_v26 = vsel %vm1858_vm8, %v2419_v43, %v2417_v55  ;;  %v8724_v5 = vpack.c.bf16 %v2716_v18, %v8615_v13  ;;  %v2718_v10 = vrot.slane %v8716_v4, 1  ;;  %v6211_v39 = vld [vmem:[#allocation2 + $0x2f0] sm:$0xf] }
 0x228   : > { %v2514_v45 = vsel %vm1862_vm10, %v10288_v9, %v2513_v37  ;;  %v10290_v29 = vperm.slane %v8599_v7, 0  ;;  %v2426_v60 = vperm.slane %v2253_v41, 0  ;;  %v2428_v22 = vperm.slane %v2254_v59, 0 }
 0x229   : > { %10289 = vst [vmem:[#allocation18_spill] sm:$0xff] %v8724_v5  ;;  %v10291_v17 = vperm.slane %v8618_v20, 0  ;;  %v2526_v37 = vsel %vm1862_vm10, %v2422_v6, %v2525_v47  ;;  %2974 = vmatmul.bf16.gmra.mxu2 %v8724_v5  ;;  %v2719_v55 = vsel %vm462_vm2, %v2717_v0, %v2718_v10  ;;  %v10292_v13 = vperm.slane %v8612_v28, 0 }
 0x22a   : > { %v2515_v21 = vsel %vm1864_vm11, %v10290_v29, %v2514_v45  ;;  %v2527_v35 = vsel %vm1864_vm11, %v2424_v24, %v2526_v37  ;;  %v2427_v63 = vperm.slane %v2253_v41, 2  ;;  %v8741_v31 = vpack.c.bf16 %v2719_v55, %v8654_v46  ;;  %v10296_v46 = vld [vmem:[#allocation36_spill] sm:$0xff] }
 0x22b   : > { %v2516_v25 = vsel %vm1866_vm12, %v10291_v17, %v2515_v21  ;;  %v2528_v3 = vsel %vm1866_vm12, %v2426_v60, %v2527_v35  ;;  %v10294_v52 = vperm.slane %v8596_v61, 2  ;;  %v2531_v18 = vsel %vm1860_vm9, %v2421_v2, %v2530_v26  ;;  %v5813_v35 = vld [vmem:[#allocation2 + $0x178] sm:$0xf0] }
 0x22c   : > { %v2517_v43 = vsel %vm1868_vm13, %v10292_v13, %v2516_v25  ;;  %10293 = vst [vmem:[#allocation19_spill] sm:$0xff] %v8741_v31  ;;  %v2529_v0 = vsel %vm1868_vm13, %v2428_v22, %v2528_v3  ;;  %v10295_v9 = vperm.slane %v8604_v36, 2  ;;  %v2532_v41 = vsel %vm1862_vm10, %v2423_v51, %v2531_v18  ;;  %3003 = vmatmul.bf16.gmra.mxu3 %v8741_v31  ;;  %v6652_v13 = vld [vmem:[#allocation2 + $0x174] sm:$0xf]  ;;  %v5877_v3 = vld [vmem:[#allocation2 + $0x1f8] sm:$0xf0] }
 0x22d   : > { %v2519_v6 = vsel %vm1860_vm9, %v10294_v52, %v8641_v14  ;;  %v2247_v24 = vmax.f32 %v10296_v46, %v8609_v48  ;;  %v2429_v47 = vperm.slane %v2254_v59, 2  ;;  %v10297_v61 = vperm.slane %v8599_v7, 2  ;;  %v6701_v31 = vld [vmem:[#allocation2 + $0x2f4] sm:$0xf0] }
 0x22e   : > { %v2520_v45 = vsel %vm1862_vm10, %v10295_v9, %v2519_v6  ;;  %v2533_v2 = vsel %vm1864_vm11, %v2425_v12, %v2532_v41  ;;  %v2255_v26 = vmax.f32 %v8232_v40, %v2135_v33  ;;  %v2413_v36 = vperm.slane %v8612_v28, 2  ;;  %v8800_v9 = vld [vmem:[#allocation2 + $0x168] sm:$0xf0] }
 0x22f   : > { %v2521_v14 = vsel %vm1864_vm11, %v10297_v61, %v2520_v45  ;;  %v2534_v10 = vsel %vm1866_vm12, %v2427_v63, %v2533_v2  ;;  %v2414_v48 = vperm.slane %v2247_v24, 0  ;;  %v8769_v7 = vsel %vm385_vm0, 0.0, %v2517_v43  ;;  %v6668_v63 = vld [vmem:[#allocation2 + $0x1f4] sm:$0xf]  ;;  %v8810_v61 = vld [vmem:[#allocation2 + $0x1e8] sm:$0xf0] }
 0x230   : > { %v2522_v51 = vsel %vm1866_vm12, %v2411_v42, %v2521_v14  ;;  %v2535_v29 = vsel %vm1868_vm13, %v2429_v47, %v2534_v10  ;;  %v2430_v59 = vperm.slane %v2255_v26, 0  ;;  %v8772_v21 = vsel %vm385_vm0, 0.0, %v2529_v0  ;;  %v8808_v47 = vld [vmem:[#allocation2 + $0x1e4] sm:$0xf]  ;;  %v8812_v14 = vld [vmem:[#allocation2 + $0x154] sm:$0xf] }
 0x231   : > { %v2523_v28 = vsel %vm1868_vm13, %v2413_v36, %v2522_v51  ;;  %v8777_v20 = vsel %vm385_vm0, %v2414_v48, 0.0  ;;  %v2726_v42 = vrot.slane %v8772_v21, 1  ;;  %v8782_v60 = vpack.c.bf16 %v2529_v0, %v2517_v43  ;;  %v8798_v0 = vld [vmem:[#allocation2 + $0x164] sm:$0xf]  ;;  %v8814_v2 = vld [vmem:[#allocation2 + $0x158] sm:$0xf0] }
 0x232   : > { %v8785_v22 = vsel %vm385_vm0, %v2430_v59, 0.0  ;;  %v8787_v17 = vpack.c.bf16 %v2535_v29, %v2523_v28  ;;  %v2720_v25 = vrot.slane %v8769_v7, 1  ;;  %v2415_v55 = vperm.slane %v2247_v24, 2  ;;  %v8823_v51 = vld [vmem:[#allocation2 + $0x1d4] sm:$0xf] }
 0x233   : > { %10298 = vst [vmem:[#allocation20_spill] sm:$0xff] %v8782_v60  ;;  %v2727_v37 = vrot.slane %v8785_v22, 1  ;;  %v2721_v52 = vrot.slane %v8777_v20, 1  ;;  %v2431_v6 = vperm.slane %v2255_v26, 2  ;;  %v8793_v43 = vsel %vm385_vm0, 0.0, %v2523_v28 }
 0x234   : > { %10299 = vst [vmem:[#allocation21_spill] sm:$0xff] %v8787_v17  ;;  %v8796_v18 = vsel %vm385_vm0, 0.0, %v2535_v29  ;;  %v8804_v41 = vsel %vm385_vm0, %v2415_v55, 0.0  ;;  %v2723_v46 = vrot.slane %v8793_v43, 1  ;;  %6023 = vmatmul.msk.bf16.gmra.mxu0 %vm8481_vm1, %v8782_v60  ;;  %v8825_v10 = vld [vmem:[#allocation2 + $0x1d8] sm:$0xf0]  ;;  %v5816_v12 = vor.u32 %v6652_v13, %v5813_v35 }
 0x235   : > { %10300 = vst [vmem:[#allocation22_spill] sm:$0xff] %v8796_v18  ;;  %v2728_v45 = vsel %vm462_vm2, %v2726_v42, %v2727_v37  ;;  %v2729_v24 = vrot.slane %v8796_v18, 1  ;;  %v8820_v26 = vsel %vm385_vm0, %v2431_v6, 0.0  ;;  %v2724_v36 = vrot.slane %v8804_v41, 1  ;;  %v8827_v48 = vld [vmem:[#allocation2 + $0x144] sm:$0xf]  ;;  %6043 = vmatmul.msk.bf16.gmra.mxu1 %vm8481_vm1, %v8787_v17 }
 0x236   : > { %10301 = vst [vmem:[#allocation24_spill] sm:$0xff] %v8820_v26  ;;  %v8829_v29 = vld [vmem:[#allocation2 + $0x148] sm:$0xf0]  ;;  %v2722_v28 = vsel %vm462_vm2, %v2720_v25, %v2721_v52  ;;  %v2730_v42 = vrot.slane %v8820_v26, 1  ;;  %v8837_v37 = vld [vmem:[#allocation2 + $0x1c4] sm:$0xf]  ;;  %v5880_v60 = vor.u32 %v6668_v63, %v5877_v3  ;;  %v5808_v5 = vor.u32 %v8798_v0, %v8800_v9  ;;  %3019 = vmatpush.bf16.msra.mxu2 %v5816_v12 }
 0x237   : > { %v8839_v55 = vld [vmem:[#allocation2 + $0x1c8] sm:$0xf0]  ;;  %v6147_v6 = vld [vmem:[#allocation2 + $0x270] sm:$0xf]  ;;  %v8841_v40 = vpack.c.bf16 %v2728_v45, %v2722_v28  ;;  %v2725_v33 = vsel %vm462_vm2, %v2723_v46, %v2724_v36  ;;  %v8847_v26 = vld [vmem:[#allocation2 + $0x134] sm:$0xf]  ;;  %v5872_v13 = vor.u32 %v8808_v47, %v8810_v61  ;;  %v5800_v35 = vor.u32 %v8812_v14, %v8814_v2 }
 0x238   : > { %v2731_v17 = vsel %vm462_vm2, %v2729_v24, %v2730_v42  ;;  %v8849_v18 = vld [vmem:[#allocation2 + $0x138] sm:$0xf0]  ;;  %v8851_v45 = vld [vmem:[#allocation2 + $0x1b4] sm:$0xf]  ;;  %3048 = vmatpush.bf16.msra.mxu3 %v5880_v60  ;;  %v8861_v3 = vld [vmem:[#allocation2 + $0x260] sm:$0xf]  ;;  %v5864_v12 = vor.u32 %v8823_v51, %v8825_v10  ;;  %v6148_v14 = vor.u32 %v6685_v11, %v6147_v6  ;;  %v6212_v2 = vor.u32 %v6701_v31, %v6211_v39 }
 0x239   : > { %10302 = vst [vmem:[#allocation31_spill] sm:$0xff] %v8841_v40  ;;  %v8853_v46 = vpack.c.bf16 %v2731_v17, %v2725_v33  ;;  %v8859_v63 = vld [vmem:[#allocation2 + $0x1b8] sm:$0xf0]  ;;  %v8863_v0 = vld [vmem:[#allocation2 + $0x264] sm:$0xf0]  ;;  %2979 = vmatmul.bf16.gmra.mxu2 %v8841_v40 }
 0x23a   : > { %v6203_v17 = vld [vmem:[#allocation2 + $0x2e0] sm:$0xf]  ;;  %v6699_v24 = vld [vmem:[#allocation2 + $0x2e4] sm:$0xf0]  ;;  %v8874_v36 = vld [vmem:[#allocation2 + $0x250] sm:$0xf]  ;;  %v6140_v51 = vor.u32 %v8863_v0, %v8861_v3  ;;  %3020 = vmatpush.bf16.msra.mxu2 %v5808_v5  ;;  %3618 = vmatpush.bf16.msrb.mxu0 %v6148_v14 }
 0x23b   : > { %10303 = vst [vmem:[#allocation23_spill] sm:$0xff] %v8853_v46  ;;  %v6204_v10 = vor.u32 %v6699_v24, %v6203_v17  ;;  %v8882_v42 = vld [vmem:[#allocation2 + $0x254] sm:$0xf0]  ;;  %v8895_v3 = vld [vmem:[#allocation2 + $0x128] sm:$0xf0]  ;;  %3647 = vmatpush.bf16.msrb.mxu1 %v6212_v2 }
 0x23c   : > { %v6852_v59 = vpop.permute.xlu0 %6851  ;;  %3008 = vmatmul.bf16.gmra.mxu3 %v8853_v46  ;;  %v6132_v60 = vor.u32 %v8882_v42, %v8874_v36  ;;  %v8915_v2 = vld [vmem:[#allocation2 + $0x1a4] sm:$0xf]  ;;  %v8917_v36 = vld [vmem:[#allocation2 + $0x1a8] sm:$0xf0]  ;;  %v6123_v42 = vld [vmem:[#allocation2 + $0x240] sm:$0xf] }
 0x23d   : > { %v6854_v25 = vunpack.i.h.bf16 %v6852_v59  ;;  %v6853_v52 = vunpack.i.l.bf16 %v6852_v59  ;;  %3049 = vmatpush.bf16.msra.mxu3 %v5872_v13  ;;  %v6695_v59 = vld [vmem:[#allocation2 + $0x2c4] sm:$0xf0] }
 0x23e   : > { %3021 = vmatpush.bf16.msra.mxu2 %v5800_v35  ;;  %3619 = vmatpush.bf16.msrb.mxu0 %v6140_v51  ;;  %v10306_v51 = vor.u32 %v8837_v37, %v8839_v55 }
 0x23f   : > { %v2014_v9 = vsel %vm2007_vm14, %v6853_v52, %v6854_v25  ;;  %v2038_v33 = vsel %vm2007_vm14, %v6854_v25, %v6853_v52  ;;  %v8884_v25 = vld [vmem:[#allocation2 + $0x2d0] sm:$0xf]  ;;  %v8886_v52 = vld [vmem:[#allocation2 + $0x2d4] sm:$0xf0]  ;;  %3648 = vmatpush.bf16.msrb.mxu1 %v6204_v10  ;;  %v5840_v10 = vor.u32 %v8915_v2, %v8917_v36 }
 0x240   : > { %v2054_v47 = vrot.slane %v2038_v33, 6  ;;  %v8893_v33 = vld [vmem:[#allocation2 + $0x124] sm:$0xf] }
 0x241   : > { %3050 = vmatpush.bf16.msra.mxu3 %v5864_v12 }
 0x242   : > { %v2098_v39 = vsel %vm1229_vm4, %v2014_v9, %v2054_v47  ;;  %v2099_v11 = vsel %vm1231_vm5, %v2014_v9, %v2054_v47  ;;  %v2101_v31 = vsel %vm1234_vm6, %v2014_v9, %v2054_v47  ;;  %v2103_v6 = vsel %vm833_vm3, %v2054_v47, %v2014_v9  ;;  %3620 = vmatpush.bf16.msrb.mxu0 %v6132_v60  ;;  %v6179_v60 = vld [vmem:[#allocation2 + $0x2b0] sm:$0xf] }
 0x243   : > { %v2100_v0 = vrot.slane %v2099_v11, 2  ;;  %v2102_v17 = vrot.slane %v2101_v31, 4  ;;  %v2104_v24 = vrot.slane %v2103_v6, 6  ;;  %v2136_v28 = vrot.slane %v2098_v39, 1  ;;  %v6187_v6 = vld [vmem:[#allocation2 + $0x2c0] sm:$0xf] }
 0x244   : > { %v2256_v61 = vmax.f32 %v8188_v1, %v2098_v39  ;;  %v6196_v9 = vor.u32 %v8886_v52, %v8884_v25 }
 0x245   : > { %v2137_v47 = vrot.slane %v2100_v0, 1  ;;  %v2138_v46 = vrot.slane %v2102_v17, 1  ;;  %v2257_v11 = vmax.f32 %v8194_v57, %v2136_v28  ;;  %v8906_v13 = vrot.slane %v2104_v24, 1  ;;  %v10304_v28 = vld [vmem:[#allocation37_spill] sm:$0xff]  ;;  %3051 = vmatpush.bf16.msra.mxu3 %v10306_v51 }
 0x246   : > { %v2258_v31 = vmax.f32 %v8196_v50, %v2100_v0  ;;  %v8910_v1 = vmax.f32 %v8250_v53, %v2102_v17  ;;  %v8913_v14 = vmax.f32 %v8257_v16, %v2104_v24  ;;  %v2432_v52 = vperm.slane %v2256_v61, 0  ;;  %v6857_v50 = vpop.permute.xlu1 %6856  ;;  %v6679_v53 = vld [vmem:[#allocation2 + $0x244] sm:$0xf0]  ;;  %3649 = vmatpush.bf16.msrb.mxu1 %v6196_v9  ;;  %v6693_v9 = vld [vmem:[#allocation2 + $0x2b4] sm:$0xf0] }
 0x247   : > { %v2259_v57 = vmax.f32 %v8198_v49, %v2137_v47  ;;  %v8921_v25 = vmax.f32 %v10304_v28, %v2138_v46  ;;  %v2434_v39 = vperm.slane %v2257_v11, 0  ;;  %v2433_v0 = vperm.slane %v2256_v61, 2 }
 0x248   : > { %v2435_v16 = vperm.slane %v2257_v11, 2  ;;  %v2436_v17 = vperm.slane %v2258_v31, 0  ;;  %v2437_v24 = vperm.slane %v2258_v31, 2  ;;  %v2440_v49 = vperm.slane %v8910_v1, 0 }
 0x249   : > { %v2438_v5 = vperm.slane %v2259_v57, 0  ;;  %v2439_v40 = vperm.slane %v2259_v57, 2  ;;  %v2536_v46 = vsel %vm1858_vm8, %v2434_v39, %v2432_v52  ;;  %v2441_v47 = vperm.slane %v8910_v1, 2  ;;  %v6115_v1 = vld [vmem:[#allocation2 + $0x230] sm:$0xf] }
 0x24a   : > { %v2542_v35 = vsel %vm1858_vm8, %v2435_v16, %v2433_v0  ;;  %v6859_v12 = vunpack.i.h.bf16 %v6857_v50  ;;  %v6858_v28 = vunpack.i.l.bf16 %v6857_v50  ;;  %v10305_v61 = vor.u32 %v8827_v48, %v8829_v29  ;;  %v6677_v52 = vld [vmem:[#allocation2 + $0x234] sm:$0xf0] }
 0x24b   : > { %v6124_v11 = vor.u32 %v6679_v53, %v6123_v42  ;;  %v6188_v31 = vor.u32 %v6695_v59, %v6187_v6  ;;  %v2442_v57 = vperm.slane %v8921_v25, 0  ;;  %v2444_v48 = vperm.slane %v8913_v14, 0 }
 0x24c   : > { %3022 = vmatpush.bf16.msra.mxu2 %v10305_v61  ;;  %v2015_v39 = vsel %vm2007_vm14, %v6858_v28, %v6859_v12  ;;  %v2039_v50 = vsel %vm2007_vm14, %v6859_v12, %v6858_v28  ;;  %v2537_v29 = vsel %vm1860_vm9, %v2436_v17, %v2536_v46  ;;  %v2443_v2 = vperm.slane %v8921_v25, 2 }
 0x24d   : > { %v2055_v37 = vrot.slane %v2039_v50, 6  ;;  %v2538_v55 = vsel %vm1862_vm10, %v2438_v5, %v2537_v29  ;;  %v2543_v59 = vsel %vm1860_vm9, %v2437_v24, %v2542_v35  ;;  %v2445_v42 = vperm.slane %v8913_v14, 2  ;;  %3621 = vmatpush.bf16.msrb.mxu0 %v6124_v11  ;;  %3650 = vmatpush.bf16.msrb.mxu1 %v6188_v31 }
 0x24e   : > { %v2539_v36 = vsel %vm1864_vm11, %v2440_v49, %v2538_v55  ;;  %v2544_v53 = vsel %vm1862_vm10, %v2439_v40, %v2543_v59  ;;  %v6116_v6 = vor.u32 %v6677_v52, %v6115_v1  ;;  %v10307_v25 = vor.u32 %v8847_v26, %v8849_v18  ;;  %v10309_v52 = vld [vmem:[#allocation39_spill] sm:$0xff] }
 0x24f   : > { %v2105_v0 = vsel %vm1229_vm4, %v2015_v39, %v2055_v37  ;;  %v2106_v16 = vsel %vm1231_vm5, %v2015_v39, %v2055_v37  ;;  %v2108_v17 = vsel %vm1234_vm6, %v2015_v39, %v2055_v37  ;;  %v2110_v5 = vsel %vm833_vm3, %v2055_v37, %v2015_v39  ;;  %v10314_v37 = vld [vmem:[#allocation41_spill] sm:$0xff] }
 0x250   : > { %3023 = vmatpush.bf16.msra.mxu2 %v10307_v25  ;;  %v2107_v24 = vrot.slane %v2106_v16, 2  ;;  %v2109_v49 = vrot.slane %v2108_v17, 4  ;;  %v2111_v46 = vrot.slane %v2110_v5, 6  ;;  %v2140_v35 = vrot.slane %v2105_v0, 1 }
 0x251   : > { %v10308_v40 = vor.u32 %v8851_v45, %v8859_v63  ;;  %v2264_v12 = vmax.f32 %v8287_v30, %v2105_v0  ;;  %v2540_v28 = vsel %vm1866_vm12, %v2442_v57, %v2539_v36  ;;  %v2545_v61 = vsel %vm1864_vm11, %v2441_v47, %v2544_v53  ;;  %v10310_v63 = vld [vmem:[#allocation40_spill] sm:$0xff]  ;;  %v10311_v30 = vld [vmem:[#allocation42_spill] sm:$0xff]  ;;  %3622 = vmatpush.bf16.msrb.mxu0 %v6116_v6 }
 0x252   : > { %v6180_v51 = vor.u32 %v6693_v9, %v6179_v60  ;;  %v2141_v1 = vrot.slane %v2107_v24, 1  ;;  %v2142_v18 = vrot.slane %v2109_v49, 1  ;;  %v2265_v26 = vmax.f32 %v8293_v56, %v2140_v35  ;;  %v10313_v47 = vld [vmem:[#allocation38_spill] sm:$0xff] }
 0x253   : > { %3052 = vmatpush.bf16.msra.mxu3 %v10308_v40  ;;  %v8962_v39 = vmax.f32 %v10309_v52, %v8906_v13  ;;  %v2143_v50 = vrot.slane %v2111_v46, 1  ;;  %v2266_v45 = vmax.f32 %v8295_v44, %v2107_v24  ;;  %v2268_v11 = vmax.f32 %v10310_v63, %v2109_v49  ;;  %v10315_v40 = vld [vmem:[#allocation43_spill] sm:$0xff] }
 0x254   : > { %v2270_v31 = vmax.f32 %v10311_v30, %v2111_v46  ;;  %v10312_v57 = vor.u32 %v8893_v33, %v8895_v3  ;;  %v2267_v29 = vmax.f32 %v10313_v47, %v2141_v1  ;;  %v2269_v55 = vmax.f32 %v10314_v37, %v2142_v18  ;;  %3651 = vmatpush.bf16.msrb.mxu1 %v6180_v51 }
 0x255   : > { %v2448_v56 = vperm.slane %v2264_v12, 0  ;;  %v2450_v59 = vperm.slane %v2265_v26, 0  ;;  %v2449_v13 = vperm.slane %v2264_v12, 2  ;;  %v2451_v36 = vperm.slane %v2265_v26, 2 }
 0x256   : > { %3024 = vmatpush.bf16.msra.mxu2 %v10312_v57  ;;  %v2452_v53 = vperm.slane %v2266_v45, 0  ;;  %v2453_v44 = vperm.slane %v2266_v45, 2  ;;  %v2454_v60 = vperm.slane %v2267_v29, 0  ;;  %v2455_v9 = vperm.slane %v2267_v29, 2 }
 0x257   : > { %3053 = vmatpush.bf16.msra.mxu3 %v5840_v10  ;;  %v2456_v0 = vperm.slane %v2268_v11, 0  ;;  %v2548_v16 = vsel %vm1858_vm8, %v2450_v59, %v2448_v56  ;;  %v2457_v33 = vperm.slane %v2268_v11, 2  ;;  %v2554_v3 = vsel %vm1858_vm8, %v2451_v36, %v2449_v13  ;;  %v6640_v56 = vld [vmem:[#allocation2 + $0x114] sm:$0xf]  ;;  %v5765_v59 = vld [vmem:[#allocation2 + $0x118] sm:$0xf0] }
 0x258   : > { %v2458_v17 = vperm.slane %v2269_v55, 0  ;;  %v2541_v5 = vsel %vm1868_vm13, %v2444_v48, %v2540_v28  ;;  %v2460_v25 = vperm.slane %v2270_v31, 0  ;;  %v2549_v10 = vsel %vm1860_vm9, %v2452_v53, %v2548_v16  ;;  %v6656_v13 = vld [vmem:[#allocation2 + $0x194] sm:$0xf]  ;;  %v5829_v36 = vld [vmem:[#allocation2 + $0x198] sm:$0xf0] }
 0x259   : > { %v2459_v6 = vperm.slane %v2269_v55, 2  ;;  %v2546_v24 = vsel %vm1866_vm12, %v2443_v2, %v2545_v61  ;;  %v2550_v49 = vsel %vm1862_vm10, %v2454_v60, %v2549_v10  ;;  %v2461_v46 = vperm.slane %v2270_v31, 2  ;;  %v6107_v53 = vld [vmem:[#allocation2 + $0x220] sm:$0xf]  ;;  %v6675_v16 = vld [vmem:[#allocation2 + $0x224] sm:$0xf0] }
 0x25a   : > { %v2555_v35 = vsel %vm1860_vm9, %v2453_v44, %v2554_v3  ;;  %v2271_v12 = vmax.f32 %v10315_v40, %v2143_v50  ;;  %v2551_v51 = vsel %vm1864_vm11, %v2456_v0, %v2550_v49  ;;  %v2446_v18 = vperm.slane %v8962_v39, 0  ;;  %v6638_v49 = vld [vmem:[#allocation2 + $0x104] sm:$0xf] }
 0x25b   : > { %v2556_v1 = vsel %vm1862_vm10, %v2455_v9, %v2555_v35  ;;  %v8984_v48 = vsel %vm385_vm0, 0.0, %v2541_v5  ;;  %v2552_v28 = vsel %vm1866_vm12, %v2458_v17, %v2551_v51  ;;  %v2547_v2 = vsel %vm1868_vm13, %v2445_v42, %v2546_v24  ;;  %v6099_v24 = vld [vmem:[#allocation2 + $0x210] sm:$0xf]  ;;  %v5821_v51 = vld [vmem:[#allocation2 + $0x188] sm:$0xf0] }
 0x25c   : > { %v2557_v61 = vsel %vm1864_vm11, %v2457_v33, %v2556_v1  ;;  %v2462_v26 = vperm.slane %v2271_v12, 0  ;;  %v2553_v52 = vsel %vm1868_vm13, %v2460_v25, %v2552_v28  ;;  %v8994_v45 = vsel %vm385_vm0, %v2446_v18, 0.0  ;;  %v6171_v33 = vld [vmem:[#allocation2 + $0x2a0] sm:$0xf]  ;;  %v6691_v25 = vld [vmem:[#allocation2 + $0x2a4] sm:$0xf0] }
 0x25d   : > { %v2558_v50 = vsel %vm1866_vm12, %v2459_v6, %v2557_v61  ;;  %v2732_v63 = vrot.slane %v8984_v48, 1  ;;  %v8997_v11 = vpack.c.bf16 %v2553_v52, %v2541_v5  ;;  %v9001_v14 = vsel %vm385_vm0, 0.0, %v2553_v52  ;;  %v6163_v61 = vld [vmem:[#allocation2 + $0x290] sm:$0xf] }
 0x25e   : > { %v2559_v30 = vsel %vm1868_vm13, %v2461_v46, %v2558_v50  ;;  %v9004_v42 = vsel %vm385_vm0, %v2462_v26, 0.0  ;;  %v2733_v57 = vrot.slane %v8994_v45, 1  ;;  %v2738_v47 = vrot.slane %v9001_v14, 1  ;;  %v5757_v46 = vld [vmem:[#allocation2 + $0x108] sm:$0xf0] }
 0x25f   : > { %v9006_v31 = vpack.c.bf16 %v2559_v30, %v2547_v2  ;;  %v2739_v29 = vrot.slane %v9004_v42, 1  ;;  %v3377_v37 = vrot.slane %v8769_v7, 2  ;;  %6028 = vmatmul.msk.bf16.gmra.mxu0 %vm8481_vm1, %v8997_v11  ;;  %v2447_v55 = vperm.slane %v8962_v39, 2  ;;  %v6689_v26 = vld [vmem:[#allocation2 + $0x294] sm:$0xf0] }
 0x260   : > { %v2734_v44 = vsel %vm462_vm2, %v2732_v63, %v2733_v57  ;;  %v2463_v9 = vperm.slane %v2271_v12, 2  ;;  %v9022_v0 = vsel %vm385_vm0, 0.0, %v2547_v2  ;;  %v9027_v3 = vsel %vm385_vm0, 0.0, %v2559_v30  ;;  %v6654_v12 = vld [vmem:[#allocation2 + $0x184] sm:$0xf] }
 0x261   : > { %6048 = vmatmul.msk.bf16.gmra.mxu1 %vm8481_vm1, %v9006_v31  ;;  %v2740_v60 = vsel %vm462_vm2, %v2738_v47, %v2739_v29  ;;  %v9030_v17 = vsel %vm385_vm0, %v2447_v55, 0.0  ;;  %v2735_v5 = vrot.slane %v9022_v0, 1  ;;  %v2741_v6 = vrot.slane %v9027_v3, 1  ;;  %v6673_v2 = vld [vmem:[#allocation2 + $0x214] sm:$0xf0] }
 0x262   : > { %v9024_v39 = vpack.c.bf16 %v2740_v60, %v2734_v44  ;;  %v9034_v10 = vsel %vm385_vm0, %v2463_v9, 0.0  ;;  %v2736_v35 = vrot.slane %v9030_v17, 1  ;;  %v5768_v1 = vor.u32 %v6640_v56, %v5765_v59  ;;  %v6091_v30 = vld [vmem:[#allocation2 + $0x200] sm:$0xf]  ;;  %v6620_v57 = vld [vmem:[#allocation2 + $0x74] sm:$0xf] }
 0x263   : > { %v2742_v40 = vrot.slane %v9034_v10, 1  ;;  %v5832_v18 = vor.u32 %v6656_v13, %v5829_v36  ;;  %v6108_v28 = vor.u32 %v6675_v16, %v6107_v53  ;;  %v6172_v63 = vor.u32 %v6691_v25, %v6171_v33  ;;  %v5941_v47 = vld [vmem:[#allocation2 + $0x78] sm:$0xf0]  ;;  %v6671_v56 = vld [vmem:[#allocation2 + $0x204] sm:$0xf0] }
 0x264   : > { %2984 = vmatmul.bf16.gmra.mxu2 %v9024_v39  ;;  %v2737_v52 = vsel %vm462_vm2, %v2735_v5, %v2736_v35  ;;  %v5760_v55 = vor.u32 %v6638_v49, %v5757_v46  ;;  %v5824_v44 = vor.u32 %v6654_v12, %v5821_v51  ;;  %v6636_v59 = vld [vmem:[#allocation2 + $0xf4] sm:$0xf]  ;;  %v6005_v13 = vld [vmem:[#allocation2 + $0xf8] sm:$0xf0]  ;;  %v3383_v36 = vrot.slane %v8772_v21, 2 }
 0x265   : > { %v2743_v50 = vsel %vm462_vm2, %v2741_v6, %v2742_v40  ;;  %3025 = vmatpush.bf16.msra.mxu2 %v5768_v1  ;;  %3054 = vmatpush.bf16.msra.mxu3 %v5832_v18  ;;  %v6100_v53 = vor.u32 %v6673_v2, %v6099_v24  ;;  %v6164_v60 = vor.u32 %v6689_v26, %v6163_v61  ;;  %v10316_v9 = vrot.slane %v8487_v23, 2  ;;  %v6155_v5 = vld [vmem:[#allocation2 + $0x280] sm:$0xf]  ;;  %v6687_v25 = vld [vmem:[#allocation2 + $0x284] sm:$0xf0]  ;;  %v10321_v23 = vld [vmem:[#allocation9_spill] sm:$0xff] }
 0x266   : > { %v9042_v29 = vpack.c.bf16 %v2743_v50, %v2737_v52  ;;  %3623 = vmatpush.bf16.msrb.mxu0 %v6108_v28  ;;  %3652 = vmatpush.bf16.msrb.mxu1 %v6172_v63  ;;  %v10317_v16 = vrot.slane %v8497_v62, 2  ;;  %v10318_v49 = vrot.slane %v8490_v58, 2  ;;  %v10319_v21 = vrot.slane %v8478_v15, 2  ;;  %v6618_v12 = vld [vmem:[#allocation2 + $0x64] sm:$0xf] }
 0x267   : > { %v10320_v46 = vrot.slane %v8500_v32, 2  ;;  %v10322_v35 = vrot.slane %v10321_v23, 2  ;;  %v5944_v40 = vor.u32 %v6620_v57, %v5941_v47  ;;  %v6092_v51 = vor.u32 %v6671_v56, %v6091_v30  ;;  %v6634_v28 = vld [vmem:[#allocation2 + $0xe4] sm:$0xf]  ;;  %v5997_v2 = vld [vmem:[#allocation2 + $0xe8] sm:$0xf0] }
 0x268   : > { %v3361_v33 = vsel %vm833_vm3, %v10317_v16, %v10316_v9  ;;  %3013 = vmatmul.bf16.gmra.mxu3 %v9042_v29  ;;  %v3358_v24 = vsel %vm833_vm3, %v10319_v21, %v10318_v49  ;;  %v6008_v18 = vor.u32 %v6636_v59, %v6005_v13  ;;  %v3378_v58 = vrot.slane %v8777_v20, 2  ;;  %v10323_v15 = vld [vmem:[#allocation14_spill] sm:$0xff]  ;;  %v10325_v32 = vld [vmem:[#allocation13_spill] sm:$0xff]  ;;  %v10330_v47 = vld [vmem:[#allocation16_spill] sm:$0xff] }
 0x269   : > { %v9052_v6 = vpack.c.bf16 %v3361_v33, %v8540_v8  ;;  %v3364_v62 = vsel %vm833_vm3, %v10322_v35, %v10320_v46  ;;  %v5933_v8 = vld [vmem:[#allocation2 + $0x68] sm:$0xf0]  ;;  %3026 = vmatpush.bf16.msra.mxu2 %v5760_v55  ;;  %3055 = vmatpush.bf16.msra.mxu3 %v5824_v44  ;;  %v10324_v61 = vrot.slane %v10323_v15, 2  ;;  %v10326_v26 = vrot.slane %v10325_v32, 2  ;;  %v10334_v49 = vld [vmem:[#allocation22_spill] sm:$0xff] }
 0x26a   : > { %v9064_v1 = vpack.c.bf16 %v3364_v62, %v3358_v24  ;;  %v10327_v50 = vrot.slane %v8700_v38, 2  ;;  %v10328_v63 = vrot.slane %v8693_v19, 2  ;;  %v10329_v57 = vrot.slane %v8635_v34, 2  ;;  %3624 = vmatpush.bf16.msrb.mxu0 %v6100_v53  ;;  %3653 = vmatpush.bf16.msrb.mxu1 %v6164_v60  ;;  %v5925_v53 = vld [vmem:[#allocation2 + $0x58] sm:$0xf0]  ;;  %v10335_v24 = vld [vmem:[#allocation24_spill] sm:$0xff] }
 0x26b   : > { %v3367_v52 = vsel %vm833_vm3, %v10326_v26, %v10324_v61  ;;  %v10331_v56 = vrot.slane %v10330_v47, 2  ;;  %v3384_v55 = vrot.slane %v8785_v22, 2  ;;  %v6156_v44 = vor.u32 %v6687_v25, %v6155_v5  ;;  %v6616_v22 = vld [vmem:[#allocation2 + $0x54] sm:$0xf]  ;;  %v5989_v5 = vld [vmem:[#allocation2 + $0xd8] sm:$0xf0] }
 0x26c   : > { %v3373_v30 = vsel %vm833_vm3, %v10328_v63, %v10327_v50  ;;  %v10332_v13 = vrot.slane %v8716_v4, 2  ;;  %v10333_v38 = vrot.slane %v8708_v27, 2  ;;  %v3380_v9 = vrot.slane %v8793_v43, 2  ;;  %v6632_v60 = vld [vmem:[#allocation2 + $0xd4] sm:$0xf] }
 0x26d   : > { %v3370_v20 = vsel %vm833_vm3, %v10331_v56, %v10329_v57  ;;  %v9083_v59 = vpack.c.bf16 %v3373_v30, %v3367_v52  ;;  %3295 = vmatpush.bf16.msrb.mxu2 %v5944_v40  ;;  %3324 = vmatpush.bf16.msrb.mxu3 %v6008_v18  ;;  %v5936_v34 = vor.u32 %v6618_v12, %v5933_v8  ;;  %v3381_v25 = vrot.slane %v8804_v41, 2  ;;  %v6614_v62 = vld [vmem:[#allocation2 + $0x44] sm:$0xf]  ;;  %v10336_v12 = vld [vmem:[#allocation11_spill] sm:$0xff]  ;;  %v6628_v15 = vld [vmem:[#allocation2 + $0xb4] sm:$0xf] }
 0x26e   : > { %v3376_v19 = vsel %vm833_vm3, %v10333_v38, %v10332_v13  ;;  %v6000_v16 = vor.u32 %v6634_v28, %v5997_v2  ;;  %v3379_v4 = vsel %vm833_vm3, %v3377_v37, %v3378_v58  ;;  %v3385_v27 = vsel %vm833_vm3, %v3383_v36, %v3384_v55  ;;  %3625 = vmatpush.bf16.msrb.mxu0 %v6092_v51  ;;  %v5917_v37 = vld [vmem:[#allocation2 + $0x48] sm:$0xf0]  ;;  %v6630_v41 = vld [vmem:[#allocation2 + $0xc4] sm:$0xf]  ;;  %v10337_v28 = vld [vmem:[#allocation12_spill] sm:$0xff] }
 0x26f   : > { %v9091_v33 = vpack.c.bf16 %v3376_v19, %v3370_v20  ;;  %v3386_v43 = vrot.slane %v10334_v49, 2  ;;  %v9099_v21 = vpack.c.bf16 %v3385_v27, %v3379_v4  ;;  %3654 = vmatpush.bf16.msrb.mxu1 %v6156_v44  ;;  %v3387_v46 = vrot.slane %v10335_v24, 2  ;;  %v5981_v36 = vld [vmem:[#allocation2 + $0xc8] sm:$0xf0]  ;;  %v6612_v2 = vld [vmem:[#allocation2 + $0x34] sm:$0xf] }
 0x270   : > { %v5928_v23 = vor.u32 %v6616_v22, %v5925_v53  ;;  %v5992_v35 = vor.u32 %v6632_v60, %v5989_v5  ;;  %v3382_v7 = vsel %vm833_vm3, %v3380_v9, %v3381_v25  ;;  %v5920_v18 = vor.u32 %v6614_v62, %v5917_v37  ;;  %v5909_v58 = vld [vmem:[#allocation2 + $0x38] sm:$0xf0]  ;;  %v6610_v26 = vld [vmem:[#allocation2 + $0x24] sm:$0xf]  ;;  %v5901_v52 = vld [vmem:[#allocation2 + $0x28] sm:$0xf0] }
 0x271   : > { %3296 = vmatpush.bf16.msrb.mxu2 %v5936_v34  ;;  %3325 = vmatpush.bf16.msrb.mxu3 %v6000_v16  ;;  %v3388_v40 = vsel %vm833_vm3, %v3386_v43, %v3387_v46  ;;  %v5984_v8 = vor.u32 %v6630_v41, %v5981_v36  ;;  %v5912_v61 = vor.u32 %v6612_v2, %v5909_v58  ;;  %v5973_v32 = vld [vmem:[#allocation2 + $0xb8] sm:$0xf0]  ;;  %v6626_v63 = vld [vmem:[#allocation2 + $0xa4] sm:$0xf]  ;;  %v5965_v30 = vld [vmem:[#allocation2 + $0xa8] sm:$0xf0] }
 0x272   : > { %3626 = vmatmul.bf16.vlgmr.msrb.gmra.mxu0 %v9052_v6  ;;  %3655 = vmatmul.bf16.vlgmr.msrb.gmra.mxu1 %v9064_v1  ;;  %v9107_v51 = vpack.c.bf16 %v3388_v40, %v3382_v7  ;;  %v5976_v50 = vor.u32 %v6628_v15, %v5973_v32  ;;  %v5904_v47 = vor.u32 %v6610_v26, %v5901_v52  ;;  %v10338_v44 = vld [vmem:[#allocation18_spill] sm:$0xff]  ;;  %v10339_v13 = vld [vmem:[#allocation19_spill] sm:$0xff]  ;;  %v6608_v38 = vld [vmem:[#allocation2 + $0x14] sm:$0xf]  ;;  %v3395_v25 = vrot.slane %v9001_v14, 2 }
 0x273   : > { %v5968_v20 = vor.u32 %v6626_v63, %v5965_v30  ;;  %v5893_v19 = vld [vmem:[#allocation2 + $0x18] sm:$0xf0]  ;;  %v6624_v9 = vld [vmem:[#allocation2 + $0x94] sm:$0xf]  ;;  %v10340_v53 = vld [vmem:[#allocation31_spill] sm:$0xff]  ;;  %v3398_v49 = vrot.slane %v9027_v3, 2 }
 0x274   : > { %3027 = vmatmul.bf16.vlgmr.msra.gmra.mxu2 %v10336_v12  ;;  %v5896_v34 = vor.u32 %v6608_v38, %v5893_v19  ;;  %v5957_v16 = vld [vmem:[#allocation2 + $0x98] sm:$0xf0]  ;;  %v10341_v60 = vld [vmem:[#allocation23_spill] sm:$0xff]  ;;  %v6606_v5 = vld [vmem:[#allocation2 + $0x4] sm:$0xf]  ;;  %v3392_v7 = vrot.slane %v9022_v0, 2 }
 0x275   : > { %3297 = vmatpush.bf16.msrb.mxu2 %v5928_v23  ;;  %3326 = vmatpush.bf16.msrb.mxu3 %v5992_v35  ;;  %v5960_v22 = vor.u32 %v6624_v9, %v5957_v16  ;;  %v5885_v4 = vld [vmem:[#allocation2 + $0x8] sm:$0xf0]  ;;  %v6622_v27 = vld [vmem:[#allocation2 + $0x84] sm:$0xf]  ;;  %v3389_v23 = vrot.slane %v8984_v48, 2  ;;  %v3396_v35 = vrot.slane %v9004_v42, 2 }
 0x276   : > { %v5888_v43 = vor.u32 %v6606_v5, %v5885_v4  ;;  %v5949_v24 = vld [vmem:[#allocation2 + $0x88] sm:$0xf0]  ;;  %v3399_v62 = vrot.slane %v9034_v10, 2  ;;  %v3390_v37 = vrot.slane %v8994_v45, 2  ;;  %v3393_v41 = vrot.slane %v9030_v17, 2  ;;  %v10342_v9 = vld [vmem:[#allocation10_spill] sm:$0xff] }
 0x277   : > { %v5952_v46 = vor.u32 %v6622_v27, %v5949_v24  ;;  %v3397_v14 = vsel %vm833_vm3, %v3395_v25, %v3396_v35  ;;  %v6684_v0 = vld [vmem:[#allocation2 + $0x274] sm:$0xf]  ;;  %v6149_v10 = vld [vmem:[#allocation2 + $0x278] sm:$0xf0]  ;;  %v6141_v2 = vld [vmem:[#allocation2 + $0x268] sm:$0xf0] }
 0x278   : > { %3056 = vmatmul.bf16.vlgmr.msra.gmra.mxu3 %v10337_v28  ;;  %v3400_v3 = vsel %vm833_vm3, %v3398_v49, %v3399_v62  ;;  %v3391_v36 = vsel %vm833_vm3, %v3389_v23, %v3390_v37  ;;  %v3394_v48 = vsel %vm833_vm3, %v3392_v7, %v3393_v41  ;;  %v6700_v12 = vld [vmem:[#allocation2 + $0x2f4] sm:$0xf]  ;;  %v6152_v45 = vor.u32 %v6684_v0, %v6149_v10  ;;  %v6682_v28 = vld [vmem:[#allocation2 + $0x264] sm:$0xf]  ;;  %v6189_v38 = vld [vmem:[#allocation2 + $0x2c8] sm:$0xf0]  ;;  %v3275_v0 = vpop.f32.mrf.mxu1 }
 0x279   : > { %3298 = vmatpush.bf16.msrb.mxu2 %v5920_v18  ;;  %3327 = vmatpush.bf16.msrb.mxu3 %v5984_v8  ;;  %v2970_v57 = vpop.f32.mrf.mxu2  ;;  %v9132_v40 = vpack.c.bf16 %v3397_v14, %v3391_v36  ;;  %v9134_v42 = vpack.c.bf16 %v3400_v3, %v3394_v48  ;;  %v9136_v18 = vpop.f32.mrf.mxu0  ;;  %v6213_v8 = vld [vmem:[#allocation2 + $0x2f8] sm:$0xf0]  ;;  %v6698_v58 = vld [vmem:[#allocation2 + $0x2e4] sm:$0xf]  ;;  %v6144_v15 = vor.u32 %v6682_v28, %v6141_v2  ;;  %v6680_v63 = vld [vmem:[#allocation2 + $0x254] sm:$0xf] }
 0x27a   : > { %v6216_v17 = vor.u32 %v6700_v12, %v6213_v8  ;;  %v6696_v30 = vld [vmem:[#allocation2 + $0x2d4] sm:$0xf]  ;;  %v6117_v27 = vld [vmem:[#allocation2 + $0x238] sm:$0xf0]  ;;  %v6674_v24 = vld [vmem:[#allocation2 + $0x224] sm:$0xf] }
 0x27b   : > { %v2999_v56 = vpop.f32.mrf.mxu3  ;;  %v10343_v5 = vld [vmem:[#allocation8_spill] sm:$0xff]  ;;  %v6690_v7 = vld [vmem:[#allocation2 + $0x2a4] sm:$0xf]  ;;  %v6173_v62 = vld [vmem:[#allocation2 + $0x2a8] sm:$0xf0]  ;;  %vm4226_vm0 = vcmask 785408  }
 0x27c   : > { %v9110_v55 = vadd.f32 %v2999_v56, %v2970_v57  ;;  %v6125_v56 = vld [vmem:[#allocation2 + $0x248] sm:$0xf0]  ;;  %v6676_v4 = vld [vmem:[#allocation2 + $0x234] sm:$0xf]  ;;  %v6176_v3 = vor.u32 %v6690_v7, %v6173_v62  ;;  %v6101_v2 = vld [vmem:[#allocation2 + $0x218] sm:$0xf0] }
 0x27d   : > { %3299 = vmatpush.bf16.msrb.mxu2 %v5912_v61  ;;  %3328 = vmatpush.bf16.msrb.mxu3 %v5976_v50  ;;  %v6205_v61 = vld [vmem:[#allocation2 + $0x2e8] sm:$0xf0]  ;;  %v6692_v25 = vld [vmem:[#allocation2 + $0x2b4] sm:$0xf]  ;;  %v6120_v49 = vor.u32 %v6676_v4, %v6117_v27  ;;  %vm5486_vm2 = vcmask 261120  }
 0x27e   : > { %v6208_v26 = vor.u32 %v6698_v58, %v6205_v61  ;;  %v10344_v48 = vld [vmem:[#allocation15_spill] sm:$0xff]  ;;  %v6672_v28 = vld [vmem:[#allocation2 + $0x214] sm:$0xf]  ;;  %v6165_v61 = vld [vmem:[#allocation2 + $0x298] sm:$0xf0] }
 0x27f   : > { %v6688_v58 = vld [vmem:[#allocation2 + $0x294] sm:$0xf] }
 0x281   : > { %3300 = vmatpush.bf16.msrb.mxu2 %v5904_v47  ;;  %3329 = vmatpush.bf16.msrb.mxu3 %v5968_v20  ;;  %v9142_v32 = vpop.f32.mrf.mxu2  ;;  %v9144_v52 = vpop.f32.mrf.mxu0  ;;  %v6197_v47 = vld [vmem:[#allocation2 + $0x2d8] sm:$0xf0] }
 0x282   : > { %3631 = vmatmul.bf16.gmra.mxu0 %v9083_v59  ;;  %3660 = vmatmul.bf16.gmra.mxu1 %v9091_v33 }
 0x283   : > { %v9146_v50 = vpop.f32.mrf.mxu3 }
 0x284   : > { %3032 = vmatmul.bf16.gmra.mxu2 %v10338_v44  ;;  %v6200_v44 = vor.u32 %v6696_v30, %v6197_v47  ;;  %v6670_v30 = vld [vmem:[#allocation2 + $0x204] sm:$0xf] }
 0x285   : > { %3301 = vmatpush.bf16.msrb.mxu2 %v5896_v34  ;;  %3330 = vmatpush.bf16.msrb.mxu3 %v5960_v22  ;;  %v6686_v47 = vld [vmem:[#allocation2 + $0x284] sm:$0xf] }
 0x288   : > { %3061 = vmatmul.bf16.gmra.mxu3 %v10339_v13  ;;  %v6694_v13 = vld [vmem:[#allocation2 + $0x2c4] sm:$0xf] }
 0x289   : > { %3302 = vmatpush.bf16.msrb.mxu2 %v5888_v43  ;;  %3331 = vmatpush.bf16.msrb.mxu3 %v5952_v46  ;;  %v6192_v22 = vor.u32 %v6694_v13, %v6189_v38  ;;  %v6181_v43 = vld [vmem:[#allocation2 + $0x2b8] sm:$0xf0]  ;;  %v6109_v46 = vld [vmem:[#allocation2 + $0x228] sm:$0xf0]  ;;  %v10346_v38 = vld [vmem:[#allocation20_spill] sm:$0xff] }
 0x28a   : > { %v6184_v35 = vor.u32 %v6692_v25, %v6181_v43  ;;  %v6112_v37 = vor.u32 %v6674_v24, %v6109_v46 }
 0x28d   : > { %3676 = vmatpush.bf16.msra.mxu2 %v6152_v45  ;;  %3705 = vmatpush.bf16.msra.mxu3 %v6216_v17  ;;  %v10345_v17 = vld [vmem:[#allocation17_spill] sm:$0xff] }
 0x291   : > { %3677 = vmatpush.bf16.msra.mxu2 %v6144_v15  ;;  %3706 = vmatpush.bf16.msra.mxu3 %v6208_v26  ;;  %v6104_v15 = vor.u32 %v6672_v28, %v6101_v2  ;;  %v6168_v26 = vor.u32 %v6688_v58, %v6165_v61 }
 0x292   : > { %3636 = vmatmul.bf16.gmra.mxu0 %v9099_v21  ;;  %3665 = vmatmul.bf16.gmra.mxu1 %v9107_v51 }
 0x294   : > { %3037 = vmatmul.bf16.gmra.mxu2 %v10340_v53 }
 0x295   : > { %3707 = vmatpush.bf16.msra.mxu3 %v6200_v44  ;;  %v3002_v44 = vadd.f32 %v9146_v50, %v9142_v32 }
 0x298   : > { %3066 = vmatmul.bf16.gmra.mxu3 %v10341_v60 }
 0x299   : > { %3708 = vmatpush.bf16.msra.mxu3 %v6192_v22 }
 0x29d   : > { %3709 = vmatpush.bf16.msra.mxu3 %v6184_v35 }
 0x2a1   : > { %v3251_v19 = vpop.f32.mrf.mxu0  ;;  %3710 = vmatpush.bf16.msra.mxu3 %v6176_v3 }
 0x2a2   : > { %3641 = vmatmul.bf16.gmra.mxu0 %v9132_v40  ;;  %3670 = vmatmul.bf16.gmra.mxu1 %v9134_v42 }
 0x2a4   : > { %3042 = vmatmul.bf16.gmra.mxu2 %v9024_v39  ;;  %v6133_v39 = vld [vmem:[#allocation2 + $0x258] sm:$0xf0] }
 0x2a5   : > { %v6136_v57 = vor.u32 %v6680_v63, %v6133_v39  ;;  %v3247_v63 = vadd.f32 %v9136_v18, %v9110_v55  ;;  %3711 = vmatpush.bf16.msra.mxu3 %v6168_v26  ;;  %v3277_v39 = vpop.f32.mrf.mxu1  ;;  %v3249_v55 = vadd.f32 %v9144_v52, %v3002_v44 }
 0x2a7   : > { %3678 = vmatpush.bf16.msra.mxu2 %v6136_v57  ;;  %v6093_v57 = vld [vmem:[#allocation2 + $0x208] sm:$0xf0] }
 0x2a8   : > { %3071 = vmatmul.bf16.gmra.mxu3 %v9042_v29  ;;  %v6678_v29 = vld [vmem:[#allocation2 + $0x244] sm:$0xf] }
 0x2a9   : > { %v6128_v34 = vor.u32 %v6678_v29, %v6125_v56  ;;  %v3253_v41 = vpop.f32.mrf.mxu0  ;;  %v6096_v29 = vor.u32 %v6670_v30, %v6093_v57  ;;  %v6157_v56 = vld [vmem:[#allocation2 + $0x288] sm:$0xf0] }
 0x2aa   : > { %v6160_v13 = vor.u32 %v6686_v47, %v6157_v56 }
 0x2ab   : > { %3679 = vmatpush.bf16.msra.mxu2 %v6128_v34 }
 0x2ac   : > { %v2975_v20 = vpop.f32.mrf.mxu2  ;;  %3712 = vmatpush.bf16.msra.mxu3 %v6160_v13 }
 0x2ad   : > { %v3280_v18 = vpop.f32.mrf.mxu1 }
 0x2af   : > { %v3004_v16 = vpop.f32.mrf.mxu3  ;;  %3680 = vmatpush.bf16.msra.mxu2 %v6120_v49 }
 0x2b0   : > { %v3005_v53 = vadd.f32 %v3004_v16, %v2975_v20  ;;  %v9162_v20 = vadd.f32 %v3275_v0, %v3247_v63 }
 0x2b1   : > { %v3256_v45 = vpop.f32.mrf.mxu0 }
 0x2b2   : > { %v3252_v60 = vadd.f32 %v3251_v19, %v3005_v53  ;;  %v10347_v19 = vld [vmem:[#allocation21_spill] sm:$0xff] }
 0x2b3   : > { %3681 = vmatpush.bf16.msra.mxu2 %v6112_v37 }
 0x2b4   : > { %6053 = vmatmul.msk.bf16.vlgmr.msrb.gmra.mxu2 %vm8481_vm1, %v10342_v9  ;;  %v2977_v23 = vpop.f32.mrf.mxu2  ;;  %v9173_v9 = vadd.f32 %v3277_v39, %v3249_v55  ;;  %v9175_v32 = vadd.f32 %v3280_v18, %v3252_v60 }
 0x2b5   : > { %v3282_v16 = vpop.f32.mrf.mxu1 }
 0x2b7   : > { %v3006_v14 = vpop.f32.mrf.mxu3  ;;  %3682 = vmatpush.bf16.msra.mxu2 %v6104_v15 }
 0x2b8   : > { %6073 = vmatmul.msk.bf16.vlgmr.msrb.gmra.mxu3 %vm8481_vm1, %v10343_v5  ;;  %v3007_v22 = vadd.f32 %v3006_v14, %v2977_v23 }
 0x2b9   : > { %v3258_v50 = vpop.f32.mrf.mxu0 }
 0x2ba   : > { %v3254_v5 = vadd.f32 %v3253_v41, %v3007_v22 }
 0x2bb   : > { %3683 = vmatpush.bf16.msra.mxu2 %v6096_v29 }
 0x2bc   : > { %v2980_v36 = vpop.f32.mrf.mxu2  ;;  %v9183_v4 = vadd.f32 %v3282_v16, %v3254_v5 }
 0x2bd   : > { %v3285_v27 = vpop.f32.mrf.mxu1 }
 0x2bf   : > { %v3009_v10 = vpop.f32.mrf.mxu3 }
 0x2c0   : > { %v3010_v12 = vadd.f32 %v3009_v10, %v2980_v36 }
 0x2c2   : > { %v3257_v8 = vadd.f32 %v3256_v45, %v3010_v12 }
 0x2c4   : > { %6058 = vmatmul.msk.bf16.gmra.mxu2 %vm8481_vm1, %v10344_v48  ;;  %v2982_v34 = vpop.f32.mrf.mxu2  ;;  %v9185_v23 = vadd.f32 %v3285_v27, %v3257_v8 }
 0x2c5   : > { %v3287_v62 = vpop.f32.mrf.mxu1 }
 0x2c7   : > { %v3011_v53 = vpop.f32.mrf.mxu3 }
 0x2c8   : > { %6078 = vmatmul.msk.bf16.gmra.mxu3 %vm8481_vm1, %v10345_v17  ;;  %v3012_v46 = vadd.f32 %v3011_v53, %v2982_v34 }
 0x2d4   : > { %6063 = vmatmul.msk.bf16.gmra.mxu2 %vm8481_vm1, %v10346_v38 }
 0x2d8   : > { %6083 = vmatmul.msk.bf16.gmra.mxu3 %vm8481_vm1, %v10347_v19 }
 0x2dc   : > { %v3261_v25 = vpop.f32.mrf.mxu0 }
 0x2de   : > { %v3290_v36 = vpop.f32.mrf.mxu1 }
 0x2e4   : > { %6068 = vmatmul.msk.bf16.gmra.mxu2 %vm8481_vm1, %v8997_v11  ;;  %v3259_v11 = vadd.f32 %v3258_v50, %v3012_v46  ;;  %v3263_v37 = vpop.f32.mrf.mxu0 }
 0x2e6   : > { %v9189_v41 = vadd.f32 %v3287_v62, %v3259_v11  ;;  %v3292_v12 = vpop.f32.mrf.mxu1 }
 0x2e7   : > { %v2985_v52 = vpop.f32.mrf.mxu2 }
 0x2e8   : > { %6088 = vmatmul.msk.bf16.gmra.mxu3 %vm8481_vm1, %v9006_v31 }
 0x2eb   : > { %v3014_v49 = vpop.f32.mrf.mxu3 }
 0x2ec   : > { %v3015_v43 = vadd.f32 %v3014_v49, %v2985_v52 }
 0x2ee   : > { %v3262_v60 = vadd.f32 %v3261_v25, %v3015_v43 }
 0x2ef   : > { %v2987_v24 = vpop.f32.mrf.mxu2  ;;  %v3627_v47 = vpop.f32.mrf.mxu0 }
 0x2f0   : > { %v9191_v0 = vadd.f32 %v3290_v36, %v3262_v60 }
 0x2f3   : > { %v3016_v35 = vpop.f32.mrf.mxu3 }
 0x2f4   : > { %3684 = vmatmul.bf16.vlgmr.msra.gmra.mxu2 %v9052_v6  ;;  %v3017_v7 = vadd.f32 %v3016_v35, %v2987_v24 }
 0x2f6   : > { %v3264_v54 = vadd.f32 %v3263_v37, %v3017_v7 }
 0x2f7   : > { %v3028_v31 = vpop.f32.mrf.mxu2  ;;  %v3629_v38 = vpop.f32.mrf.mxu0 }
 0x2f8   : > { %3713 = vmatmul.bf16.vlgmr.msra.gmra.mxu3 %v9064_v1  ;;  %v9195_v45 = vadd.f32 %v3292_v12, %v3264_v54 }
 0x2fb   : > { %v3057_v14 = vpop.f32.mrf.mxu3 }
 0x2fc   : > { %v3058_v3 = vadd.f32 %v3057_v14, %v3028_v31 }
 0x2ff   : > { %v3030_v48 = vpop.f32.mrf.mxu2  ;;  %v3632_v50 = vpop.f32.mrf.mxu0 }
 0x303   : > { %v3059_v10 = vpop.f32.mrf.mxu3 }
 0x304   : > { %3689 = vmatmul.bf16.gmra.mxu2 %v9083_v59  ;;  %v3060_v55 = vadd.f32 %v3059_v10, %v3030_v48 }
 0x307   : > { %v3033_v6 = vpop.f32.mrf.mxu2  ;;  %v3634_v43 = vpop.f32.mrf.mxu0 }
 0x308   : > { %3718 = vmatmul.bf16.gmra.mxu3 %v9091_v33 }
 0x30b   : > { %v3062_v8 = vpop.f32.mrf.mxu3 }
 0x30c   : > { %v3063_v17 = vadd.f32 %v3062_v8, %v3033_v6 }
 0x30f   : > { %v3035_v1 = vpop.f32.mrf.mxu2  ;;  %v3637_v62 = vpop.f32.mrf.mxu0 }
 0x313   : > { %v3064_v28 = vpop.f32.mrf.mxu3 }
 0x314   : > { %3694 = vmatmul.bf16.gmra.mxu2 %v9099_v21  ;;  %v3656_v21 = vpop.f32.mrf.mxu1  ;;  %v3065_v27 = vadd.f32 %v3064_v28, %v3035_v1 }
 0x317   : > { %v3038_v2 = vpop.f32.mrf.mxu2  ;;  %v3639_v48 = vpop.f32.mrf.mxu0 }
 0x318   : > { %3723 = vmatmul.bf16.gmra.mxu3 %v9107_v51 }
 0x31b   : > { %v3067_v58 = vpop.f32.mrf.mxu3 }
 0x31c   : > { %v3068_v15 = vadd.f32 %v3067_v58, %v3038_v2 }
 0x31f   : > { %v3040_v61 = vpop.f32.mrf.mxu2  ;;  %v3642_v2 = vpop.f32.mrf.mxu0 }
 0x323   : > { %v3069_v26 = vpop.f32.mrf.mxu3 }
 0x324   : > { %3699 = vmatmul.bf16.gmra.mxu2 %v9132_v40  ;;  %v3070_v59 = vadd.f32 %v3069_v26, %v3040_v61  ;;  %v3658_v40 = vpop.f32.mrf.mxu1  ;;  %v3657_v26 = vadd.f32 %v3656_v21, %v3627_v47 }
 0x327   : > { %v3043_v63 = vpop.f32.mrf.mxu2 }
 0x328   : > { %3728 = vmatmul.bf16.gmra.mxu3 %v9134_v42 }
 0x32b   : > { %v3072_v33 = vpop.f32.mrf.mxu3 }
 0x32c   : > { %v3073_v39 = vadd.f32 %v3072_v33, %v3043_v63  ;;  %v3661_v53 = vpop.f32.mrf.mxu1  ;;  %v3659_v33 = vadd.f32 %v3658_v40, %v3629_v38 }
 0x32f   : > { %v3045_v30 = vpop.f32.mrf.mxu2 }
 0x333   : > { %v3074_v57 = vpop.f32.mrf.mxu3 }
 0x334   : > { %v3075_v29 = vadd.f32 %v3074_v57, %v3045_v30  ;;  %v3663_v60 = vpop.f32.mrf.mxu1  ;;  %v3734_v30 = vadd.f32 %v3657_v26, %v9162_v20  ;;  %v3662_v57 = vadd.f32 %v3661_v53, %v3632_v50 }
 0x336   : > { %v3738_v20 = vadd.f32 %v3662_v57, %v9175_v32 }
 0x337   : > { %v3304_v56 = vpop.f32.mrf.mxu2 }
 0x338   : > { %v3305_v44 = vadd.f32 %v3304_v56, %v3058_v3  ;;  %v3644_v56 = vpop.f32.mrf.mxu0 }
 0x33b   : > { %v3333_v51 = vpop.f32.mrf.mxu3 }
 0x33c   : > { %v9201_v13 = vadd.f32 %v3333_v51, %v3305_v44  ;;  %v3666_v54 = vpop.f32.mrf.mxu1  ;;  %v3736_v44 = vadd.f32 %v3659_v33, %v9173_v9  ;;  %v3664_v51 = vadd.f32 %v3663_v60, %v3634_v43 }
 0x33f   : > { %v3306_v18 = vpop.f32.mrf.mxu2 }
 0x340   : > { %v3307_v19 = vadd.f32 %v3306_v18, %v3060_v55  ;;  %v3667_v55 = vadd.f32 %v3666_v54, %v3637_v62 }
 0x343   : > { %v3335_v34 = vpop.f32.mrf.mxu3 }
 0x344   : > { %v9203_v16 = vadd.f32 %v3335_v34, %v3307_v19  ;;  %v3668_v6 = vpop.f32.mrf.mxu1 }
 0x345   : > { %v3669_v47 = vadd.f32 %v3668_v6, %v3639_v48 }
 0x347   : > { %v3309_v42 = vpop.f32.mrf.mxu2 }
 0x348   : > { %v3310_v22 = vadd.f32 %v3309_v42, %v3063_v17 }
 0x34b   : > { %v3338_v5 = vpop.f32.mrf.mxu3 }
 0x34c   : > { %v9205_v52 = vadd.f32 %v3338_v5, %v3310_v22  ;;  %v3671_v58 = vpop.f32.mrf.mxu1 }
 0x34d   : > { %v3672_v42 = vadd.f32 %v3671_v58, %v3642_v2 }
 0x34f   : > { %v3311_v25 = vpop.f32.mrf.mxu2  ;;  %v3746_v32 = vadd.f32 %v3672_v42, %v9191_v0 }
 0x350   : > { %v3312_v49 = vadd.f32 %v3311_v25, %v3065_v27  ;;  %v3740_v27 = vadd.f32 %v3664_v51, %v9183_v4  ;;  %v3742_v25 = vadd.f32 %v3667_v55, %v9185_v23 }
 0x353   : > { %v3340_v24 = vpop.f32.mrf.mxu3 }
 0x354   : > { %v9207_v46 = vadd.f32 %v3340_v24, %v3312_v49  ;;  %v3673_v21 = vpop.f32.mrf.mxu1  ;;  %v3744_v49 = vadd.f32 %v3669_v47, %v9189_v41 }
 0x355   : > { %v3674_v22 = vadd.f32 %v3673_v21, %v3644_v56 }
 0x357   : > { %v3314_v35 = vpop.f32.mrf.mxu2 }
 0x358   : > { %v3315_v11 = vadd.f32 %v3314_v35, %v3068_v15  ;;  %v3748_v35 = vadd.f32 %v3674_v22, %v9195_v45 }
 0x35b   : > { %v3343_v7 = vpop.f32.mrf.mxu3 }
 0x35c   : > { %v9209_v37 = vadd.f32 %v3343_v7, %v3315_v11 }
 0x35f   : > { %v3316_v31 = vpop.f32.mrf.mxu2 }
 0x360   : > { %v3317_v14 = vadd.f32 %v3316_v31, %v3070_v59  ;;  %v3750_v59 = vld [vmem:[%s10075_s5] sm:$0x3] }
 0x361   : > { %v9225_v34 = vperm.slane %v3750_v59, 1 }
 0x363   : > { %v3345_v3 = vpop.f32.mrf.mxu3 }
 0x364   : > { %v9211_v36 = vadd.f32 %v3345_v3, %v3317_v14 }
 0x367   : > { %v3319_v10 = vpop.f32.mrf.mxu2 }
 0x368   : > { %v3320_v12 = vadd.f32 %v3319_v10, %v3073_v39  ;;  %v3752_v39 = vperm.slane %v3750_v59, 0 }
 0x36a   : > { %v3756_v38 = vmul.f32 %v3752_v39, %v3734_v30  ;;  %v3758_v9 = vmul.f32 %v3752_v39, %v3736_v44  ;;  %v3760_v24 = vmul.f32 %v3752_v39, %v3738_v20  ;;  %v3762_v7 = vmul.f32 %v3752_v39, %v3740_v27 }
 0x36b   : > { %v3348_v8 = vpop.f32.mrf.mxu3  ;;  %v3764_v62 = vmul.f32 %v3752_v39, %v3742_v25  ;;  %v3766_v54 = vmul.f32 %v3752_v39, %v3744_v49  ;;  %v3768_v41 = vmul.f32 %v3752_v39, %v3746_v32  ;;  %v3770_v48 = vmul.f32 %v3752_v39, %v3748_v35 }
 0x36c   : > { %v9213_v17 = vadd.f32 %v3348_v8, %v3320_v12 }
 0x36f   : > { %v3321_v1 = vpop.f32.mrf.mxu2 }
 0x370   : > { %v3322_v28 = vadd.f32 %v3321_v1, %v3075_v29  ;;  %v3772_v29 = vld [vmem:[%s10076_s6] sm:$0x3] }
 0x371   : > { %v3774_v40 = vperm.slane %v3772_v29, 0  ;;  %v9229_v53 = vperm.slane %v3772_v29, 1 }
 0x373   : > { %v3350_v15 = vpop.f32.mrf.mxu3  ;;  %v3778_v60 = vadd.f32 %v3774_v40, %v3756_v38  ;;  %v3780_v11 = vadd.f32 %v3774_v40, %v3758_v9  ;;  %v3782_v3 = vadd.f32 %v3774_v40, %v3760_v24  ;;  %v3784_v8 = vadd.f32 %v3774_v40, %v3762_v7 }
 0x374   : > { %v9215_v61 = vadd.f32 %v3350_v15, %v3322_v28  ;;  %v3786_v45 = vadd.f32 %v3774_v40, %v3764_v62  ;;  %v3788_v1 = vadd.f32 %v3774_v40, %v3766_v54  ;;  %v3792_v39 = vadd.f32 %v3774_v40, %v3770_v48 }
 0x375   : > { %v3794_v23 = vmax.f32 %v3778_v60, 0.0  ;;  %v3796_v0 = vmax.f32 %v3780_v11, 0.0  ;;  %v9243_v30 = vmax.f32 %v3782_v3, 0.0  ;;  %v9248_v47 = vmax.f32 %v3784_v8, 0.0 }
 0x376   : > { %v9250_v21 = vmax.f32 %v3786_v45, 0.0  ;;  %v9253_v38 = vmax.f32 %v3788_v1, 0.0 }
 0x377   : > { %v3685_v63 = vpop.f32.mrf.mxu2 }
 0x37b   : > { %v3714_v18 = vpop.f32.mrf.mxu3 }
 0x37c   : > { %v3715_v19 = vadd.f32 %v3714_v18, %v3685_v63 }
 0x37e   : > { %v3735_v50 = vadd.f32 %v3715_v19, %v9201_v13 }
 0x37f   : > { %v3687_v5 = vpop.f32.mrf.mxu2 }
 0x380   : > { %v3757_v43 = vmul.f32 %v9225_v34, %v3735_v50  ;;  %v9263_v50 = vmax.f32 %v3792_v39, 0.0 }
 0x382   : > { %v3779_v13 = vadd.f32 %v9229_v53, %v3757_v43 }
 0x383   : > { %v3716_v31 = vpop.f32.mrf.mxu3 }
 0x384   : > { %v3795_v4 = vmax.f32 %v3779_v13, 0.0  ;;  %v3717_v14 = vadd.f32 %v3716_v31, %v3687_v5 }
 0x386   : > { %v3826_v10 = vrot.slane %v3795_v4, 6  ;;  %v3737_v6 = vadd.f32 %v3717_v14, %v9203_v16  ;;  %v3790_v16 = vadd.f32 %v3774_v40, %v3768_v41 }
 0x387   : > { %v3690_v12 = vpop.f32.mrf.mxu2 }
 0x388   : > { %v3834_v28 = vsel %vm1229_vm4, %v3794_v23, %v3826_v10  ;;  %v3835_v2 = vsel %vm1231_vm5, %v3794_v23, %v3826_v10  ;;  %v3837_v58 = vsel %vm1234_vm6, %v3794_v23, %v3826_v10  ;;  %v3839_v15 = vsel %vm833_vm3, %v3826_v10, %v3794_v23 }
 0x389   : > { %v3836_v26 = vrot.slane %v3835_v2, 2  ;;  %v3838_v59 = vrot.slane %v3837_v58, 4  ;;  %v3840_v63 = vrot.slane %v3839_v15, 6  ;;  %v6217_v33 = vrot.slane %v3834_v28, 9 }
 0x38a   : > { %v3759_v57 = vmul.f32 %v9225_v34, %v3737_v6  ;;  %v9261_v22 = vmax.f32 %v3790_v16, 0.0 }
 0x38b   : > { %v6218_v29 = vrot.slane %v3836_v26, 9  ;;  %v6219_v56 = vrot.slane %v3838_v59, 9  ;;  %v9246_v44 = vmax.f32 %v3834_v28, %v6217_v33  ;;  %v3719_v51 = vpop.f32.mrf.mxu3  ;;  %v6220_v55 = vrot.slane %v3840_v63, 9 }
 0x38c   : > { %v3781_v18 = vadd.f32 %v9229_v53, %v3759_v57  ;;  %v3720_v19 = vadd.f32 %v3719_v51, %v3690_v12 }
 0x38d   : > { %v9255_v20 = vmax.f32 %v3836_v26, %v6218_v29  ;;  %v9257_v40 = vmax.f32 %v3838_v59, %v6219_v56  ;;  %v9259_v42 = vmax.f32 %v3840_v63, %v6220_v55  ;;  %v4082_v25 = vperm.slane %v9246_v44, 0 }
 0x38e   : > { %v3797_v5 = vmax.f32 %v3781_v18, 0.0  ;;  %v3739_v9 = vadd.f32 %v3720_v19, %v9205_v52  ;;  %v4083_v49 = vperm.slane %v9246_v44, 2 }
 0x38f   : > { %v3692_v27 = vpop.f32.mrf.mxu2  ;;  %v4084_v43 = vperm.slane %v9255_v20, 0  ;;  %v4085_v60 = vperm.slane %v9255_v20, 2  ;;  %v4086_v35 = vperm.slane %v9257_v40, 0  ;;  %v4087_v13 = vperm.slane %v9257_v40, 2 }
 0x390   : > { %v3827_v24 = vrot.slane %v3797_v5, 6  ;;  %v3761_v32 = vmul.f32 %v9225_v34, %v3739_v9  ;;  %v4088_v11 = vperm.slane %v9259_v42, 0  ;;  %v4089_v52 = vperm.slane %v9259_v42, 2 }
 0x391   : > { %v4146_v7 = vsel %vm1856_vm7, %v4084_v43, %v4082_v25  ;;  %v4149_v62 = vsel %vm1856_vm7, %v4085_v60, %v4083_v49 }
 0x392   : > { %v3841_v54 = vsel %vm1229_vm4, %v3796_v0, %v3827_v24  ;;  %v3842_v31 = vsel %vm1231_vm5, %v3796_v0, %v3827_v24  ;;  %v3844_v4 = vsel %vm1234_vm6, %v3796_v0, %v3827_v24  ;;  %v3846_v14 = vsel %vm833_vm3, %v3827_v24, %v3796_v0 }
 0x393   : > { %v3843_v23 = vrot.slane %v3842_v31, 2  ;;  %v3845_v3 = vrot.slane %v3844_v4, 4  ;;  %v3847_v41 = vrot.slane %v3846_v14, 6  ;;  %v6221_v48 = vrot.slane %v3841_v54, 9  ;;  %v3721_v10 = vpop.f32.mrf.mxu3 }
 0x394   : > { %v3783_v6 = vadd.f32 %v9229_v53, %v3761_v32  ;;  %v3722_v12 = vadd.f32 %v3721_v10, %v3692_v27  ;;  %v4147_v8 = vsel %vm1858_vm8, %v4086_v35, %v4146_v7  ;;  %v4150_v45 = vsel %vm1858_vm8, %v4087_v13, %v4149_v62 }
 0x395   : > { %v6222_v1 = vrot.slane %v3843_v23, 9  ;;  %v6223_v28 = vrot.slane %v3845_v3, 9  ;;  %v9284_v2 = vmax.f32 %v3841_v54, %v6221_v48  ;;  %v4148_v58 = vsel %vm1860_vm9, %v4088_v11, %v4147_v8 }
 0x396   : > { %v3799_v15 = vmax.f32 %v3783_v6, 0.0  ;;  %v3741_v0 = vadd.f32 %v3722_v12, %v9207_v46  ;;  %v4151_v26 = vsel %vm1860_vm9, %v4089_v52, %v4150_v45  ;;  %v6224_v63 = vrot.slane %v3847_v41, 9 }
 0x397   : > { %v3695_v59 = vpop.f32.mrf.mxu2  ;;  %v9289_v33 = vmax.f32 %v3843_v23, %v6222_v1  ;;  %v6860_v16 = vpack.i.bf16 %v4151_v26, %v4148_v58  ;;  %v9291_v39 = vmax.f32 %v3845_v3, %v6223_v28  ;;  %v4090_v57 = vperm.slane %v9284_v2, 0 }
 0x398   : > { %v3828_v29 = vrot.slane %v3799_v15, 6  ;;  %v3763_v56 = vmul.f32 %v9225_v34, %v3741_v0  ;;  %v9295_v51 = vmax.f32 %v3847_v41, %v6224_v63  ;;  %v4091_v55 = vperm.slane %v9284_v2, 2 }
 0x399   : > { %6861 = vrot.lane.b32.xlu1 %v6860_v16, %s7003_s17  ;;  %v4092_v46 = vperm.slane %v9289_v33, 0  ;;  %v4093_v18 = vperm.slane %v9289_v33, 2  ;;  %v4094_v19 = vperm.slane %v9291_v39, 0  ;;  %v4095_v5 = vperm.slane %v9291_v39, 2 }
 0x39a   : > { %v3848_v9 = vsel %vm1229_vm4, %v9243_v30, %v3828_v29  ;;  %v3849_v27 = vsel %vm1231_vm5, %v9243_v30, %v3828_v29  ;;  %v3851_v25 = vsel %vm1234_vm6, %v9243_v30, %v3828_v29  ;;  %v3853_v49 = vsel %vm833_vm3, %v3828_v29, %v9243_v30 }
 0x39b   : > { %v3850_v43 = vrot.slane %v3849_v27, 2  ;;  %v3852_v60 = vrot.slane %v3851_v25, 4  ;;  %v3854_v24 = vrot.slane %v3853_v49, 6  ;;  %v6225_v32 = vrot.slane %v3848_v9, 9  ;;  %v3724_v35 = vpop.f32.mrf.mxu3 }
 0x39c   : > { %v3785_v13 = vadd.f32 %v9229_v53, %v3763_v56  ;;  %v3725_v11 = vadd.f32 %v3724_v35, %v3695_v59  ;;  %v4096_v52 = vperm.slane %v9295_v51, 0  ;;  %v4097_v7 = vperm.slane %v9295_v51, 2 }
 0x39d   : > { %v6226_v62 = vrot.slane %v3850_v43, 9  ;;  %v6227_v54 = vrot.slane %v3852_v60, 9  ;;  %v9314_v31 = vmax.f32 %v3848_v9, %v6225_v32  ;;  %v4152_v4 = vsel %vm1856_vm7, %v4092_v46, %v4090_v57 }
 0x39e   : > { %v3801_v14 = vmax.f32 %v3785_v13, 0.0  ;;  %v3743_v30 = vadd.f32 %v3725_v11, %v9209_v37  ;;  %v4153_v23 = vsel %vm1858_vm8, %v4094_v19, %v4152_v4  ;;  %v4155_v3 = vsel %vm1856_vm7, %v4093_v18, %v4091_v55 }
 0x39f   : > { %v3697_v41 = vpop.f32.mrf.mxu2  ;;  %v9320_v48 = vmax.f32 %v3850_v43, %v6226_v62  ;;  %v4154_v10 = vsel %vm1860_vm9, %v4096_v52, %v4153_v23  ;;  %v4156_v6 = vsel %vm1858_vm8, %v4095_v5, %v4155_v3  ;;  %v6228_v12 = vrot.slane %v3854_v24, 9 }
 0x3a0   : > { %v3829_v8 = vrot.slane %v3801_v14, 6  ;;  %v3765_v45 = vmul.f32 %v9225_v34, %v3743_v30  ;;  %v4157_v1 = vsel %vm1860_vm9, %v4097_v7, %v4156_v6  ;;  %v9326_v28 = vmax.f32 %v3852_v60, %v6227_v54 }
 0x3a1   : > { %v6865_v37 = vpack.i.bf16 %v4157_v1, %v4154_v10  ;;  %v9328_v58 = vmax.f32 %v3854_v24, %v6228_v12  ;;  %v4098_v15 = vperm.slane %v9314_v31, 0  ;;  %v4099_v0 = vperm.slane %v9314_v31, 2 }
 0x3a2   : > { %v3855_v26 = vsel %vm1229_vm4, %v9248_v47, %v3829_v8  ;;  %v3856_v59 = vsel %vm1231_vm5, %v9248_v47, %v3829_v8  ;;  %v3858_v63 = vsel %vm1234_vm6, %v9248_v47, %v3829_v8  ;;  %v3860_v16 = vsel %vm833_vm3, %v3829_v8, %v9248_v47 }
 0x3a3   : > { %v3857_v57 = vrot.slane %v3856_v59, 2  ;;  %v3859_v29 = vrot.slane %v3858_v63, 4  ;;  %v3861_v56 = vrot.slane %v3860_v16, 6  ;;  %v6229_v55 = vrot.slane %v3855_v26, 9  ;;  %6866 = vrot.lane.b32.xlu2 %v6865_v37, %s7003_s17  ;;  %v3726_v46 = vpop.f32.mrf.mxu3 }
 0x3a4   : > { %v3787_v18 = vadd.f32 %v9229_v53, %v3765_v45  ;;  %v3727_v19 = vadd.f32 %v3726_v46, %v3697_v41  ;;  %v4100_v5 = vperm.slane %v9320_v48, 0  ;;  %v4101_v9 = vperm.slane %v9320_v48, 2 }
 0x3a5   : > { %v6230_v27 = vrot.slane %v3857_v57, 9  ;;  %v6231_v25 = vrot.slane %v3859_v29, 9  ;;  %v9344_v49 = vmax.f32 %v3855_v26, %v6229_v55  ;;  %v4102_v47 = vperm.slane %v9326_v28, 0 }
 0x3a6   : > { %v3803_v43 = vmax.f32 %v3787_v18, 0.0  ;;  %v3745_v60 = vadd.f32 %v3727_v19, %v9211_v36  ;;  %v4103_v24 = vperm.slane %v9326_v28, 2  ;;  %v4104_v32 = vperm.slane %v9328_v58, 0 }
 0x3a7   : > { %v9350_v35 = vmax.f32 %v3857_v57, %v6230_v27  ;;  %v4105_v13 = vperm.slane %v9328_v58, 2  ;;  %v4158_v11 = vsel %vm1856_vm7, %v4100_v5, %v4098_v15  ;;  %v4161_v52 = vsel %vm1856_vm7, %v4101_v9, %v4099_v0  ;;  %v3700_v7 = vpop.f32.mrf.mxu2 }
 0x3a8   : > { %v3830_v62 = vrot.slane %v3803_v43, 6  ;;  %v3767_v54 = vmul.f32 %v9225_v34, %v3745_v60  ;;  %v4159_v4 = vsel %vm1858_vm8, %v4102_v47, %v4158_v11  ;;  %v4162_v36 = vsel %vm1858_vm8, %v4103_v24, %v4161_v52 }
 0x3a9   : > { %v4160_v14 = vsel %vm1860_vm9, %v4104_v32, %v4159_v4  ;;  %v4163_v30 = vsel %vm1860_vm9, %v4105_v13, %v4162_v36  ;;  %v6232_v23 = vrot.slane %v3861_v56, 9  ;;  %v9360_v3 = vmax.f32 %v3859_v29, %v6231_v25 }
 0x3aa   : > { %v3862_v41 = vsel %vm1229_vm4, %v9250_v21, %v3830_v62  ;;  %v3863_v10 = vsel %vm1231_vm5, %v9250_v21, %v3830_v62  ;;  %v3865_v6 = vsel %vm1234_vm6, %v9250_v21, %v3830_v62  ;;  %v3867_v12 = vsel %vm833_vm3, %v3830_v62, %v9250_v21 }
 0x3ab   : > { %v3864_v8 = vrot.slane %v3863_v10, 2  ;;  %v3866_v45 = vrot.slane %v3865_v6, 4  ;;  %v3868_v1 = vrot.slane %v3867_v12, 6  ;;  %v6233_v37 = vrot.slane %v3862_v41, 9  ;;  %v3729_v15 = vpop.f32.mrf.mxu3 }
 0x3ac   : > { %v3789_v0 = vadd.f32 %v9229_v53, %v3767_v54  ;;  %v6870_v26 = vpack.i.bf16 %v4163_v30, %v4160_v14  ;;  %v3730_v59 = vadd.f32 %v3729_v15, %v3700_v7  ;;  %v9371_v63 = vmax.f32 %v3861_v56, %v6232_v23 }
 0x3ad   : > { %v6234_v16 = vrot.slane %v3864_v8, 9  ;;  %v6235_v57 = vrot.slane %v3866_v45, 9  ;;  %v9373_v29 = vmax.f32 %v3862_v41, %v6233_v37  ;;  %v4106_v55 = vperm.slane %v9344_v49, 0 }
 0x3ae   : > { %v3805_v46 = vmax.f32 %v3789_v0, 0.0  ;;  %6871 = vrot.lane.b32.xlu0 %v6870_v26, %s7003_s17  ;;  %v3747_v21 = vadd.f32 %v3730_v59, %v9213_v17  ;;  %v4107_v18 = vperm.slane %v9344_v49, 2  ;;  %v4108_v19 = vperm.slane %v9350_v35, 0 }
 0x3af   : > { %v9380_v5 = vmax.f32 %v3864_v8, %v6234_v16  ;;  %v4109_v56 = vperm.slane %v9350_v35, 2  ;;  %v4110_v9 = vperm.slane %v9360_v3, 0  ;;  %v4111_v27 = vperm.slane %v9360_v3, 2  ;;  %v3702_v32 = vpop.f32.mrf.mxu2 }
 0x3b0   : > { %v3831_v25 = vrot.slane %v3805_v46, 6  ;;  %v3769_v47 = vmul.f32 %v9225_v34, %v3747_v21  ;;  %v4112_v43 = vperm.slane %v9371_v63, 0  ;;  %v4113_v60 = vperm.slane %v9371_v63, 2 }
 0x3b1   : > { %v4164_v17 = vsel %vm1856_vm7, %v4108_v19, %v4106_v55  ;;  %v4167_v24 = vsel %vm1856_vm7, %v4109_v56, %v4107_v18  ;;  %v6236_v13 = vrot.slane %v3868_v1, 9  ;;  %v9390_v11 = vmax.f32 %v3866_v45, %v6235_v57 }
 0x3b2   : > { %v3869_v52 = vsel %vm1229_vm4, %v9253_v38, %v3831_v25  ;;  %v3870_v7 = vsel %vm1231_vm5, %v9253_v38, %v3831_v25  ;;  %v3872_v62 = vsel %vm1234_vm6, %v9253_v38, %v3831_v25  ;;  %v3874_v54 = vsel %vm833_vm3, %v3831_v25, %v9253_v38 }
 0x3b3   : > { %v3871_v4 = vrot.slane %v3870_v7, 2  ;;  %v3873_v36 = vrot.slane %v3872_v62, 4  ;;  %v3875_v14 = vrot.slane %v3874_v54, 6  ;;  %v6237_v30 = vrot.slane %v3869_v52, 9  ;;  %v3731_v23 = vpop.f32.mrf.mxu3 }
 0x3b4   : > { %v3791_v41 = vadd.f32 %v9229_v53, %v3769_v47  ;;  %v4165_v10 = vsel %vm1858_vm8, %v4110_v9, %v4164_v17  ;;  %v4168_v6 = vsel %vm1858_vm8, %v4111_v27, %v4167_v24  ;;  %v3732_v12 = vadd.f32 %v3731_v23, %v3702_v32 }
 0x3b5   : > { %v6238_v8 = vrot.slane %v3871_v4, 9  ;;  %v6239_v45 = vrot.slane %v3873_v36, 9  ;;  %v9403_v37 = vmax.f32 %v3869_v52, %v6237_v30  ;;  %v4166_v15 = vsel %vm1860_vm9, %v4112_v43, %v4165_v10 }
 0x3b6   : > { %v3807_v0 = vmax.f32 %v3791_v41, 0.0  ;;  %v4169_v38 = vsel %vm1860_vm9, %v4113_v60, %v4168_v6  ;;  %v3749_v26 = vadd.f32 %v3732_v12, %v9215_v61  ;;  %v9408_v59 = vmax.f32 %v3868_v1, %v6236_v13 }
 0x3b7   : > { %v9410_v16 = vmax.f32 %v3871_v4, %v6238_v8  ;;  %v6875_v57 = vpack.i.bf16 %v4169_v38, %v4166_v15  ;;  %v4114_v55 = vperm.slane %v9373_v29, 0  ;;  %v4115_v46 = vperm.slane %v9373_v29, 2 }
 0x3b8   : > { %v3832_v21 = vrot.slane %v3807_v0, 6  ;;  %v3771_v18 = vmul.f32 %v9225_v34, %v3749_v26  ;;  %v4116_v19 = vperm.slane %v9380_v5, 0  ;;  %v4117_v56 = vperm.slane %v9380_v5, 2 }
 0x3b9   : > { %6876 = vrot.lane.b32.xlu2 %v6875_v57, %s7003_s17  ;;  %v4118_v61 = vperm.slane %v9390_v11, 0  ;;  %v4119_v1 = vperm.slane %v9390_v11, 2  ;;  %v4120_v9 = vperm.slane %v9408_v59, 0  ;;  %v4121_v27 = vperm.slane %v9408_v59, 2 }
 0x3ba   : > { %v3876_v25 = vsel %vm1229_vm4, %v9261_v22, %v3832_v21  ;;  %v3877_v34 = vsel %vm1231_vm5, %v9261_v22, %v3832_v21  ;;  %v3879_v47 = vsel %vm1234_vm6, %v9261_v22, %v3832_v21  ;;  %v3881_v43 = vsel %vm833_vm3, %v3832_v21, %v9261_v22 }
 0x3bb   : > { %v3878_v60 = vrot.slane %v3877_v34, 2  ;;  %v3880_v17 = vrot.slane %v3879_v47, 4  ;;  %v3882_v24 = vrot.slane %v3881_v43, 6  ;;  %v6241_v32 = vrot.slane %v3876_v25, 9 }
 0x3bc   : > { %v3793_v13 = vadd.f32 %v9229_v53, %v3771_v18  ;;  %v4170_v52 = vsel %vm1856_vm7, %v4116_v19, %v4114_v55  ;;  %v4173_v7 = vsel %vm1856_vm7, %v4117_v56, %v4115_v46  ;;  %v6240_v62 = vrot.slane %v3875_v14, 9 }
 0x3bd   : > { %v6242_v54 = vrot.slane %v3878_v60, 9  ;;  %v6243_v4 = vrot.slane %v3880_v17, 9  ;;  %v9433_v30 = vmax.f32 %v3876_v25, %v6241_v32  ;;  %v4171_v23 = vsel %vm1858_vm8, %v4118_v61, %v4170_v52 }
 0x3be   : > { %v3809_v41 = vmax.f32 %v3793_v13, 0.0  ;;  %v4172_v22 = vsel %vm1860_vm9, %v4120_v9, %v4171_v23  ;;  %v4174_v10 = vsel %vm1858_vm8, %v4119_v1, %v4173_v7  ;;  %v9438_v6 = vmax.f32 %v3873_v36, %v6239_v45 }
 0x3bf   : > { %v9440_v12 = vmax.f32 %v3878_v60, %v6242_v54  ;;  %v4175_v53 = vsel %vm1860_vm9, %v4121_v27, %v4174_v10  ;;  %v9443_v8 = vmax.f32 %v3875_v14, %v6240_v62  ;;  %v4122_v15 = vperm.slane %v9403_v37, 0 }
 0x3c0   : > { %v3833_v0 = vrot.slane %v3809_v41, 6  ;;  %v6880_v38 = vpack.i.bf16 %v4175_v53, %v4172_v22  ;;  %v4123_v26 = vperm.slane %v9403_v37, 2  ;;  %v4124_v57 = vperm.slane %v9410_v16, 0 }
 0x3c1   : > { %v4125_v55 = vperm.slane %v9410_v16, 2  ;;  %v4126_v46 = vperm.slane %v9438_v6, 0  ;;  %v4127_v36 = vperm.slane %v9438_v6, 2  ;;  %v4128_v45 = vperm.slane %v9443_v8, 0 }
 0x3c2   : > { %v3883_v14 = vsel %vm1229_vm4, %v9263_v50, %v3833_v0  ;;  %v3884_v21 = vsel %vm1231_vm5, %v9263_v50, %v3833_v0  ;;  %v3886_v18 = vsel %vm1234_vm6, %v9263_v50, %v3833_v0  ;;  %v3888_v19 = vsel %vm833_vm3, %v3833_v0, %v9263_v50  ;;  %6881 = vrot.lane.b32.xlu0 %v6880_v38, %s7003_s17 }
 0x3c3   : > { %v3885_v56 = vrot.slane %v3884_v21, 2  ;;  %v3887_v61 = vrot.slane %v3886_v18, 4  ;;  %v3889_v1 = vrot.slane %v3888_v19, 6  ;;  %v6245_v9 = vrot.slane %v3883_v14, 9 }
 0x3c4   : > { %v4129_v27 = vperm.slane %v9443_v8, 2  ;;  %v4176_v25 = vsel %vm1856_vm7, %v4124_v57, %v4122_v15  ;;  %v4179_v34 = vsel %vm1856_vm7, %v4125_v55, %v4123_v26  ;;  %v6244_v47 = vrot.slane %v3882_v24, 9 }
 0x3c5   : > { %v6246_v43 = vrot.slane %v3885_v56, 9  ;;  %v6247_v60 = vrot.slane %v3887_v61, 9  ;;  %v9464_v32 = vmax.f32 %v3883_v14, %v6245_v9  ;;  %v4177_v13 = vsel %vm1858_vm8, %v4126_v46, %v4176_v25 }
 0x3c6   : > { %v4178_v50 = vsel %vm1860_vm9, %v4128_v45, %v4177_v13  ;;  %v4180_v52 = vsel %vm1858_vm8, %v4127_v36, %v4179_v34  ;;  %v9469_v7 = vmax.f32 %v3880_v17, %v6243_v4  ;;  %v9471_v62 = vmax.f32 %v3882_v24, %v6244_v47 }
 0x3c7   : > { %v9473_v54 = vmax.f32 %v3885_v56, %v6246_v43  ;;  %v4181_v23 = vsel %vm1860_vm9, %v4129_v27, %v4180_v52  ;;  %v4130_v41 = vperm.slane %v9433_v30, 0  ;;  %v4131_v22 = vperm.slane %v9433_v30, 2 }
 0x3c8   : > { %v6885_v10 = vpack.i.bf16 %v4181_v23, %v4178_v50  ;;  %v4132_v53 = vperm.slane %v9440_v12, 0  ;;  %v4133_v15 = vperm.slane %v9440_v12, 2  ;;  %v4134_v0 = vperm.slane %v9469_v7, 0 }
 0x3c9   : > { %v4135_v17 = vperm.slane %v9469_v7, 2  ;;  %v4136_v24 = vperm.slane %v9471_v62, 0  ;;  %v4137_v4 = vperm.slane %v9471_v62, 2  ;;  %v6248_v38 = vrot.slane %v3889_v1, 9 }
 0x3ca   : > { %6886 = vrot.lane.b32.xlu1 %v6885_v10, %s7003_s17  ;;  %v4182_v26 = vsel %vm1856_vm7, %v4132_v53, %v4130_v41  ;;  %v4185_v57 = vsel %vm1856_vm7, %v4133_v15, %v4131_v22  ;;  %v9487_v55 = vmax.f32 %v3887_v61, %v6247_v60  ;;  %v4138_v46 = vperm.slane %v9464_v32, 0 }
 0x3cb   : > { %v4183_v36 = vsel %vm1858_vm8, %v4134_v0, %v4182_v26  ;;  %v4186_v45 = vsel %vm1858_vm8, %v4135_v17, %v4185_v57  ;;  %v9492_v14 = vmax.f32 %v3889_v1, %v6248_v38  ;;  %v4139_v21 = vperm.slane %v9464_v32, 2  ;;  %v6709_v38 = vld [vmem:[%s10077_s7 + $0x38] sm:$0xff] }
 0x3cc   : > { %v4184_v18 = vsel %vm1860_vm9, %v4136_v24, %v4183_v36  ;;  %v4187_v19 = vsel %vm1860_vm9, %v4137_v4, %v4186_v45  ;;  %v4140_v56 = vperm.slane %v9473_v54, 0  ;;  %v4141_v9 = vperm.slane %v9473_v54, 2  ;;  %v6717_v26 = vld [vmem:[%s10077_s7 + $0x78] sm:$0xff]  ;;  %4902 = vmatpush.bf16.msrb.mxu2 %v6709_v38 }
 0x3cd   : > { %v6890_v61 = vpack.i.bf16 %v4187_v19, %v4184_v18  ;;  %v4142_v27 = vperm.slane %v9487_v55, 0  ;;  %v4143_v25 = vperm.slane %v9487_v55, 2  ;;  %v4144_v34 = vperm.slane %v9492_v14, 0  ;;  %v6725_v57 = vld [vmem:[%s10077_s7 + $0xb8] sm:$0xff]  ;;  %4915 = vmatpush.bf16.msrb.mxu3 %v6717_v26 }
 0x3ce   : > { %v4145_v1 = vperm.slane %v9492_v14, 2  ;;  %v4188_v47 = vsel %vm1856_vm7, %v4140_v56, %v4138_v46  ;;  %v4191_v43 = vsel %vm1856_vm7, %v4141_v9, %v4139_v21  ;;  %v6733_v45 = vld [vmem:[%s10077_s7 + $0xf8] sm:$0xff]  ;;  %4716 = vmatpush.bf16.msra.mxu0 %v6725_v57 }
 0x3cf   : > { %6891 = vrot.lane.b32.xlu2 %v6890_v61, %s7003_s17  ;;  %v4189_v60 = vsel %vm1858_vm8, %v4142_v27, %v4188_v47  ;;  %v4192_v13 = vsel %vm1858_vm8, %v4143_v25, %v4191_v43  ;;  %4729 = vmatpush.bf16.msra.mxu1 %v6733_v45  ;;  %v6716_v45 = vld [vmem:[%s10077_s7 + $0x70] sm:$0xff] }
 0x3d0   : > { %v4190_v50 = vsel %vm1860_vm9, %v4144_v34, %v4189_v60  ;;  %v4193_v52 = vsel %vm1860_vm9, %v4145_v1, %v4192_v13 }
 0x3d1   : > { %v6895_v23 = vpack.i.bf16 %v4193_v52, %v4190_v50  ;;  %4916 = vmatpush.bf16.msrb.mxu3 %v6716_v45 }
 0x3d3   : > { %6896 = vrot.lane.b32.xlu0 %v6895_v23, %s7003_s17  ;;  %s6951_s17 = scalar_lea.hbm %s10079_s9, 16 }
 0x3d4   : > { %p6953_p4 = scmp.lt.s32.totalorder %s6951_s17, %s6947_s16 }
 0x3d6   : > { %p6954_p7 = por %p6953_p4, %p6952_p3 }
 0x3d8   : > { %p6955_p8 = pnand %p6954_p7, %p6950_p2 }
 0x3fd   : > { %v6867_v41 = vpop.permute.xlu2 %6866 }
 0x3fe   : > { %v6869_v22 = vunpack.i.h.bf16 %v6867_v41  ;;  %v6868_v10 = vunpack.i.l.bf16 %v6867_v41 }
 0x400   : > { %v4252_v53 = vsel %vm4226_vm0, %v6869_v22, %v6868_v10  ;;  %v4228_v0 = vsel %vm4226_vm0, %v6868_v10, %v6869_v22 }
 0x401   : > { %v4268_v15 = vrot.slane %v4252_v53, 6 }
 0x403   : > { %v4279_v17 = vsel %vm1231_vm5, %v4228_v0, %v4268_v15  ;;  %v4278_v4 = vsel %vm1229_vm4, %v4228_v0, %v4268_v15 }
 0x404   : > { %v4280_v46 = vrot.slane %v4279_v17, 2  ;;  %v4301_v21 = vrot.slane %v4278_v4, 1  ;;  %v4351_v56 = vmax.f32 %v9284_v2, %v4278_v4 }
 0x406   : > { %v4302_v19 = vrot.slane %v4280_v46, 1  ;;  %v4352_v61 = vmax.f32 %v9289_v33, %v4301_v21  ;;  %v4353_v27 = vmax.f32 %v9291_v39, %v4280_v46  ;;  %v4389_v60 = vperm.slane %v4351_v56, 0  ;;  %v6724_v21 = vld [vmem:[%s10077_s7 + $0xb0] sm:$0xff] }
 0x407   : > { %v4390_v13 = vperm.slane %v4351_v56, 2  ;;  %4717 = vmatpush.bf16.msra.mxu0 %v6724_v21 }
 0x408   : > { %v4354_v43 = vmax.f32 %v9295_v51, %v4302_v19  ;;  %v4477_v52 = vperm.slane %v4352_v61, 0  ;;  %v4478_v23 = vperm.slane %v4352_v61, 2  ;;  %v4938_v41 = vperm.slane %v4353_v27, 0  ;;  %v6732_v61 = vld [vmem:[%s10077_s7 + $0xf0] sm:$0xff] }
 0x409   : > { %v4939_v2 = vperm.slane %v4353_v27, 2  ;;  %v4421_v39 = vpack.c.bf16 %v4389_v60, %v4389_v60  ;;  %v4422_v53 = vpack.c.bf16 %v4390_v13, %v4390_v13  ;;  %4730 = vmatpush.bf16.msra.mxu1 %v6732_v61 }
 0x40a   : > { %v5214_v15 = vperm.slane %v4354_v43, 0  ;;  %v5215_v0 = vperm.slane %v4354_v43, 2  ;;  %v4509_v17 = vpack.c.bf16 %v4477_v52, %v4477_v52  ;;  %v4970_v51 = vpack.c.bf16 %v4938_v41, %v4938_v41 }
 0x40b   : > { %v6862_v24 = vpop.permute.xlu1 %6861  ;;  %v4971_v38 = vpack.c.bf16 %v4939_v2, %v4939_v2 }
 0x40c   : > { %v6864_v36 = vunpack.i.h.bf16 %v6862_v24  ;;  %v6863_v18 = vunpack.i.l.bf16 %v6862_v24  ;;  %v4510_v24 = vpack.c.bf16 %v4478_v23, %v4478_v23  ;;  %v5246_v19 = vpack.c.bf16 %v5214_v15, %v5214_v15 }
 0x40d   : > { %v5247_v56 = vpack.c.bf16 %v5215_v0, %v5215_v0  ;;  %v4574_v27 = vunpack.c.l.b16 %v4509_v17  ;;  %v5035_v60 = vunpack.c.l.b16 %v4970_v51  ;;  %v5036_v13 = vunpack.c.l.b16 %v4971_v38 }
 0x40e   : > { %v4251_v9 = vsel %vm4226_vm0, %v6864_v36, %v6863_v18  ;;  %v4227_v10 = vsel %vm4226_vm0, %v6863_v18, %v6864_v36  ;;  %v6708_v36 = vld [vmem:[%s10077_s7 + $0x30] sm:$0xff]  ;;  %v4760_v18 = vunpack.c.l.b16 %v4421_v39  ;;  %v4575_v43 = vunpack.c.l.b16 %v4510_v24 }
 0x40f   : > { %v4267_v47 = vrot.slane %v4251_v9, 6  ;;  %4903 = vmatpush.bf16.msrb.mxu2 %v6708_v36  ;;  %v5311_v2 = vunpack.c.l.b16 %v5246_v19  ;;  %v9565_v17 = vrot.slane %v5036_v13, 7  ;;  %v6723_v19 = vld [vmem:[%s10077_s7 + $0xa8] sm:$0xff] }
 0x410   : > { %v9554_v41 = vrot.slane %v4760_v18, 7  ;;  %v9561_v0 = vrot.slane %v4575_v43, 7  ;;  %v6715_v18 = vld [vmem:[%s10077_s7 + $0x68] sm:$0xff]  ;;  %4718 = vmatpush.bf16.msra.mxu0 %v6723_v19 }
 0x411   : > { %v4275_v33 = vsel %vm1229_vm4, %v4227_v10, %v4267_v47  ;;  %v4276_v9 = vsel %vm1231_vm5, %v4227_v10, %v4267_v47  ;;  %v9556_v10 = vrot.slane %v4574_v27, 7  ;;  %v9568_v38 = vrot.slane %v5311_v2, 7  ;;  %4917 = vmatpush.bf16.msrb.mxu3 %v6715_v18 }
 0x412   : > { %v4299_v46 = vrot.slane %v4275_v33, 1  ;;  %v4277_v47 = vrot.slane %v4276_v9, 2  ;;  %v4347_v23 = vmax.f32 %v9246_v44, %v4275_v33 }
 0x413   : > { %v6877_v25 = vpop.permute.xlu2 %6876 }
 0x414   : > { %v6879_v34 = vunpack.i.h.bf16 %v6877_v25  ;;  %v6878_v1 = vunpack.i.l.bf16 %v6877_v25  ;;  %v4761_v25 = vunpack.c.l.b16 %v4422_v53  ;;  %v4300_v24 = vrot.slane %v4277_v47, 1 }
 0x415   : > { %v4387_v51 = vperm.slane %v4347_v23, 0  ;;  %v9574_v21 = vmax.f32 %v9257_v40, %v4277_v47  ;;  %v6731_v40 = vld [vmem:[%s10077_s7 + $0xe8] sm:$0xff] }
 0x416   : > { %v4254_v50 = vsel %vm4226_vm0, %v6879_v34, %v6878_v1  ;;  %v4230_v4 = vsel %vm4226_vm0, %v6878_v1, %v6879_v34  ;;  %v9558_v39 = vrot.slane %v4761_v25, 7  ;;  %4731 = vmatpush.bf16.msra.mxu1 %v6731_v40 }
 0x417   : > { %v4270_v22 = vrot.slane %v4254_v50, 6  ;;  %v4348_v50 = vmax.f32 %v9255_v20, %v4299_v46  ;;  %v9563_v20 = vrot.slane %v5035_v60, 7  ;;  %v4388_v46 = vperm.slane %v4347_v23, 2 }
 0x419   : > { %v4284_v26 = vsel %vm1229_vm4, %v4230_v4, %v4270_v22  ;;  %v4285_v57 = vsel %vm1231_vm5, %v4230_v4, %v4270_v22  ;;  %v5312_v22 = vunpack.c.l.b16 %v5247_v56  ;;  %v4476_v56 = vperm.slane %v4348_v50, 2 }
 0x41a   : > { %v4286_v34 = vrot.slane %v4285_v57, 2  ;;  %v4305_v1 = vrot.slane %v4284_v26, 1  ;;  %v4359_v52 = vmax.f32 %v9344_v49, %v4284_v26  ;;  %v4475_v49 = vperm.slane %v4348_v50, 0 }
 0x41b   : > { %v9570_v26 = vrot.slane %v5312_v22, 7  ;;  %v9593_v13 = vpack.c.bf16 %v4388_v46, %v4388_v46  ;;  %v4508_v22 = vpack.c.bf16 %v4476_v56, %v4476_v56 }
 0x41c   : > { %v4306_v53 = vrot.slane %v4286_v34, 1  ;;  %v4360_v15 = vmax.f32 %v9350_v35, %v4305_v1  ;;  %v4361_v44 = vmax.f32 %v9360_v3, %v4286_v34  ;;  %v4393_v33 = vperm.slane %v4359_v52, 0  ;;  %v6707_v3 = vld [vmem:[%s10077_s7 + $0x28] sm:$0xff] }
 0x41d   : > { %v4394_v57 = vperm.slane %v4359_v52, 2  ;;  %v4507_v9 = vpack.c.bf16 %v4475_v49, %v4475_v49  ;;  %v9589_v34 = vmax.f32 %v9259_v42, %v4300_v24  ;;  %v9591_v1 = vpack.c.bf16 %v4387_v51, %v4387_v51  ;;  %4904 = vmatpush.bf16.msrb.mxu2 %v6707_v3 }
 0x41e   : > { %v4362_v35 = vmax.f32 %v9371_v63, %v4306_v53  ;;  %v4481_v36 = vperm.slane %v4360_v15, 0  ;;  %v4482_v45 = vperm.slane %v4360_v15, 2  ;;  %v4425_v27 = vpack.c.bf16 %v4393_v33, %v4393_v33 }
 0x41f   : > { %v4942_v25 = vperm.slane %v4361_v44, 0  ;;  %v4426_v43 = vpack.c.bf16 %v4394_v57, %v4394_v57  ;;  %v4943_v60 = vperm.slane %v4361_v44, 2  ;;  %v4572_v53 = vunpack.c.l.b16 %v4507_v9 }
 0x420   : > { %v6872_v4 = vpop.permute.xlu0 %6871  ;;  %v4513_v52 = vpack.c.bf16 %v4481_v36, %v4481_v36  ;;  %v4514_v47 = vpack.c.bf16 %v4482_v45, %v4482_v45  ;;  %v5218_v23 = vperm.slane %v4362_v35, 0  ;;  %v4936_v42 = vperm.slane %v9574_v21, 0 }
 0x421   : > { %v6874_v63 = vunpack.i.h.bf16 %v6872_v4  ;;  %v6873_v61 = vunpack.i.l.bf16 %v6872_v4  ;;  %v4764_v49 = vunpack.c.l.b16 %v4425_v27  ;;  %v4974_v33 = vpack.c.bf16 %v4942_v25, %v4942_v25 }
 0x422   : > { %v4975_v4 = vpack.c.bf16 %v4943_v60, %v4943_v60  ;;  %v5219_v57 = vperm.slane %v4362_v35, 2  ;;  %v4578_v45 = vunpack.c.l.b16 %v4513_v52  ;;  %v4579_v3 = vunpack.c.l.b16 %v4514_v47 }
 0x423   : > { %v4253_v50 = vsel %vm4226_vm0, %v6874_v63, %v6873_v61  ;;  %v4229_v15 = vsel %vm4226_vm0, %v6873_v61, %v6874_v63  ;;  %v4765_v18 = vunpack.c.l.b16 %v4426_v43  ;;  %v5250_v19 = vpack.c.bf16 %v5218_v23, %v5218_v23 }
 0x424   : > { %v4269_v2 = vrot.slane %v4253_v50, 6  ;;  %v5039_v40 = vunpack.c.l.b16 %v4974_v33  ;;  %v4573_v27 = vunpack.c.l.b16 %v4508_v22  ;;  %v5040_v35 = vunpack.c.l.b16 %v4975_v4 }
 0x425   : > { %v9605_v60 = vpack.c.bf16 %v5219_v57, %v5219_v57  ;;  %v9608_v43 = vrot.slane %v4578_v45, 5  ;;  %v9610_v47 = vrot.slane %v4579_v3, 5  ;;  %v9612_v23 = vrot.slane %v4765_v18, 5  ;;  %v6706_v3 = vld [vmem:[%s10077_s7 + $0x20] sm:$0xff] }
 0x426   : > { %v4281_v44 = vsel %vm1229_vm4, %v4229_v15, %v4269_v2  ;;  %v4282_v24 = vsel %vm1231_vm5, %v4229_v15, %v4269_v2  ;;  %v9603_v2 = vrot.slane %v4764_v49, 5  ;;  %v9616_v22 = vsel %vm1856_vm7, %v9556_v10, %v4572_v53  ;;  %v6722_v18 = vld [vmem:[%s10077_s7 + $0xa0] sm:$0xff]  ;;  %4905 = vmatpush.bf16.msrb.mxu2 %v6706_v3 }
 0x427   : > { %v4283_v46 = vrot.slane %v4282_v24, 2  ;;  %v4303_v36 = vrot.slane %v4281_v44, 1  ;;  %v4355_v9 = vmax.f32 %v9314_v31, %v4281_v44  ;;  %v5315_v31 = vunpack.c.l.b16 %v5250_v19  ;;  %4719 = vmatpush.bf16.msra.mxu0 %v6722_v18 }
 0x428   : > { %v9619_v33 = vrot.slane %v5039_v40, 5  ;;  %v4937_v57 = vperm.slane %v9574_v21, 2  ;;  %v5212_v10 = vperm.slane %v9589_v34, 0  ;;  %v5213_v53 = vperm.slane %v9589_v34, 2 }
 0x429   : > { %v6892_v51 = vpop.permute.xlu2 %6891  ;;  %v4304_v25 = vrot.slane %v4283_v46, 1  ;;  %v4356_v50 = vmax.f32 %v9320_v48, %v4303_v36  ;;  %v4357_v52 = vmax.f32 %v9326_v28, %v4283_v46  ;;  %v4391_v15 = vperm.slane %v4355_v9, 0 }
 0x42a   : > { %v6894_v63 = vunpack.i.h.bf16 %v6892_v51  ;;  %v6893_v61 = vunpack.i.l.bf16 %v6892_v51  ;;  %v4392_v48 = vperm.slane %v4355_v9, 2  ;;  %10348 = vst [vmem:[#allocation29_spill] sm:$0xff] %v9619_v33  ;;  %v9622_v51 = vrot.slane %v5040_v35, 5  ;;  %v6730_v9 = vld [vmem:[%s10077_s7 + $0xe0] sm:$0xff] }
 0x42b   : > { %v4358_v44 = vmax.f32 %v9328_v58, %v4304_v25  ;;  %v4479_v28 = vperm.slane %v4356_v50, 0  ;;  %v4480_v24 = vperm.slane %v4356_v50, 2  ;;  %v4940_v46 = vperm.slane %v4357_v52, 0  ;;  %v6714_v58 = vld [vmem:[%s10077_s7 + $0x60] sm:$0xff]  ;;  %4732 = vmatpush.bf16.msra.mxu1 %v6730_v9 }
 0x42c   : > { %v4257_v49 = vsel %vm4226_vm0, %v6894_v63, %v6893_v61  ;;  %10349 = vst [vmem:[#allocation32_spill] sm:$0xff] %v9622_v51  ;;  %v4968_v36 = vpack.c.bf16 %v4936_v42, %v4936_v42  ;;  %v9639_v21 = vsel %vm1856_vm7, %v9561_v0, %v4573_v27  ;;  %v4423_v42 = vpack.c.bf16 %v4391_v15, %v4391_v15 }
 0x42d   : > { %v4273_v45 = vrot.slane %v4257_v49, 6  ;;  %v4424_v19 = vpack.c.bf16 %v4392_v48, %v4392_v48  ;;  %v4941_v34 = vperm.slane %v4357_v52, 2  ;;  %v9644_v40 = vrot.slane %v5315_v31, 5  ;;  %4918 = vmatpush.bf16.msrb.mxu3 %v6714_v58 }
 0x42e   : > { %v4511_v25 = vpack.c.bf16 %v4479_v28, %v4479_v28  ;;  %v4512_v50 = vpack.c.bf16 %v4480_v24, %v4480_v24  ;;  %v5216_v35 = vperm.slane %v4358_v44, 0  ;;  %v4759_v49 = vunpack.c.l.b16 %v9593_v13 }
 0x42f   : > { %v4969_v4 = vpack.c.bf16 %v4937_v57, %v4937_v57  ;;  %v4972_v56 = vpack.c.bf16 %v4940_v46, %v4940_v46  ;;  %v4233_v0 = vsel %vm4226_vm0, %v6893_v61, %v6894_v63  ;;  %v5033_v27 = vunpack.c.l.b16 %v4968_v36 }
 0x430   : > { %v5244_v52 = vpack.c.bf16 %v5212_v10, %v5212_v10  ;;  %v5245_v15 = vpack.c.bf16 %v5213_v53, %v5213_v53  ;;  %v4293_v48 = vsel %vm1229_vm4, %v4233_v0, %v4273_v45  ;;  %v4762_v31 = vunpack.c.l.b16 %v4423_v42 }
 0x431   : > { %v4763_v51 = vunpack.c.l.b16 %v4424_v19  ;;  %v4973_v28 = vpack.c.bf16 %v4941_v34, %v4941_v34  ;;  %v4294_v24 = vsel %vm1231_vm5, %v4233_v0, %v4273_v45  ;;  %v4576_v3 = vunpack.c.l.b16 %v4511_v25 }
 0x432   : > { %v4577_v58 = vunpack.c.l.b16 %v4512_v50  ;;  %v5217_v33 = vperm.slane %v4358_v44, 2  ;;  %v5248_v13 = vpack.c.bf16 %v5216_v35, %v5216_v35  ;;  %v10350_v57 = vunpack.c.l.b16 %v9591_v1 }
 0x433   : > { %v4789_v61 = vsel %vm1856_vm7, %v9558_v39, %v4759_v49  ;;  %v5034_v46 = vunpack.c.l.b16 %v4969_v4  ;;  %v5037_v36 = vunpack.c.l.b16 %v4972_v56  ;;  %v5050_v10 = vsel %vm1856_vm7, %v9563_v20, %v5033_v27  ;;  %v6721_v27 = vld [vmem:[%s10077_s7 + $0x98] sm:$0xff] }
 0x434   : > { %v4775_v63 = vsel %vm1856_vm7, %v9554_v41, %v10350_v57  ;;  %v5309_v53 = vunpack.c.l.b16 %v5244_v52  ;;  %v5310_v18 = vunpack.c.l.b16 %v5245_v15  ;;  %v4295_v45 = vrot.slane %v4294_v24, 2  ;;  %v6882_v42 = vpop.permute.xlu0 %6881  ;;  %v6729_v15 = vld [vmem:[%s10077_s7 + $0xd8] sm:$0xff]  ;;  %4720 = vmatpush.bf16.msra.mxu0 %v6721_v27  ;;  %v6720_v57 = vld [vmem:[%s10077_s7 + $0x90] sm:$0xff] }
 0x435   : > { %v4776_v19 = vrot.slane %v4762_v31, 6  ;;  %v4790_v44 = vrot.slane %v4763_v51, 6  ;;  %v5038_v34 = vunpack.c.l.b16 %v4973_v28  ;;  %v4311_v9 = vrot.slane %v4293_v48, 1  ;;  %4733 = vmatpush.bf16.msra.mxu1 %v6729_v15 }
 0x436   : > { %v4590_v1 = vrot.slane %v4576_v3, 6  ;;  %v4604_v25 = vrot.slane %v4577_v58, 6  ;;  %v5249_v50 = vpack.c.bf16 %v5217_v33, %v5217_v33  ;;  %v5313_v41 = vunpack.c.l.b16 %v5248_v13  ;;  %v6705_v33 = vld [vmem:[%s10077_s7 + $0x18] sm:$0xff] }
 0x437   : > { %v5051_v35 = vrot.slane %v5037_v36, 6  ;;  %v4371_v39 = vmax.f32 %v9433_v30, %v4293_v48  ;;  %v6884_v4 = vunpack.i.h.bf16 %v6882_v42  ;;  %v6883_v56 = vunpack.i.l.bf16 %v6882_v42  ;;  %v6713_v30 = vld [vmem:[%s10077_s7 + $0x58] sm:$0xff]  ;;  %4906 = vmatpush.bf16.msrb.mxu2 %v6705_v33 }
 0x438   : > { %v5064_v20 = vsel %vm1856_vm7, %v9565_v17, %v5034_v46  ;;  %v5326_v49 = vsel %vm1856_vm7, %v9568_v38, %v5309_v53  ;;  %v5340_v51 = vsel %vm1856_vm7, %v9570_v26, %v5310_v18  ;;  %v4312_v0 = vrot.slane %v4295_v45, 1  ;;  %4919 = vmatpush.bf16.msrb.mxu3 %v6713_v30  ;;  %4721 = vmatpush.bf16.msra.mxu0 %v6720_v57  ;;  %v6757_v57 = vld [vmem:[%s10077_s7 + $0x1b8] sm:$0xff] }
 0x439   : > { %v9675_v17 = vsel %vm1858_vm8, %v4776_v19, %v4775_v63  ;;  %v9678_v38 = vsel %vm1858_vm8, %v4790_v44, %v4789_v61  ;;  %v5065_v26 = vrot.slane %v5038_v34, 6  ;;  %v4372_v52 = vmax.f32 %v9440_v12, %v4311_v9  ;;  %v6704_v12 = vld [vmem:[%s10077_s7 + $0x10] sm:$0xff] }
 0x43a   : > { %v9686_v48 = vsel %vm1858_vm8, %v4590_v1, %v9616_v22  ;;  %v9690_v31 = vsel %vm1858_vm8, %v4604_v25, %v9639_v21  ;;  %v5314_v28 = vunpack.c.l.b16 %v5249_v50  ;;  %v9693_v24 = vmax.f32 %v9469_v7, %v4295_v45  ;;  %v6712_v22 = vld [vmem:[%s10077_s7 + $0x50] sm:$0xff]  ;;  %v6711_v1 = vld [vmem:[%s10077_s7 + $0x48] sm:$0xff] }
 0x43b   : > { %v9704_v58 = vsel %vm1858_vm8, %v5051_v35, %v5050_v10  ;;  %v5327_v21 = vrot.slane %v5313_v41, 6  ;;  %v4399_v13 = vperm.slane %v4371_v39, 0  ;;  %v4255_v7 = vsel %vm4226_vm0, %v6884_v4, %v6883_v56  ;;  %v6728_v63 = vld [vmem:[%s10077_s7 + $0xd0] sm:$0xff]  ;;  %4907 = vmatpush.bf16.msrb.mxu2 %v6704_v12 }
 0x43c   : > { %v9695_v3 = vpop.permute.xlu1 %6886  ;;  %v9714_v61 = vmax.f32 %v9471_v62, %v4312_v0  ;;  %v4400_v46 = vperm.slane %v4371_v39, 2  ;;  %v4231_v36 = vsel %vm4226_vm0, %v6883_v56, %v6884_v4  ;;  %v4271_v10 = vrot.slane %v4255_v7, 6  ;;  %4920 = vmatpush.bf16.msrb.mxu3 %v6712_v22  ;;  %v6703_v62 = vld [vmem:[%s10077_s7 + $0x8] sm:$0xff]  ;;  %4734 = vmatpush.bf16.msra.mxu1 %v6728_v63  ;;  %v6710_v7 = vld [vmem:[%s10077_s7 + $0x40] sm:$0xff]  ;;  %v6765_v63 = vld [vmem:[%s10077_s7 + $0x1f8] sm:$0xff] }
 0x43d   : > { %v4487_v53 = vperm.slane %v4372_v52, 0  ;;  %v4488_v18 = vperm.slane %v4372_v52, 2  ;;  %v6889_v45 = vunpack.i.h.bf16 %v9695_v3  ;;  %v6888_v42 = vunpack.i.l.bf16 %v9695_v3 }
 0x43e   : > { %v9720_v19 = vsel %vm1858_vm8, %v5065_v26, %v5064_v20  ;;  %v5341_v44 = vrot.slane %v5314_v28, 6  ;;  %v4948_v34 = vperm.slane %v9693_v24, 0  ;;  %v4287_v9 = vsel %vm1229_vm4, %v4231_v36, %v4271_v10 }
 0x43f   : > { %v10351_v25 = vunpack.c.l.b16 %v9605_v60  ;;  %v9735_v41 = vsel %vm1858_vm8, %v5327_v21, %v5326_v49  ;;  %v4431_v35 = vpack.c.bf16 %v4399_v13, %v4399_v13  ;;  %v4288_v39 = vsel %vm1231_vm5, %v4231_v36, %v4271_v10  ;;  %4908 = vmatpush.bf16.msrb.mxu2 %v6703_v62  ;;  %v6718_v36 = vld [vmem:[%s10077_s7 + $0x80] sm:$0xff] }
 0x440   : > { %v4432_v4 = vpack.c.bf16 %v4400_v46, %v4400_v46  ;;  %v4949_v56 = vperm.slane %v9693_v24, 2  ;;  %v5224_v20 = vperm.slane %v9714_v61, 0  ;;  %v4307_v0 = vrot.slane %v4287_v9, 1  ;;  %4921 = vmatpush.bf16.msrb.mxu3 %v6711_v1  ;;  %v6727_v24 = vld [vmem:[%s10077_s7 + $0xc8] sm:$0xff]  ;;  %v6726_v10 = vld [vmem:[%s10077_s7 + $0xc0] sm:$0xff] }
 0x441   : > { %v9732_v50 = vrot.slane %v10351_v25, 5  ;;  %v4519_v30 = vpack.c.bf16 %v4487_v53, %v4487_v53  ;;  %v4520_v60 = vpack.c.bf16 %v4488_v18, %v4488_v18  ;;  %v4363_v27 = vmax.f32 %v9373_v29, %v4287_v9  ;;  %v6719_v29 = vld [vmem:[%s10077_s7 + $0x88] sm:$0xff]  ;;  %4735 = vmatpush.bf16.msra.mxu1 %v6727_v24  ;;  %v6749_v9 = vld [vmem:[%s10077_s7 + $0x178] sm:$0xff] }
 0x442   : > { %v9748_v49 = vsel %vm4226_vm0, %v6889_v45, %v6888_v42  ;;  %v9751_v26 = vsel %vm1858_vm8, %v5341_v44, %v5340_v51  ;;  %v9753_v52 = vpack.c.bf16 %v4948_v34, %v4948_v34  ;;  %v5225_v15 = vperm.slane %v9714_v61, 2  ;;  %v6702_v51 = vld [vmem:[%s10077_s7] sm:$0xff]  ;;  %4722 = vmatpush.bf16.msra.mxu0 %v6719_v29  ;;  %v6748_v29 = vld [vmem:[%s10077_s7 + $0x170] sm:$0xff] }
 0x443   : > { %v4289_v28 = vrot.slane %v4288_v39, 2  ;;  %v4770_v12 = vunpack.c.l.b16 %v4431_v35  ;;  %v9768_v22 = vsel %vm1860_vm9, %v9603_v2, %v9675_v17  ;;  %v4771_v61 = vunpack.c.l.b16 %v4432_v4  ;;  %4909 = vmatpush.bf16.msrb.mxu2 %v6702_v51 }
 0x444   : > { %v9781_v46 = vpack.c.bf16 %v4949_v56, %v4949_v56  ;;  %v4364_v2 = vmax.f32 %v9380_v5, %v4307_v0  ;;  %v4272_v17 = vrot.slane %v9748_v49, 6  ;;  %v4584_v53 = vunpack.c.l.b16 %v4519_v30  ;;  %v6741_v5 = vld [vmem:[%s10077_s7 + $0x138] sm:$0xff]  ;;  %4922 = vmatpush.bf16.msrb.mxu3 %v6710_v7  ;;  %v6756_v0 = vld [vmem:[%s10077_s7 + $0x1b0] sm:$0xff] }
 0x445   : > { %v9740_v33 = vpop.permute.xlu0 %6896  ;;  %v4585_v18 = vunpack.c.l.b16 %v4520_v60  ;;  %v9791_v44 = vpack.c.bf16 %v5224_v20, %v5224_v20  ;;  %v4395_v34 = vperm.slane %v4363_v27, 0  ;;  %v5045_v62 = vunpack.c.l.b16 %v9753_v52  ;;  %4736 = vmatpush.bf16.msra.mxu1 %v6726_v10 }
 0x446   : > { %v6899_v21 = vunpack.i.h.bf16 %v9740_v33  ;;  %v6898_v13 = vunpack.i.l.bf16 %v9740_v33  ;;  %v9800_v1 = vpack.c.bf16 %v5225_v15, %v5225_v15  ;;  %v4308_v25 = vrot.slane %v4289_v28, 1  ;;  %4723 = vmatpush.bf16.msra.mxu0 %v6718_v36  ;;  %v6763_v36 = vld [vmem:[%s10077_s7 + $0x1e8] sm:$0xff] }
 0x447   : > { %v4396_v35 = vperm.slane %v4363_v27, 2  ;;  %v9802_v39 = vrot.slane %v4770_v12, 2  ;;  %v9805_v4 = vmax.f32 %v9390_v11, %v4289_v28  ;;  %v4232_v56 = vsel %vm4226_vm0, %v6888_v42, %v6889_v45  ;;  %5453 = vmatpush.bf16.msra.mxu2 %v6757_v57  ;;  %v6764_v11 = vld [vmem:[%s10077_s7 + $0x1f0] sm:$0xff] }
 0x448   : > { %v4258_v20 = vsel %vm4226_vm0, %v6899_v21, %v6898_v13  ;;  %5466 = vmatpush.bf16.msra.mxu3 %v6765_v63  ;;  %v9821_v30 = vrot.slane %v4771_v61, 2  ;;  %v4483_v60 = vperm.slane %v4364_v2, 0  ;;  %v4484_v3 = vperm.slane %v4364_v2, 2  ;;  %v6740_v28 = vld [vmem:[%s10077_s7 + $0x130] sm:$0xff] }
 0x449   : > { %v4290_v45 = vsel %vm1229_vm4, %v4232_v56, %v4272_v17  ;;  %v9824_v42 = vrot.slane %v4584_v53, 2  ;;  %v9826_v27 = vrot.slane %v4585_v18, 2  ;;  %v5321_v49 = vunpack.c.l.b16 %v9791_v44  ;;  %5190 = vmatpush.bf16.msrb.mxu1 %v6749_v9  ;;  %v6747_v9 = vld [vmem:[%s10077_s7 + $0x168] sm:$0xff] }
 0x44a   : > { %v4427_v15 = vpack.c.bf16 %v4395_v34, %v4395_v34  ;;  %5177 = vmatpush.bf16.msrb.mxu0 %v6741_v5  ;;  %v4366_v24 = vmax.f32 %v9408_v59, %v4308_v25  ;;  %v4428_v51 = vpack.c.bf16 %v4396_v35, %v4396_v35  ;;  %v9839_v12 = vsel %vm1860_vm9, %v9612_v23, %v9678_v38  ;;  %v6755_v59 = vld [vmem:[%s10077_s7 + $0x1a8] sm:$0xff] }
 0x44b   : > { %v4274_v7 = vrot.slane %v4258_v20, 6  ;;  %v4944_v57 = vperm.slane %v9805_v4, 0  ;;  %v4291_v63 = vsel %vm1231_vm5, %v4232_v56, %v4272_v17  ;;  %v4309_v61 = vrot.slane %v4290_v45, 1  ;;  %5454 = vmatpush.bf16.msra.mxu2 %v6756_v0  ;;  %v6739_v5 = vld [vmem:[%s10077_s7 + $0x128] sm:$0xff]  ;;  %v6754_v0 = vld [vmem:[%s10077_s7 + $0x1a0] sm:$0xff] }
 0x44c   : > { %v4367_v2 = vmax.f32 %v9403_v37, %v4290_v45  ;;  %5467 = vmatpush.bf16.msra.mxu3 %v6764_v11  ;;  %v4515_v23 = vpack.c.bf16 %v4483_v60, %v4483_v60  ;;  %v4516_v38 = vpack.c.bf16 %v4484_v3, %v4484_v3  ;;  %v4292_v10 = vrot.slane %v4291_v63, 2 }
 0x44d   : > { %v4234_v17 = vsel %vm4226_vm0, %v6898_v13, %v6899_v21  ;;  %v4766_v53 = vunpack.c.l.b16 %v4427_v15  ;;  %v4368_v37 = vmax.f32 %v9410_v16, %v4309_v61  ;;  %5191 = vmatpush.bf16.msrb.mxu1 %v6748_v29  ;;  %v4767_v25 = vunpack.c.l.b16 %v4428_v51  ;;  %v6746_v51 = vld [vmem:[%s10077_s7 + $0x160] sm:$0xff] }
 0x44e   : > { %v4397_v18 = vperm.slane %v4367_v2, 0  ;;  %v4398_v34 = vperm.slane %v4367_v2, 2  ;;  %5178 = vmatpush.bf16.msrb.mxu0 %v6740_v28  ;;  %v4945_v33 = vperm.slane %v9805_v4, 2  ;;  %v5220_v35 = vperm.slane %v4366_v24, 0  ;;  %v6762_v4 = vld [vmem:[%s10077_s7 + $0x1e0] sm:$0xff] }
 0x44f   : > { %v4310_v21 = vrot.slane %v4292_v10, 1  ;;  %v9861_v13 = vpack.c.bf16 %v4944_v57, %v4944_v57  ;;  %v5221_v16 = vperm.slane %v4366_v24, 2  ;;  %v9864_v56 = vmax.f32 %v9438_v6, %v4292_v10  ;;  %5455 = vmatpush.bf16.msra.mxu2 %v6755_v59  ;;  %v6738_v24 = vld [vmem:[%s10077_s7 + $0x120] sm:$0xff]  ;;  %v6761_v10 = vld [vmem:[%s10077_s7 + $0x1d8] sm:$0xff] }
 0x450   : > { %v4296_v20 = vsel %vm1229_vm4, %v4234_v17, %v4274_v7  ;;  %5468 = vmatpush.bf16.msra.mxu3 %v6763_v36  ;;  %v4429_v11 = vpack.c.bf16 %v4397_v18, %v4397_v18  ;;  %v4430_v60 = vpack.c.bf16 %v4398_v34, %v4398_v34  ;;  %v4485_v3 = vperm.slane %v4368_v37, 0 }
 0x451   : > { %v9874_v45 = vsel %vm1231_vm5, %v4234_v17, %v4274_v7  ;;  %v4580_v6 = vunpack.c.l.b16 %v4515_v23  ;;  %v4581_v15 = vunpack.c.l.b16 %v4516_v38  ;;  %v4780_v28 = vrot.slane %v4766_v53, 4  ;;  %5192 = vmatpush.bf16.msrb.mxu1 %v6747_v9  ;;  %v6753_v38 = vld [vmem:[%s10077_s7 + $0x198] sm:$0xff] }
 0x452   : > { %v4486_v29 = vperm.slane %v4368_v37, 2  ;;  %5179 = vmatpush.bf16.msrb.mxu0 %v6739_v5  ;;  %v4794_v57 = vrot.slane %v4767_v25, 4  ;;  %v9882_v63 = vpack.c.bf16 %v4945_v33, %v4945_v33  ;;  %v9884_v61 = vpack.c.bf16 %v5220_v35, %v5220_v35  ;;  %v6737_v25 = vld [vmem:[%s10077_s7 + $0x118] sm:$0xff] }
 0x453   : > { %v4370_v7 = vmax.f32 %v9443_v8, %v4310_v21  ;;  %v5041_v2 = vunpack.c.l.b16 %v9861_v13  ;;  %v9888_v59 = vpack.c.bf16 %v5221_v16, %v5221_v16  ;;  %v4298_v36 = vrot.slane %v9874_v45, 2  ;;  %5456 = vmatpush.bf16.msra.mxu2 %v6754_v0  ;;  %v6745_v33 = vld [vmem:[%s10077_s7 + $0x158] sm:$0xff] }
 0x454   : > { %v4313_v23 = vrot.slane %v4296_v20, 1  ;;  %5469 = vmatpush.bf16.msra.mxu3 %v6762_v4  ;;  %v4517_v17 = vpack.c.bf16 %v4485_v3, %v4485_v3  ;;  %v4768_v53 = vunpack.c.l.b16 %v4429_v11  ;;  %v4769_v8 = vunpack.c.l.b16 %v4430_v60  ;;  %v6752_v3 = vld [vmem:[%s10077_s7 + $0x190] sm:$0xff] }
 0x455   : > { %v4946_v37 = vperm.slane %v9864_v56, 0  ;;  %v9898_v18 = vrot.slane %v4580_v6, 4  ;;  %v9900_v34 = vrot.slane %v4581_v15, 4  ;;  %v4781_v5 = vsel %vm1862_vm10, %v4780_v28, %v9768_v22  ;;  %5193 = vmatpush.bf16.msrb.mxu1 %v6746_v51  ;;  %v6744_v51 = vld [vmem:[%s10077_s7 + $0x150] sm:$0xff] }
 0x456   : > { %v4518_v9 = vpack.c.bf16 %v4486_v29, %v4486_v29  ;;  %5180 = vmatpush.bf16.msrb.mxu0 %v6738_v24  ;;  %v4795_v35 = vsel %vm1862_vm10, %v4794_v57, %v9839_v12  ;;  %v5317_v21 = vunpack.c.l.b16 %v9884_v61  ;;  %v5222_v16 = vperm.slane %v4370_v7, 0  ;;  %v6760_v12 = vld [vmem:[%s10077_s7 + $0x1d0] sm:$0xff] }
 0x457   : > { %v5223_v0 = vperm.slane %v4370_v7, 2  ;;  %v5318_v22 = vunpack.c.l.b16 %v9888_v59  ;;  %v4314_v4 = vrot.slane %v4298_v36, 1  ;;  %v4375_v11 = vmax.f32 %v9464_v32, %v4296_v20  ;;  %5457 = vmatpush.bf16.msra.mxu2 %v6753_v38 }
 0x458   : > { %v4376_v60 = vmax.f32 %v9473_v54, %v4313_v23  ;;  %5470 = vmatpush.bf16.msra.mxu3 %v6761_v10  ;;  %v4582_v45 = vunpack.c.l.b16 %v4517_v17  ;;  %v4782_v6 = vrot.slane %v4768_v53, 3  ;;  %v4796_v15 = vrot.slane %v4769_v8, 3  ;;  %v6736_v54 = vld [vmem:[%s10077_s7 + $0x110] sm:$0xff] }
 0x459   : > { %v9922_v28 = vpack.c.bf16 %v4946_v37, %v4946_v37  ;;  %v4583_v29 = vunpack.c.l.b16 %v4518_v9  ;;  %v4401_v24 = vperm.slane %v4375_v11, 0  ;;  %v4402_v32 = vperm.slane %v4375_v11, 2  ;;  %5194 = vmatpush.bf16.msrb.mxu1 %v6745_v33  ;;  %v6751_v37 = vld [vmem:[%s10077_s7 + $0x188] sm:$0xff] }
 0x45a   : > { %v4489_v20 = vperm.slane %v4376_v60, 0  ;;  %5181 = vmatpush.bf16.msrb.mxu0 %v6737_v25  ;;  %v9930_v57 = vpack.c.bf16 %v5222_v16, %v5222_v16  ;;  %v9932_v7 = vpack.c.bf16 %v5223_v0, %v5223_v0  ;;  %v4378_v23 = vmax.f32 %v9492_v14, %v4314_v4  ;;  %v6759_v9 = vld [vmem:[%s10077_s7 + $0x1c8] sm:$0xff] }
 0x45b   : > { %v4490_v38 = vperm.slane %v4376_v60, 2  ;;  %v4947_v10 = vperm.slane %v9864_v56, 2  ;;  %v4433_v17 = vpack.c.bf16 %v4401_v24, %v4401_v24  ;;  %v4434_v53 = vpack.c.bf16 %v4402_v32, %v4402_v32  ;;  %5458 = vmatpush.bf16.msra.mxu2 %v6752_v3  ;;  %v6735_v60 = vld [vmem:[%s10077_s7 + $0x108] sm:$0xff]  ;;  %v6750_v24 = vld [vmem:[%s10077_s7 + $0x180] sm:$0xff] }
 0x45c   : > { %v4521_v8 = vpack.c.bf16 %v4489_v20, %v4489_v20  ;;  %5471 = vmatpush.bf16.msra.mxu3 %v6760_v12  ;;  %v4596_v25 = vrot.slane %v4582_v45, 3  ;;  %v4783_v33 = vsel %vm1864_vm11, %v4782_v6, %v4781_v5  ;;  %v4797_v14 = vsel %vm1864_vm11, %v4796_v15, %v4795_v35  ;;  %v6743_v3 = vld [vmem:[%s10077_s7 + $0x148] sm:$0xff]  ;;  %v6758_v32 = vld [vmem:[%s10077_s7 + $0x1c0] sm:$0xff] }
 0x45d   : > { %v4522_v16 = vpack.c.bf16 %v4490_v38, %v4490_v38  ;;  %v9945_v56 = vmax.f32 %v9487_v55, %v4298_v36  ;;  %v4772_v4 = vunpack.c.l.b16 %v4433_v17  ;;  %v4773_v11 = vunpack.c.l.b16 %v4434_v53  ;;  %5195 = vmatpush.bf16.msrb.mxu1 %v6744_v51 }
 0x45e   : > { %v4586_v0 = vunpack.c.l.b16 %v4521_v8  ;;  %5182 = vmatpush.bf16.msrb.mxu0 %v6736_v54  ;;  %v4610_v5 = vrot.slane %v4583_v29, 3  ;;  %v5319_v35 = vunpack.c.l.b16 %v9930_v57  ;;  %v5320_v12 = vunpack.c.l.b16 %v9932_v7 }
 0x45f   : > { %v5226_v55 = vperm.slane %v4378_v23, 0  ;;  %v4587_v36 = vunpack.c.l.b16 %v4522_v16  ;;  %v4786_v45 = vrot.slane %v4772_v4, 1  ;;  %v4800_v6 = vrot.slane %v4773_v11, 1  ;;  %5459 = vmatpush.bf16.msra.mxu2 %v6751_v37 }
 0x460   : > { %v5227_v15 = vperm.slane %v4378_v23, 2  ;;  %5472 = vmatpush.bf16.msra.mxu3 %v6759_v9  ;;  %v4600_v29 = vrot.slane %v4586_v0, 1  ;;  %v4785_v20 = vsel %vm1866_vm12, %v9802_v39, %v4783_v33  ;;  %v4799_v54 = vsel %vm1866_vm12, %v9821_v30, %v4797_v14  ;;  %v6734_v39 = vld [vmem:[%s10077_s7 + $0x100] sm:$0xff] }
 0x461   : > { %v4593_v51 = vsel %vm1860_vm9, %v9608_v43, %v9686_v48  ;;  %v4950_v57 = vperm.slane %v9945_v56, 0  ;;  %v4787_v7 = vsel %vm1868_vm13, %v4786_v45, %v4785_v20  ;;  %v4801_v23 = vsel %vm1868_vm13, %v4800_v6, %v4799_v54  ;;  %5196 = vmatpush.bf16.msrb.mxu1 %v6743_v3  ;;  %v6742_v30 = vld [vmem:[%s10077_s7 + $0x140] sm:$0xff] }
 0x462   : > { %v4595_v38 = vsel %vm1862_vm10, %v9898_v18, %v4593_v51  ;;  %5183 = vmatpush.bf16.msrb.mxu0 %v6735_v60  ;;  %v5258_v43 = vpack.c.bf16 %v5226_v55, %v5226_v55  ;;  %v4802_v48 = vpack.c.b16 %v4787_v7, %v4787_v7  ;;  %v4803_v17 = vpack.c.b16 %v4801_v23, %v4801_v23  ;;  %v10353_v7 = vld [vmem:[#allocation32_spill] sm:$0xff] }
 0x463   : > { %v4597_v53 = vsel %vm1864_vm11, %v4596_v25, %v4595_v38  ;;  %v4614_v8 = vrot.slane %v4587_v36, 1  ;;  %v5259_v37 = vpack.c.bf16 %v5227_v15, %v5227_v15  ;;  %v4607_v9 = vsel %vm1860_vm9, %v9610_v47, %v9690_v31  ;;  %5460 = vmatpush.bf16.msra.mxu2 %v6750_v24  ;;  %v10352_v15 = vld [vmem:[#allocation29_spill] sm:$0xff] }
 0x464   : > { %v4599_v18 = vsel %vm1866_vm12, %v9824_v42, %v4597_v53  ;;  %5473 = vmatpush.bf16.msra.mxu3 %v6758_v32  ;;  %v5331_v33 = vrot.slane %v5317_v21, 4  ;;  %v5345_v14 = vrot.slane %v5318_v22, 4  ;;  %4910 = vmatmul.bf16.vlgmr.msrb.gmra.mxu2 %v4802_v48  ;;  %v4609_v16 = vsel %vm1862_vm10, %v9900_v34, %v4607_v9 }
 0x465   : > { %4923 = vmatmul.bf16.vlgmr.msrb.gmra.mxu3 %v4803_v17  ;;  %v4601_v25 = vsel %vm1868_vm13, %v4600_v29, %v4599_v18  ;;  %v4979_v42 = vpack.c.bf16 %v4947_v10, %v4947_v10  ;;  %v4951_v0 = vperm.slane %v9945_v56, 2  ;;  %v4611_v47 = vsel %vm1864_vm11, %v4610_v5, %v4609_v16  ;;  %5197 = vmatpush.bf16.msrb.mxu1 %v6742_v30 }
 0x466   : > { %v4616_v4 = vpack.c.b16 %v4601_v25, %v4601_v25  ;;  %5184 = vmatpush.bf16.msrb.mxu0 %v6734_v39  ;;  %v5043_v31 = vunpack.c.l.b16 %v9922_v28  ;;  %v5333_v61 = vrot.slane %v5319_v35, 3  ;;  %v4982_v59 = vpack.c.bf16 %v4950_v57, %v4950_v57 }
 0x467   : > { %v4613_v21 = vsel %vm1866_vm12, %v9826_v27, %v4611_v47  ;;  %v5347_v22 = vrot.slane %v5320_v12, 3  ;;  %v5323_v11 = vunpack.c.l.b16 %v5258_v43  ;;  %v5324_v60 = vunpack.c.l.b16 %v5259_v37 }
 0x468   : > { %4724 = vmatmul.bf16.vlgmr.msra.gmra.mxu0 %v4616_v4  ;;  %v4615_v34 = vsel %vm1868_vm13, %v4614_v8, %v4613_v21  ;;  %v5322_v10 = vunpack.c.l.b16 %v9800_v1  ;;  %v5042_v56 = vunpack.c.l.b16 %v9882_v63  ;;  %v5055_v3 = vrot.slane %v5041_v2, 4 }
 0x469   : > { %v4617_v5 = vpack.c.b16 %v4615_v34, %v4615_v34  ;;  %v5044_v28 = vunpack.c.l.b16 %v4979_v42  ;;  %v4983_v35 = vpack.c.bf16 %v4951_v0, %v4951_v0  ;;  %v5330_v27 = vsel %vm1860_vm9, %v9644_v40, %v9735_v41 }
 0x46a   : > { %v5344_v12 = vsel %vm1860_vm9, %v9732_v50, %v9751_v26  ;;  %v5057_v55 = vrot.slane %v5043_v31, 3  ;;  %v5047_v36 = vunpack.c.l.b16 %v4982_v59  ;;  %v5332_v1 = vsel %vm1862_vm10, %v5331_v33, %v5330_v27 }
 0x46b   : > { %4737 = vmatmul.bf16.vlgmr.msra.gmra.mxu1 %v4617_v5  ;;  %v5346_v63 = vsel %vm1862_vm10, %v5345_v14, %v5344_v12  ;;  %v5337_v13 = vrot.slane %v5323_v11, 1  ;;  %v5351_v2 = vrot.slane %v5324_v60, 1  ;;  %v5334_v45 = vsel %vm1864_vm11, %v5333_v61, %v5332_v1 }
 0x46c   : > { %v5348_v6 = vsel %vm1864_vm11, %v5347_v22, %v5346_v63  ;;  %v5335_v40 = vrot.slane %v5321_v49, 2  ;;  %v5349_v41 = vrot.slane %v5322_v10, 2  ;;  %v5054_v50 = vsel %vm1860_vm9, %v10352_v15, %v9704_v58  ;;  %v6900_v10 = vld [vmem:[%s10078_s8] ss:$0 sm:$0xff] }
 0x46d   : > { %v5069_v26 = vrot.slane %v5042_v56, 4  ;;  %v5046_v24 = vunpack.c.l.b16 %v9781_v46  ;;  %v5056_v32 = vsel %vm1862_vm10, %v5055_v3, %v5054_v50  ;;  %v5071_v29 = vrot.slane %v5044_v28, 3 }
 0x46e   : > { %v5048_v20 = vunpack.c.l.b16 %v4983_v35  ;;  %v5061_v54 = vrot.slane %v5047_v36, 1  ;;  %v5336_v51 = vsel %vm1866_vm12, %v5335_v40, %v5334_v45  ;;  %v5350_v57 = vsel %vm1866_vm12, %v5349_v41, %v5348_v6 }
 0x46f   : > { %v5058_v44 = vsel %vm1864_vm11, %v5057_v55, %v5056_v32  ;;  %v5059_v49 = vrot.slane %v5045_v62, 2  ;;  %v5068_v58 = vsel %vm1860_vm9, %v10353_v7, %v9720_v19  ;;  %v5338_v46 = vsel %vm1868_vm13, %v5337_v13, %v5336_v51 }
 0x470   : > { %v5352_v23 = vsel %vm1868_vm13, %v5351_v2, %v5350_v57  ;;  %v5070_v38 = vsel %vm1862_vm10, %v5069_v26, %v5068_v58  ;;  %v5075_v39 = vrot.slane %v5048_v20, 1  ;;  %v5073_v48 = vrot.slane %v5046_v24, 2 }
 0x471   : > { %v5060_v30 = vsel %vm1866_vm12, %v5059_v49, %v5058_v44  ;;  %v5072_v43 = vsel %vm1864_vm11, %v5071_v29, %v5070_v38  ;;  %v5353_v17 = vpack.c.b16 %v5338_v46, %v5338_v46  ;;  %v5354_v53 = vpack.c.b16 %v5352_v23, %v5352_v23 }
 0x472   : > { %v5062_v52 = vsel %vm1868_vm13, %v5061_v54, %v5060_v30  ;;  %v5074_v19 = vsel %vm1866_vm12, %v5073_v48, %v5072_v43 }
 0x473   : > { %v5077_v62 = vpack.c.b16 %v5062_v52, %v5062_v52  ;;  %v5076_v8 = vsel %vm1868_vm13, %v5075_v39, %v5074_v19 }
 0x474   : > { %5461 = vmatmul.bf16.vlgmr.msra.gmra.mxu2 %v5353_v17  ;;  %v5078_v37 = vpack.c.b16 %v5076_v8, %v5076_v8 }
 0x475   : > { %5474 = vmatmul.bf16.vlgmr.msra.gmra.mxu3 %v5354_v53 }
 0x478   : > { %5185 = vmatmul.bf16.vlgmr.msrb.gmra.mxu0 %v5077_v62 }
 0x47b   : > { %5198 = vmatmul.bf16.vlgmr.msrb.gmra.mxu1 %v5078_v37 }
 0x4e5   : > { %v4725_v18 = vpop.f32.mrf.mxu0 }
 0x4e7   : > { %v4911_v33 = vpop.f32.mrf.mxu2 }
 0x4e8   : > { %v4738_v9 = vpop.f32.mrf.mxu1  ;;  %v4924_v14 = vpop.f32.mrf.mxu3 }
 0x4e9   : > { %v4739_v4 = vadd.f32 %v4738_v9, %v4725_v18 }
 0x4eb   : > { %v4912_v47 = vadd.f32 %v4911_v33, %v4739_v4 }
 0x4ed   : > { %v4727_v25 = vpop.f32.mrf.mxu0  ;;  %v4925_v21 = vadd.f32 %v4924_v14, %v4912_v47 }
 0x4ef   : > { %v4913_v42 = vpop.f32.mrf.mxu2 }
 0x4f0   : > { %v4740_v16 = vpop.f32.mrf.mxu1  ;;  %v4926_v0 = vpop.f32.mrf.mxu3 }
 0x4f5   : > { %v5186_v31 = vpop.f32.mrf.mxu0 }
 0x4f7   : > { %v5462_v59 = vpop.f32.mrf.mxu2 }
 0x4f8   : > { %v5199_v61 = vpop.f32.mrf.mxu1  ;;  %v5475_v11 = vpop.f32.mrf.mxu3 }
 0x4f9   : > { %v5200_v22 = vadd.f32 %v5199_v61, %v5186_v31  ;;  %v5476_v60 = vadd.f32 %v5475_v11, %v5462_v59 }
 0x4fb   : > { %v5203_v34 = vadd.f32 %v5200_v22, %v4925_v21 }
 0x4fd   : > { %v5479_v56 = vadd.f32 %v5476_v60, %v5203_v34  ;;  %v5188_v3 = vpop.f32.mrf.mxu0 }
 0x4ff   : > { %v5484_v5 = vadd.f32 %v6900_v10, %v5479_v56  ;;  %v5464_v35 = vpop.f32.mrf.mxu2 }
 0x500   : > { %v5201_v28 = vpop.f32.mrf.mxu1  ;;  %v5477_v12 = vpop.f32.mrf.mxu3 }
 0x501   : > { %v5485_v27 = vmax.f32 %v5484_v5, 0.0 }
 0x503   : > { %5487 = vst.msk [vmem:[%s345_s24] sm:$0xff] %vm5486_vm2, %v5485_v27 }
 0x504   : > { %6958 = shalt.err (!%p6955_p8)
}
 0x505   : > { %6770 = dma.vmem_to_hbm [thread:$0]  (%p7092_p5), %s5502_s25, 128, %s5504_s13, %s5489_s26  }
 0x506 PF: > { %p6782_p9 = scmp.ge.s32.totalorder %s6997_s12, 2  ;;  %s5515_s29 = sand.u32 1, %s6985_s30  }
 0x507   : > { %s5516_s21 = scalar_lea.sflag [#allocation4], %s5515_s29 }
 0x508   : > { %p6777_p10 = pnand %p6782_p9, %p7096_p6 }
 0x50a   : > { %p6778_p11 = pneg %p6777_p10 }
 0x50c   : > { %6980 = dma.done.wait (%p6778_p11), %s5516_s21, 128  }
 0x50d   : > { %6982 = vsyncadd (%p6778_p11), %s5516_s21, 4294967168  ;;  %p20_p12 = scmp.ge.s32.totalorder %s7079_s15, 4   ;;  %s10354_s30 = smov %s6989_s10 }
 0x50e   : > { %s10355_s10 = smov %s6993_s11  ;;  %s10356_s11 = smov %s7090_s18 }
 0x50f   : > { %s10357_s12 = smov %s7079_s15  ;;  %22 = sbr.rel (!%p20_p12) target bundleno = 4 (0x4), region = 103 }
 0x514   :  { %5522 = vsyncpa [#allocation3], 1 }
 0x515   :  { %5524 = vsyncpa [#allocation3 + $0x1], 1 }
 0x516   :  { %5525 = vsyncpa [#allocation4], 1 }
 0x517   :  { %5527 = vsyncpa [#allocation4 + $0x1], 1 }

</bundles_post_ra>
